<compile_context>
chip_gen: v6e
topology: v6e:2x2x1
jax: 0.10.0
libtpu: 0.0.40
codegen_flags: <defaults>
</compile_context>

<pallas_src>
import jax
import jax.numpy as jnp
from jax import lax
from jax.experimental import pallas as pl
from jax.experimental.pallas import tpu as pltpu


# ----------------------------------------------------------------------------
# Fused Pallas kernel
# ----------------------------------------------------------------------------
def _up_fused_kernel(x1_ref, x2_ref, wup_ref, bup_ref,
                     w1_ref, s1_ref, b1_ref,
                     w2_ref, s2_ref, b2_ref,
                     o_ref, cat_sc, mid_sc):
    # Per grid step (one batch image):
    #   x1_ref : (1, H1, W1, Cin)     bf16  deep feature map
    #   x2_ref : (1, H2, W2, Cmid)    bf16  skip connection
    #   wup_ref: (Cin, 4*Cmid)        bf16  transpose-conv taps, cols = (kh,kw,c)
    #   bup_ref: (1, 4*Cmid)          f32   transpose-conv bias (tiled x4)
    #   w1_ref : (18*Cmid, Cout)      bf16  conv1, rows = (ky, kx, cin)
    #   w2_ref : (9*Cout, Cout)       bf16  conv2, rows = (ky, kx, cin)
    #   s*/b*  : (1, Cout)            f32   folded BN scale / bias
    #   o_ref  : (1, H2, W2, Cout)    f32
    #   cat_sc : (H2+2, W2+2, 2*Cmid) f32   zero-padded [x2 | upsampled x1]
    #   mid_sc : (H2+2, W2+2, Cout)   f32   zero-padded conv1 output
    _, H1, W1, Cin = x1_ref.shape
    _, H2, W2, Cmid = x2_ref.shape
    Cout = o_ref.shape[3]
    dh, dw = H2 - 2 * H1, W2 - 2 * W1          # static F.pad amounts
    pt, plft = dh // 2, dw // 2

    # --- 1) ConvTranspose2d(k=2, s=2): one MXU matmul, then interleave the ---
    #        four (kh, kw) taps into the 2x-upsampled image in registers.
    xf = x1_ref[0].reshape(H1 * W1, Cin)
    y = jnp.dot(xf, wup_ref[...], preferred_element_type=jnp.float32)
    y = y + bup_ref[...]                                      # (H1*W1, 4*Cmid)
    taps = [y[:, t * Cmid:(t + 1) * Cmid].reshape(H1, W1, Cmid)
            for t in range(4)]                                # t = kh*2 + kw

    col_par = lax.broadcasted_iota(jnp.int32, (H1, 2 * W1, Cmid), 1) % 2

    def interleave_w(t_even, t_odd):
        # (H1, W1, C) pair -> (H1, 2*W1, C) with columns interleaved.
        r_e = jnp.broadcast_to(t_even[:, :, None, :], (H1, W1, 2, Cmid))
        r_o = jnp.broadcast_to(t_odd[:, :, None, :], (H1, W1, 2, Cmid))
        r_e = r_e.reshape(H1, 2 * W1, Cmid)
        r_o = r_o.reshape(H1, 2 * W1, Cmid)
        return jnp.where(col_par == 0, r_e, r_o)

    row_kh0 = interleave_w(taps[0], taps[1]).reshape(H1, 1, 2 * W1, Cmid)
    row_kh1 = interleave_w(taps[2], taps[3]).reshape(H1, 1, 2 * W1, Cmid)
    up = jnp.concatenate([row_kh0, row_kh1], axis=1)          # untiled-axis cat
    up = up.reshape(2 * H1, 2 * W1, Cmid)

    # --- 2) F.pad + conv halo + channel concat in ONE VMEM scratch image. ----
    #        lanes [0:Cmid] = x2, lanes [Cmid:2*Cmid] = upsampled + padded x1.
    cat_sc[...] = jnp.zeros_like(cat_sc)
    cat_sc[1:H2 + 1, 1:W2 + 1, 0:Cmid] = x2_ref[0].astype(cat_sc.dtype)
    cat_sc[1 + pt:1 + pt + 2 * H1,
           1 + plft:1 + plft + 2 * W1,
           Cmid:2 * Cmid] = up

    def patches(v):
        # zero-padded (H2+2, W2+2, C) image -> 9 shifted (H2, W2, C) taps.
        return [v[dy:dy + H2, dx:dx + W2, :]
                for dy in range(3) for dx in range(3)]

    # --- 3) conv1 as a single im2col dot (K = 18*Cmid) + BN + ReLU. ----------
    cols1 = jnp.concatenate(patches(cat_sc[...]), axis=-1)
    cols1 = cols1.reshape(H2 * W2, 18 * Cmid).astype(jnp.bfloat16)
    h1 = jnp.dot(cols1, w1_ref[...], preferred_element_type=jnp.float32)
    h1 = jnp.maximum(h1 * s1_ref[...] + b1_ref[...], 0.0)

    mid_sc[...] = jnp.zeros_like(mid_sc)
    mid_sc[1:H2 + 1, 1:W2 + 1, :] = h1.reshape(H2, W2, Cout)

    # --- 4) conv2 as a single im2col dot (K = 9*Cout) + BN + ReLU. -----------
    cols2 = jnp.concatenate(patches(mid_sc[...]), axis=-1)
    cols2 = cols2.reshape(H2 * W2, 9 * Cout).astype(jnp.bfloat16)
    h2 = jnp.dot(cols2, w2_ref[...], preferred_element_type=jnp.float32)
    h2 = jnp.maximum(h2 * s2_ref[...] + b2_ref[...], 0.0)
    o_ref[0] = h2.reshape(H2, W2, Cout)


# ----------------------------------------------------------------------------
# Wrapper (NCHW in/out to match the PyTorch module)
# ----------------------------------------------------------------------------
def _fold_bn(conv_b, bn, eps=1e-5):
    gamma, beta, mean, var = bn
    scale = gamma / jnp.sqrt(var + eps)
    bias = beta + scale * (conv_b - mean)
    return scale, bias


def up_forward(x1_nchw, x2_nchw, params):
    """Equivalent of Up.forward(x1, x2) with bilinear=False (BN in eval mode)."""
    x1 = jnp.transpose(x1_nchw, (0, 2, 3, 1)).astype(jnp.bfloat16)   # NHWC
    x2 = jnp.transpose(x2_nchw, (0, 2, 3, 1)).astype(jnp.bfloat16)   # NHWC
    N, H1, W1, Cin = x1.shape
    _, H2, W2, Cmid = x2.shape
    Cout = params["c1_w"].shape[0]
    assert Cin == 2 * Cmid and params["c1_w"].shape[1] == 2 * Cmid
    assert H2 >= 2 * H1 and W2 >= 2 * W1   # TODO(synk): cropping not supported

    # ConvTranspose2d weights (Cin, Cmid, 2, 2) -> (Cin, (kh, kw, c)) slab.
    wup = jnp.transpose(params["up_w"], (0, 2, 3, 1)).reshape(Cin, 4 * Cmid)
    wup = wup.astype(jnp.bfloat16)
    bup = jnp.tile(params["up_b"], 4).reshape(1, 4 * Cmid).astype(jnp.float32)

    # Conv weights -> 2-D (taps * in_channels, Cout) slabs in (ky, kx, cin)
    # row order -- matches the in-kernel im2col column order directly
    # (x2 channels [0:Cmid], upsampled channels [Cmid:2*Cmid] per tap).
    w1 = jnp.transpose(params["c1_w"], (2, 3, 1, 0)).reshape(18 * Cmid, Cout)
    w1 = w1.astype(jnp.bfloat16)
    w2 = jnp.transpose(params["c2_w"], (2, 3, 1, 0)).reshape(9 * Cout, Cout)
    w2 = w2.astype(jnp.bfloat16)

    s1, b1 = _fold_bn(params["c1_b"], params["bn1"])
    s2, b2 = _fold_bn(params["c2_b"], params["bn2"])
    s1 = s1.reshape(1, Cout).astype(jnp.float32)
    b1 = b1.reshape(1, Cout).astype(jnp.float32)
    s2 = s2.reshape(1, Cout).astype(jnp.float32)
    b2 = b2.reshape(1, Cout).astype(jnp.float32)

    const2 = lambda n: (0, 0)
    out = pl.pallas_call(
        _up_fused_kernel,
        out_shape=jax.ShapeDtypeStruct((N, H2, W2, Cout), jnp.float32),
        grid=(N,),
        in_specs=[
            pl.BlockSpec((1, H1, W1, Cin), lambda n: (n, 0, 0, 0)),
            pl.BlockSpec((1, H2, W2, Cmid), lambda n: (n, 0, 0, 0)),
            pl.BlockSpec((Cin, 4 * Cmid), const2),
            pl.BlockSpec((1, 4 * Cmid), const2),
            pl.BlockSpec((18 * Cmid, Cout), const2),
            pl.BlockSpec((1, Cout), const2),
            pl.BlockSpec((1, Cout), const2),
            pl.BlockSpec((9 * Cout, Cout), const2),
            pl.BlockSpec((1, Cout), const2),
            pl.BlockSpec((1, Cout), const2),
        ],
        out_specs=pl.BlockSpec((1, H2, W2, Cout), lambda n: (n, 0, 0, 0)),
        scratch_shapes=[
            pltpu.VMEM((H2 + 2, W2 + 2, 2 * Cmid), jnp.float32),  # padded concat
            pltpu.VMEM((H2 + 2, W2 + 2, Cout), jnp.float32),      # padded conv1 out
        ],
        compiler_params=pltpu.CompilerParams(
            dimension_semantics=("parallel",),
            vmem_limit_bytes=32 * 1024 * 1024,
        ),
    )(x1, x2, wup, bup, w1, s1, b1, w2, s2, b2)
    return jnp.transpose(out, (0, 3, 1, 2))   # back to NCHW


# ----------------------------------------------------------------------------
# Pure-JAX reference (for verification)
# ----------------------------------------------------------------------------
def _ref_forward(x1, x2, params, eps=1e-5):
    x1 = x1.astype(jnp.float32)
    x2 = x2.astype(jnp.float32)
    w = params["up_w"]                                  # (Cin, Cmid, 2, 2)
    y = jnp.einsum("nchw,cokl->nohwkl", x1, w)
    N, Co, H, W, _, _ = y.shape
    y = jnp.transpose(y, (0, 1, 2, 4, 3, 5)).reshape(N, Co, 2 * H, 2 * W)
    y = y + params["up_b"][None, :, None, None]
    dh = x2.shape[2] - y.shape[2]
    dw = x2.shape[3] - y.shape[3]
    y = jnp.pad(y, ((0, 0), (0, 0), (dh // 2, dh - dh // 2),
                    (dw // 2, dw - dw // 2)))
    x = jnp.concatenate([x2, y], axis=1)

    def conv_bn_relu(x, w, b, bn):
        gamma, beta, mean, var = bn
        z = lax.conv_general_dilated(
            x, w, window_strides=(1, 1), padding="SAME",
            dimension_numbers=("NCHW", "OIHW", "NCHW"))
        z = z + b[None, :, None, None]
        z = (gamma[None, :, None, None] * (z - mean[None, :, None, None])
             / jnp.sqrt(var + eps)[None, :, None, None]
             + beta[None, :, None, None])
        return jnp.maximum(z, 0.0)

    x = conv_bn_relu(x, params["c1_w"], params["c1_b"], params["bn1"])
    x = conv_bn_relu(x, params["c2_w"], params["c2_b"], params["bn2"])
    return x


# ----------------------------------------------------------------------------
if __name__ == "__main__":
    key = jax.random.PRNGKey(0)
    in_ch, out_ch = 8, 8
    cmid = in_ch // 2
    N, H1, W1 = 2, 8, 8          # x1 (deep feature map)
    H2, W2 = 16, 16              # x2 (skip connection)

    keys = jax.random.split(key, 8)
    x1 = jax.random.normal(keys[0], (N, in_ch, H1, W1), jnp.float32)
    x2 = jax.random.normal(keys[1], (N, cmid, H2, W2), jnp.float32)

    def bn_params(c, base):
        idx = jnp.arange(c, dtype=jnp.float32)
        return (1.0 + 0.05 * idx + base,   # gamma
                0.02 * idx - base,          # beta
                0.01 * idx,                 # running_mean
                1.0 + 0.1 * idx)            # running_var

    params = {
        "up_w": 0.1 * jax.random.normal(keys[2], (in_ch, cmid, 2, 2), jnp.float32),
        "up_b": 0.1 * jax.random.normal(keys[3], (cmid,), jnp.float32),
        "c1_w": 0.1 * jax.random.normal(keys[4], (out_ch, in_ch, 3, 3), jnp.float32),
        "c1_b": 0.1 * jax.random.normal(keys[5], (out_ch,), jnp.float32),
        "bn1": bn_params(out_ch, 0.0),
        "c2_w": 0.1 * jax.random.normal(keys[6], (out_ch, out_ch, 3, 3), jnp.float32),
        "c2_b": 0.1 * jax.random.normal(keys[7], (out_ch,), jnp.float32),
        "bn2": bn_params(out_ch, 0.1),
    }

    out = jax.jit(up_forward)(x1, x2, params)
    out = jax.block_until_ready(out)
    assert out.shape == (N, out_ch, H2, W2), out.shape

    ref = _ref_forward(x1, x2, params)
    max_err = float(jnp.max(jnp.abs(out - ref)))
    max_ref = float(jnp.max(jnp.abs(ref)))
    # bf16 MXU inputs -> relaxed tolerance vs. f32 reference.
    if max_err <= 0.03 * max(1.0, max_ref):
        print("KERNEL_OK")
    else:
        print(f"MISMATCH max_err={max_err} max_ref={max_ref}")
</pallas_src>

<mosaic_0001>
module attributes {stable_mosaic.version = 11 : i64} {
  func.func @_up_fused_kernel(%arg0: i32, %arg1: memref<1x8x8x8xbf16, #tpu.memory_space<vmem>>, %arg2: memref<1x16x16x4xbf16, #tpu.memory_space<vmem>>, %arg3: memref<8x16xbf16, #tpu.memory_space<vmem>>, %arg4: memref<1x16xf32, #tpu.memory_space<vmem>>, %arg5: memref<72x8xbf16, #tpu.memory_space<vmem>>, %arg6: memref<1x8xf32, #tpu.memory_space<vmem>>, %arg7: memref<1x8xf32, #tpu.memory_space<vmem>>, %arg8: memref<72x8xbf16, #tpu.memory_space<vmem>>, %arg9: memref<1x8xf32, #tpu.memory_space<vmem>>, %arg10: memref<1x8xf32, #tpu.memory_space<vmem>>, %arg11: memref<1x16x16x8xf32, #tpu.memory_space<vmem>>, %arg12: memref<18x18x8xf32, #tpu.memory_space<vmem>>, %arg13: memref<18x18x8xf32, #tpu.memory_space<vmem>>) attributes {dimension_semantics = [#tpu.dimension_semantics<parallel>], iteration_bounds = array<i64: 2>, scalar_prefetch = 0 : i64, scratch_operands = 2 : i64, tpu.core_type = #tpu.core_type<tc>, window_params = [{transform_indices = @transform_0, window_bounds = array<i64: 1, 8, 8, 8>}, {transform_indices = @transform_1, window_bounds = array<i64: 1, 16, 16, 4>}, {pipeline_mode = #tpu.pipeline_mode<synchronous>, transform_indices = @transform_2, window_bounds = array<i64: 8, 16>}, {pipeline_mode = #tpu.pipeline_mode<synchronous>, transform_indices = @transform_3, window_bounds = array<i64: 1, 16>}, {pipeline_mode = #tpu.pipeline_mode<synchronous>, transform_indices = @transform_4, window_bounds = array<i64: 72, 8>}, {pipeline_mode = #tpu.pipeline_mode<synchronous>, transform_indices = @transform_5, window_bounds = array<i64: 1, 8>}, {pipeline_mode = #tpu.pipeline_mode<synchronous>, transform_indices = @transform_6, window_bounds = array<i64: 1, 8>}, {pipeline_mode = #tpu.pipeline_mode<synchronous>, transform_indices = @transform_7, window_bounds = array<i64: 72, 8>}, {pipeline_mode = #tpu.pipeline_mode<synchronous>, transform_indices = @transform_8, window_bounds = array<i64: 1, 8>}, {pipeline_mode = #tpu.pipeline_mode<synchronous>, transform_indices = @transform_9, window_bounds = array<i64: 1, 8>}, {transform_indices = @transform_10, window_bounds = array<i64: 1, 16, 16, 8>}]} {
    %c0 = arith.constant 0 : index
    %c0_0 = arith.constant 0 : index
    %c0_1 = arith.constant 0 : index
    %c0_2 = arith.constant 0 : index
    %0 = vector.load %arg1[%c0, %c0_0, %c0_1, %c0_2] : memref<1x8x8x8xbf16, #tpu.memory_space<vmem>>, vector<1x8x8x8xbf16>
    %1 = vector.shape_cast %0 : vector<1x8x8x8xbf16> to vector<8x8x8xbf16>
    %2 = vector.shape_cast %1 : vector<8x8x8xbf16> to vector<64x8xbf16>
    %c0_3 = arith.constant 0 : index
    %c0_4 = arith.constant 0 : index
    %3 = vector.load %arg3[%c0_3, %c0_4] : memref<8x16xbf16, #tpu.memory_space<vmem>>, vector<8x16xbf16>
    %cst = arith.constant dense<0.000000e+00> : vector<64x16xf32>
    %4 = tpu.matmul %2, %3, %cst {dimension_numbers = #tpu.dot_dimension_numbers<[1], [0], [0], [1], [0, 0, 1, 1], [], []>} : vector<64x8xbf16>, vector<8x16xbf16>, vector<64x16xf32> -> vector<64x16xf32>
    %c0_5 = arith.constant 0 : index
    %c0_6 = arith.constant 0 : index
    %5 = vector.load %arg4[%c0_5, %c0_6] : memref<1x16xf32, #tpu.memory_space<vmem>>, vector<1x16xf32>
    %6 = vector.broadcast %5 : vector<1x16xf32> to vector<64x16xf32>
    %7 = arith.addf %4, %6 : vector<64x16xf32>
    %8 = vector.extract_strided_slice %7 {offsets = [0, 0], sizes = [64, 4], strides = [1, 1]} : vector<64x16xf32> to vector<64x4xf32>
    %9 = vector.shape_cast %8 : vector<64x4xf32> to vector<8x8x4xf32>
    %10 = vector.extract_strided_slice %7 {offsets = [0, 4], sizes = [64, 4], strides = [1, 1]} : vector<64x16xf32> to vector<64x4xf32>
    %11 = vector.shape_cast %10 : vector<64x4xf32> to vector<8x8x4xf32>
    %12 = vector.extract_strided_slice %7 {offsets = [0, 8], sizes = [64, 4], strides = [1, 1]} : vector<64x16xf32> to vector<64x4xf32>
    %13 = vector.shape_cast %12 : vector<64x4xf32> to vector<8x8x4xf32>
    %14 = vector.extract_strided_slice %7 {offsets = [0, 12], sizes = [64, 4], strides = [1, 1]} : vector<64x16xf32> to vector<64x4xf32>
    %15 = vector.shape_cast %14 : vector<64x4xf32> to vector<8x8x4xf32>
    %16 = tpu.iota {dimensions = array<i32: 1>} : vector<8x16x4xi32>
    %c2_i32 = arith.constant 2 : i32
    %c0_i32 = arith.constant 0 : i32
    %17 = arith.cmpi eq, %c2_i32, %c0_i32 : i32
    %c1_i32 = arith.constant 1 : i32
    %18 = arith.select %17, %c1_i32, %c2_i32 : i32
    %19 = vector.broadcast %18 : i32 to vector<8x16x4xi32>
    %20 = arith.remsi %16, %19 : vector<8x16x4xi32>
    %c0_i32_7 = arith.constant 0 : i32
    %21 = vector.broadcast %c0_i32_7 : i32 to vector<8x16x4xi32>
    %22 = arith.cmpi ne, %20, %21 : vector<8x16x4xi32>
    %c0_i32_8 = arith.constant 0 : i32
    %23 = vector.broadcast %c0_i32_8 : i32 to vector<8x16x4xi32>
    %24 = arith.cmpi slt, %20, %23 : vector<8x16x4xi32>
    %c0_i32_9 = arith.constant 0 : i32
    %25 = arith.cmpi slt, %18, %c0_i32_9 : i32
    %26 = vector.broadcast %25 : i1 to vector<8x16x4xi1>
    %27 = vector.broadcast %26 : vector<8x16x4xi1> to vector<8x16x4xi1>
    %28 = arith.xori %24, %27 : vector<8x16x4xi1>
    %29 = arith.andi %28, %22 : vector<8x16x4xi1>
    %30 = vector.broadcast %18 : i32 to vector<8x16x4xi32>
    %31 = arith.addi %20, %30 : vector<8x16x4xi32>
    %32 = arith.select %29, %31, %20 : vector<8x16x4xi1>, vector<8x16x4xi32>
    %33 = vector.shape_cast %9 : vector<8x8x4xf32> to vector<8x8x1x4xf32>
    %34 = vector.shape_cast %33 : vector<8x8x1x4xf32> to vector<8x8x1x4xf32>
    %35 = vector.broadcast %34 : vector<8x8x1x4xf32> to vector<8x8x2x4xf32>
    %36 = vector.shape_cast %11 : vector<8x8x4xf32> to vector<8x8x1x4xf32>
    %37 = vector.shape_cast %36 : vector<8x8x1x4xf32> to vector<8x8x1x4xf32>
    %38 = vector.broadcast %37 : vector<8x8x1x4xf32> to vector<8x8x2x4xf32>
    %39 = vector.shape_cast %35 : vector<8x8x2x4xf32> to vector<8x16x4xf32>
    %40 = vector.shape_cast %38 : vector<8x8x2x4xf32> to vector<8x16x4xf32>
    %c0_i32_10 = arith.constant 0 : i32
    %41 = vector.broadcast %c0_i32_10 : i32 to vector<8x16x4xi32>
    %42 = arith.cmpi eq, %32, %41 : vector<8x16x4xi32>
    %43 = arith.select %42, %39, %40 : vector<8x16x4xi1>, vector<8x16x4xf32>
    %44 = vector.shape_cast %43 : vector<8x16x4xf32> to vector<8x1x16x4xf32>
    %45 = vector.shape_cast %13 : vector<8x8x4xf32> to vector<8x8x1x4xf32>
    %46 = vector.shape_cast %45 : vector<8x8x1x4xf32> to vector<8x8x1x4xf32>
    %47 = vector.broadcast %46 : vector<8x8x1x4xf32> to vector<8x8x2x4xf32>
    %48 = vector.shape_cast %15 : vector<8x8x4xf32> to vector<8x8x1x4xf32>
    %49 = vector.shape_cast %48 : vector<8x8x1x4xf32> to vector<8x8x1x4xf32>
    %50 = vector.broadcast %49 : vector<8x8x1x4xf32> to vector<8x8x2x4xf32>
    %51 = vector.shape_cast %47 : vector<8x8x2x4xf32> to vector<8x16x4xf32>
    %52 = vector.shape_cast %50 : vector<8x8x2x4xf32> to vector<8x16x4xf32>
    %c0_i32_11 = arith.constant 0 : i32
    %53 = vector.broadcast %c0_i32_11 : i32 to vector<8x16x4xi32>
    %54 = arith.cmpi eq, %32, %53 : vector<8x16x4xi32>
    %55 = arith.select %54, %51, %52 : vector<8x16x4xi1>, vector<8x16x4xf32>
    %56 = vector.shape_cast %55 : vector<8x16x4xf32> to vector<8x1x16x4xf32>
    %57 = tpu.concatenate %44, %56 in 1 : vector<8x1x16x4xf32>, vector<8x1x16x4xf32> -> vector<8x2x16x4xf32>
    %58 = vector.shape_cast %57 : vector<8x2x16x4xf32> to vector<16x16x4xf32>
    %cst_12 = arith.constant 0.000000e+00 : f32
    %59 = vector.broadcast %cst_12 : f32 to vector<18x18x8xf32>
    %c0_13 = arith.constant 0 : index
    %c0_14 = arith.constant 0 : index
    %c0_15 = arith.constant 0 : index
    %60 = vector.load %arg12[%c0_13, %c0_14, %c0_15] : memref<18x18x8xf32, #tpu.memory_space<vmem>>, vector<18x18x8xf32>
    tpu.vector_store %arg12[%c0_13, %c0_14, %c0_15], %59 {strides = array<i32>} : memref<18x18x8xf32, #tpu.memory_space<vmem>>, vector<18x18x8xf32>,
    %c0_16 = arith.constant 0 : index
    %c0_17 = arith.constant 0 : index
    %c0_18 = arith.constant 0 : index
    %c0_19 = arith.constant 0 : index
    %61 = vector.load %arg2[%c0_16, %c0_17, %c0_18, %c0_19] : memref<1x16x16x4xbf16, #tpu.memory_space<vmem>>, vector<1x16x16x4xbf16>
    %62 = vector.shape_cast %61 : vector<1x16x16x4xbf16> to vector<16x16x4xbf16>
    %63 = arith.extf %62 : vector<16x16x4xbf16> to vector<16x16x4xf32>
    %c1 = arith.constant 1 : index
    %c1_20 = arith.constant 1 : index
    %c0_21 = arith.constant 0 : index
    %64 = vector.load %arg12[%c1, %c1_20, %c0_21] : memref<18x18x8xf32, #tpu.memory_space<vmem>>, vector<16x16x4xf32>
    tpu.vector_store %arg12[%c1, %c1_20, %c0_21], %63 {strides = array<i32>} : memref<18x18x8xf32, #tpu.memory_space<vmem>>, vector<16x16x4xf32>,
    %c1_22 = arith.constant 1 : index
    %c1_23 = arith.constant 1 : index
    %c4 = arith.constant 4 : index
    %65 = vector.load %arg12[%c1_22, %c1_23, %c4] : memref<18x18x8xf32, #tpu.memory_space<vmem>>, vector<16x16x4xf32>
    tpu.vector_store %arg12[%c1_22, %c1_23, %c4], %58 {strides = array<i32>} : memref<18x18x8xf32, #tpu.memory_space<vmem>>, vector<16x16x4xf32>,
    %c0_24 = arith.constant 0 : index
    %c0_25 = arith.constant 0 : index
    %c0_26 = arith.constant 0 : index
    %66 = vector.load %arg12[%c0_24, %c0_25, %c0_26] : memref<18x18x8xf32, #tpu.memory_space<vmem>>, vector<18x18x8xf32>
    %67 = vector.extract_strided_slice %66 {offsets = [0, 0, 0], sizes = [16, 16, 8], strides = [1, 1, 1]} : vector<18x18x8xf32> to vector<16x16x8xf32>
    %68 = vector.extract_strided_slice %66 {offsets = [0, 1, 0], sizes = [16, 16, 8], strides = [1, 1, 1]} : vector<18x18x8xf32> to vector<16x16x8xf32>
    %69 = vector.extract_strided_slice %66 {offsets = [0, 2, 0], sizes = [16, 16, 8], strides = [1, 1, 1]} : vector<18x18x8xf32> to vector<16x16x8xf32>
    %70 = vector.extract_strided_slice %66 {offsets = [1, 0, 0], sizes = [16, 16, 8], strides = [1, 1, 1]} : vector<18x18x8xf32> to vector<16x16x8xf32>
    %71 = vector.extract_strided_slice %66 {offsets = [1, 1, 0], sizes = [16, 16, 8], strides = [1, 1, 1]} : vector<18x18x8xf32> to vector<16x16x8xf32>
    %72 = vector.extract_strided_slice %66 {offsets = [1, 2, 0], sizes = [16, 16, 8], strides = [1, 1, 1]} : vector<18x18x8xf32> to vector<16x16x8xf32>
    %73 = vector.extract_strided_slice %66 {offsets = [2, 0, 0], sizes = [16, 16, 8], strides = [1, 1, 1]} : vector<18x18x8xf32> to vector<16x16x8xf32>
    %74 = vector.extract_strided_slice %66 {offsets = [2, 1, 0], sizes = [16, 16, 8], strides = [1, 1, 1]} : vector<18x18x8xf32> to vector<16x16x8xf32>
    %75 = vector.extract_strided_slice %66 {offsets = [2, 2, 0], sizes = [16, 16, 8], strides = [1, 1, 1]} : vector<18x18x8xf32> to vector<16x16x8xf32>
    %76 = tpu.concatenate %67, %68, %69, %70, %71, %72, %73, %74, %75 in 2 : vector<16x16x8xf32>, vector<16x16x8xf32>, vector<16x16x8xf32>, vector<16x16x8xf32>, vector<16x16x8xf32>, vector<16x16x8xf32>, vector<16x16x8xf32>, vector<16x16x8xf32>, vector<16x16x8xf32> -> vector<16x16x72xf32>
    %77 = vector.shape_cast %76 : vector<16x16x72xf32> to vector<256x72xf32>
    %78 = arith.truncf %77 : vector<256x72xf32> to vector<256x72xbf16>
    %c0_27 = arith.constant 0 : index
    %c0_28 = arith.constant 0 : index
    %79 = vector.load %arg5[%c0_27, %c0_28] : memref<72x8xbf16, #tpu.memory_space<vmem>>, vector<72x8xbf16>
    %cst_29 = arith.constant dense<0.000000e+00> : vector<256x8xf32>
    %80 = tpu.matmul %78, %79, %cst_29 {dimension_numbers = #tpu.dot_dimension_numbers<[1], [0], [0], [1], [0, 0, 1, 1], [], []>} : vector<256x72xbf16>, vector<72x8xbf16>, vector<256x8xf32> -> vector<256x8xf32>
    %c0_30 = arith.constant 0 : index
    %c0_31 = arith.constant 0 : index
    %81 = vector.load %arg6[%c0_30, %c0_31] : memref<1x8xf32, #tpu.memory_space<vmem>>, vector<1x8xf32>
    %82 = vector.broadcast %81 : vector<1x8xf32> to vector<256x8xf32>
    %83 = arith.mulf %80, %82 : vector<256x8xf32>
    %c0_32 = arith.constant 0 : index
    %c0_33 = arith.constant 0 : index
    %84 = vector.load %arg7[%c0_32, %c0_33] : memref<1x8xf32, #tpu.memory_space<vmem>>, vector<1x8xf32>
    %85 = vector.broadcast %84 : vector<1x8xf32> to vector<256x8xf32>
    %86 = arith.addf %83, %85 : vector<256x8xf32>
    %cst_34 = arith.constant 0.000000e+00 : f32
    %87 = vector.broadcast %cst_34 : f32 to vector<256x8xf32>
    %88 = arith.maximumf %86, %87 : vector<256x8xf32>
    %cst_35 = arith.constant 0.000000e+00 : f32
    %89 = vector.broadcast %cst_35 : f32 to vector<18x18x8xf32>
    %c0_36 = arith.constant 0 : index
    %c0_37 = arith.constant 0 : index
    %c0_38 = arith.constant 0 : index
    %90 = vector.load %arg13[%c0_36, %c0_37, %c0_38] : memref<18x18x8xf32, #tpu.memory_space<vmem>>, vector<18x18x8xf32>
    tpu.vector_store %arg13[%c0_36, %c0_37, %c0_38], %89 {strides = array<i32>} : memref<18x18x8xf32, #tpu.memory_space<vmem>>, vector<18x18x8xf32>,
    %91 = vector.shape_cast %88 : vector<256x8xf32> to vector<16x16x8xf32>
    %c1_39 = arith.constant 1 : index
    %c1_40 = arith.constant 1 : index
    %c0_41 = arith.constant 0 : index
    %92 = vector.load %arg13[%c1_39, %c1_40, %c0_41] : memref<18x18x8xf32, #tpu.memory_space<vmem>>, vector<16x16x8xf32>
    tpu.vector_store %arg13[%c1_39, %c1_40, %c0_41], %91 {strides = array<i32>} : memref<18x18x8xf32, #tpu.memory_space<vmem>>, vector<16x16x8xf32>,
    %c0_42 = arith.constant 0 : index
    %c0_43 = arith.constant 0 : index
    %c0_44 = arith.constant 0 : index
    %93 = vector.load %arg13[%c0_42, %c0_43, %c0_44] : memref<18x18x8xf32, #tpu.memory_space<vmem>>, vector<18x18x8xf32>
    %94 = vector.extract_strided_slice %93 {offsets = [0, 0, 0], sizes = [16, 16, 8], strides = [1, 1, 1]} : vector<18x18x8xf32> to vector<16x16x8xf32>
    %95 = vector.extract_strided_slice %93 {offsets = [0, 1, 0], sizes = [16, 16, 8], strides = [1, 1, 1]} : vector<18x18x8xf32> to vector<16x16x8xf32>
    %96 = vector.extract_strided_slice %93 {offsets = [0, 2, 0], sizes = [16, 16, 8], strides = [1, 1, 1]} : vector<18x18x8xf32> to vector<16x16x8xf32>
    %97 = vector.extract_strided_slice %93 {offsets = [1, 0, 0], sizes = [16, 16, 8], strides = [1, 1, 1]} : vector<18x18x8xf32> to vector<16x16x8xf32>
    %98 = vector.extract_strided_slice %93 {offsets = [1, 1, 0], sizes = [16, 16, 8], strides = [1, 1, 1]} : vector<18x18x8xf32> to vector<16x16x8xf32>
    %99 = vector.extract_strided_slice %93 {offsets = [1, 2, 0], sizes = [16, 16, 8], strides = [1, 1, 1]} : vector<18x18x8xf32> to vector<16x16x8xf32>
    %100 = vector.extract_strided_slice %93 {offsets = [2, 0, 0], sizes = [16, 16, 8], strides = [1, 1, 1]} : vector<18x18x8xf32> to vector<16x16x8xf32>
    %101 = vector.extract_strided_slice %93 {offsets = [2, 1, 0], sizes = [16, 16, 8], strides = [1, 1, 1]} : vector<18x18x8xf32> to vector<16x16x8xf32>
    %102 = vector.extract_strided_slice %93 {offsets = [2, 2, 0], sizes = [16, 16, 8], strides = [1, 1, 1]} : vector<18x18x8xf32> to vector<16x16x8xf32>
    %103 = tpu.concatenate %94, %95, %96, %97, %98, %99, %100, %101, %102 in 2 : vector<16x16x8xf32>, vector<16x16x8xf32>, vector<16x16x8xf32>, vector<16x16x8xf32>, vector<16x16x8xf32>, vector<16x16x8xf32>, vector<16x16x8xf32>, vector<16x16x8xf32>, vector<16x16x8xf32> -> vector<16x16x72xf32>
    %104 = vector.shape_cast %103 : vector<16x16x72xf32> to vector<256x72xf32>
    %105 = arith.truncf %104 : vector<256x72xf32> to vector<256x72xbf16>
    %c0_45 = arith.constant 0 : index
    %c0_46 = arith.constant 0 : index
    %106 = vector.load %arg8[%c0_45, %c0_46] : memref<72x8xbf16, #tpu.memory_space<vmem>>, vector<72x8xbf16>
    %cst_47 = arith.constant dense<0.000000e+00> : vector<256x8xf32>
    %107 = tpu.matmul %105, %106, %cst_47 {dimension_numbers = #tpu.dot_dimension_numbers<[1], [0], [0], [1], [0, 0, 1, 1], [], []>} : vector<256x72xbf16>, vector<72x8xbf16>, vector<256x8xf32> -> vector<256x8xf32>
    %c0_48 = arith.constant 0 : index
    %c0_49 = arith.constant 0 : index
    %108 = vector.load %arg9[%c0_48, %c0_49] : memref<1x8xf32, #tpu.memory_space<vmem>>, vector<1x8xf32>
    %109 = vector.broadcast %108 : vector<1x8xf32> to vector<256x8xf32>
    %110 = arith.mulf %107, %109 : vector<256x8xf32>
    %c0_50 = arith.constant 0 : index
    %c0_51 = arith.constant 0 : index
    %111 = vector.load %arg10[%c0_50, %c0_51] : memref<1x8xf32, #tpu.memory_space<vmem>>, vector<1x8xf32>
    %112 = vector.broadcast %111 : vector<1x8xf32> to vector<256x8xf32>
    %113 = arith.addf %110, %112 : vector<256x8xf32>
    %cst_52 = arith.constant 0.000000e+00 : f32
    %114 = vector.broadcast %cst_52 : f32 to vector<256x8xf32>
    %115 = arith.maximumf %113, %114 : vector<256x8xf32>
    %116 = vector.shape_cast %115 : vector<256x8xf32> to vector<16x16x8xf32>
    %c0_53 = arith.constant 0 : index
    %c0_54 = arith.constant 0 : index
    %c0_55 = arith.constant 0 : index
    %c0_56 = arith.constant 0 : index
    %117 = vector.load %arg11[%c0_53, %c0_54, %c0_55, %c0_56] : memref<1x16x16x8xf32, #tpu.memory_space<vmem>>, vector<1x16x16x8xf32>
    %118 = vector.shape_cast %117 : vector<1x16x16x8xf32> to vector<16x16x8xf32>
    %119 = vector.shape_cast %116 : vector<16x16x8xf32> to vector<1x16x16x8xf32>
    tpu.vector_store %arg11[%c0_53, %c0_54, %c0_55, %c0_56], %119 {strides = array<i32>} : memref<1x16x16x8xf32, #tpu.memory_space<vmem>>, vector<1x16x16x8xf32>,
    return
  }
  func.func @transform_0(%arg0: i32) -> (i32, i32, i32, i32) {
    %c0_i32 = arith.constant 0 : i32
    %c0_i32_0 = arith.constant 0 : i32
    %c0_i32_1 = arith.constant 0 : i32
    %c0_i32_2 = arith.constant 0 : i32
    return %arg0, %c0_i32, %c0_i32_0, %c0_i32_1 : i32, i32, i32, i32
  }
  func.func @transform_1(%arg0: i32) -> (i32, i32, i32, i32) {
    %c0_i32 = arith.constant 0 : i32
    %c0_i32_0 = arith.constant 0 : i32
    %c0_i32_1 = arith.constant 0 : i32
    %c0_i32_2 = arith.constant 0 : i32
    return %arg0, %c0_i32, %c0_i32_0, %c0_i32_1 : i32, i32, i32, i32
  }
  func.func @transform_2(%arg0: i32) -> (i32, i32) {
    %c0_i32 = arith.constant 0 : i32
    %c0_i32_0 = arith.constant 0 : i32
    %c0_i32_1 = arith.constant 0 : i32
    return %c0_i32, %c0_i32_0 : i32, i32
  }
  func.func @transform_3(%arg0: i32) -> (i32, i32) {
    %c0_i32 = arith.constant 0 : i32
    %c0_i32_0 = arith.constant 0 : i32
    %c0_i32_1 = arith.constant 0 : i32
    return %c0_i32, %c0_i32_0 : i32, i32
  }
  func.func @transform_4(%arg0: i32) -> (i32, i32) {
    %c0_i32 = arith.constant 0 : i32
    %c0_i32_0 = arith.constant 0 : i32
    %c0_i32_1 = arith.constant 0 : i32
    return %c0_i32, %c0_i32_0 : i32, i32
  }
  func.func @transform_5(%arg0: i32) -> (i32, i32) {
    %c0_i32 = arith.constant 0 : i32
    %c0_i32_0 = arith.constant 0 : i32
    %c0_i32_1 = arith.constant 0 : i32
    return %c0_i32, %c0_i32_0 : i32, i32
  }
  func.func @transform_6(%arg0: i32) -> (i32, i32) {
    %c0_i32 = arith.constant 0 : i32
    %c0_i32_0 = arith.constant 0 : i32
    %c0_i32_1 = arith.constant 0 : i32
    return %c0_i32, %c0_i32_0 : i32, i32
  }
  func.func @transform_7(%arg0: i32) -> (i32, i32) {
    %c0_i32 = arith.constant 0 : i32
    %c0_i32_0 = arith.constant 0 : i32
    %c0_i32_1 = arith.constant 0 : i32
    return %c0_i32, %c0_i32_0 : i32, i32
  }
  func.func @transform_8(%arg0: i32) -> (i32, i32) {
    %c0_i32 = arith.constant 0 : i32
    %c0_i32_0 = arith.constant 0 : i32
    %c0_i32_1 = arith.constant 0 : i32
    return %c0_i32, %c0_i32_0 : i32, i32
  }
  func.func @transform_9(%arg0: i32) -> (i32, i32) {
    %c0_i32 = arith.constant 0 : i32
    %c0_i32_0 = arith.constant 0 : i32
    %c0_i32_1 = arith.constant 0 : i32
    return %c0_i32, %c0_i32_0 : i32, i32
  }
  func.func @transform_10(%arg0: i32) -> (i32, i32, i32, i32) {
    %c0_i32 = arith.constant 0 : i32
    %c0_i32_0 = arith.constant 0 : i32
    %c0_i32_1 = arith.constant 0 : i32
    %c0_i32_2 = arith.constant 0 : i32
    return %arg0, %c0_i32, %c0_i32_0, %c0_i32_1 : i32, i32, i32, i32
  }
}

</mosaic_0001>

<bundles_post_ra>
// kernel: tile.8
= control target key start
LH: loop header
LB: loop body
LE: loop exit
PB: predicated region body
PF: predicated region fallthrough
CT: control target
= control target key end

     0   :  { %s22_s0 = inlined_call_operand.vmem [shape: f32[4], index: 0, kind: input, shape index: {}]   ;;  %s23_s1 = inlined_call_operand.vmem [shape: f32[4,4], index: 1, kind: output, shape index: {}]  }
   0x1   :  { %v4_v0 = vld [vmem:[%s22_s0] ss:$0 sm:$0xff] }
   0x2   :  { %5 = vst [vmem:[%s23_s1] sm:$0xf] %v4_v0 }

// kernel: tile.9
= control target key start
LH: loop header
LB: loop body
LE: loop exit
PB: predicated region body
PF: predicated region fallthrough
CT: control target
= control target key end

     0   :  { %vm8_vm0 = vcmask 31744   ;;  %s40_s8 = smov 4   ;;  %s41_s9 = smov 8   ;;  %vm14_vm1 = vcmask 130144   ;;  %vm20_vm2 = vcmask 97344   ;;  %vm26_vm3 = vcmask 64544   ;;  %s58_s0 = inlined_call_operand.vmem [shape: f32[4,4], index: 0, kind: input, shape index: {}]   ;;  %s59_s1 = inlined_call_operand.vmem [shape: f32[1,16], index: 1, kind: output, shape index: {}]  }
   0x1   :  { %v5_v0 = vld [vmem:[%s58_s0] sm:$0xf]  ;;  %s39_s0 = smov 12  }
   0x2   :  { %6 = vst [vmem:[#allocation1] sm:$0xf] %v5_v0 }
   0x9   :  { %v11_v1 = vld [vmem:[#allocation1 + $0x3] sm:$0x1]   ;;  %v23_v2 = vld [vmem:[#allocation1 + $0x1] sm:$0x1]   ;;  %v7_v3 = vld [vmem:[#allocation1] sm:$0x1]  }
   0xa   :  { %12 = vrot.lane.b32.xlu0 %v11_v1, %s39_s0  ;;  %24 = vrot.lane.b32.xlu1 %v23_v2, %s40_s8  ;;  %v17_v4 = vld [vmem:[#allocation1 + $0x2] sm:$0x1]   ;;  %9 = vst.msk [vmem:[#allocation0] sm:$0x1] %vm8_vm0, %v7_v3  }
   0xe   :  { %18 = vrot.lane.b32.xlu0 %v17_v4, %s41_s9 }
  0x7c   :  { %v13_v5 = vpop.permute.xlu0 %12   ;;  %v25_v6 = vpop.permute.xlu1 %24  }
  0x7d   :  { %15 = vst.msk [vmem:[#allocation0] sm:$0x1] %vm14_vm1, %v13_v5  }
  0x80   :  { %v19_v7 = vpop.permute.xlu0 %18  }
  0x81   :  { %21 = vst.msk [vmem:[#allocation0] sm:$0x1] %vm20_vm2, %v19_v7  }
  0x82   :  { %27 = vst.msk [vmem:[#allocation0] sm:$0x1] %vm26_vm3, %v25_v6  }
  0x89   :  { %v32_v8 = vld [vmem:[#allocation0] sm:$0x1] }
  0x8a   :  { %35 = vst [vmem:[%s59_s1] sm:$0x1] %v32_v8 }

// kernel: up_forward.1
= control target key start
LH: loop header
LB: loop body
LE: loop exit
PB: predicated region body
PF: predicated region fallthrough
CT: control target
= control target key end

     0   :  { %s7283_s13 = smov 0   ;;  %s10486_s0 = inlined_call_operand.vmem [shape: bf16[2,8,8,8], index: 0, kind: input, shape index: {}]   ;;  %s10487_s1 = inlined_call_operand.vmem [shape: bf16[2,16,16,4], index: 1, kind: input, shape index: {}]   ;;  %s10488_s2 = inlined_call_operand.vmem [shape: bf16[8,16], index: 2, kind: input, shape index: {}]   ;;  %s10489_s3 = inlined_call_operand.vmem [shape: f32[1,16], index: 3, kind: input, shape index: {}]   ;;  %s10490_s4 = inlined_call_operand.vmem [shape: bf16[72,8], index: 4, kind: input, shape index: {}]   ;;  %s10491_s5 = inlined_call_operand.vmem [shape: f32[1,8], index: 5, kind: input, shape index: {}]   ;;  %s10492_s6 = inlined_call_operand.vmem [shape: f32[1,8], index: 6, kind: input, shape index: {}]   ;;  %s10493_s7 = inlined_call_operand.vmem [shape: bf16[72,8], index: 7, kind: input, shape index: {}]   ;;  %s10494_s8 = inlined_call_operand.vmem [shape: f32[1,8], index: 8, kind: input, shape index: {}]   ;;  %s10495_s9 = inlined_call_operand.vmem [shape: f32[1,8], index: 9, kind: input, shape index: {}]   ;;  %s10496_s10 = inlined_call_operand.vmem [shape: f32[2,16,16,8], index: 10, kind: output, shape index: {}]  }
   0x1 LB: > { %s5530_s14 = sadd.s32 4294967295, %s7211_s13   ;;  %p5534_p0 = scmp.ge.s32.totalorder %s7211_s13, 1  ;;  %s7211_s13 = sphi %s7283_s13, %s20_s13  }
   0x2   : > { %p322_p1 = scmp.lt.s32.totalorder %s7211_s13, 3 }
   0x4   : > { %p323_p2 = pnand %p5534_p0, %p322_p1 }
   0x6   : > { %326 = sbr.rel (%p323_p2) target bundleno = 1520 (0x5f0), region = 60 }
   0xb   : > { %v389_v0 = vld [vmem:[%s10488_s2] sm:$0xf]  ;;  %vm430_vm0 = vcmask 1043456   ;;  %p365_p3 = scmp.lt.s32.totalorder %s5530_s14, 1  ;;  %vm417_vm1 = vcmask 64512   ;;  %vm1650_vm2 = vcmask 58368   ;;  %v499_v25 = vlaneseq }
   0xc   : > { %5821 = vmatprep.subr.msk.bf16.mxu0 %vm430_vm0, %v389_v0  ;;  %v432_v1 = vsel %vm430_vm0, %v389_v0, 0  ;;  %v7213_v6 = vmov 0.0   ;;  %vm2064_vm3 = vcmask 1046528   ;;  %s7214_s21 = smov 8   ;;  %vm2241_vm4 = vcmask 1045504   ;;  %s7215_s22 = smov 16  }
   0xd   : > { %5728 = vmatpush3.bf16.msra.mxu0 %v432_v1  ;;  %s10575_s14 = smov (!%p365_p3, %s5530_s14), 1  ;;  %1648 = vst.msk [vmem:[#allocation2] sm:$0xff] %vm417_vm1, %v7213_v6  ;;  %1649 = vst.msk [vmem:[#allocation2 + $0x8] sm:$0xff] %vm417_vm1, %v7213_v6  ;;  %s7216_s23 = smov 48   ;;  %v7217_v26 = vmov 1966171168  }
   0xe   : > { %s5598_s17 = sshll.u32 %s10575_s14, 5  ;;  %1651 = vst.msk [vmem:[#allocation2 + $0x10] sm:$0x3] %vm1650_vm2, %v7213_v6  ;;  %1654 = vst.msk [vmem:[#allocation2 + $0x28] sm:$0x3] %vm1650_vm2, %v7213_v6  ;;  %v536_v27 = vunpack.c.l.s4 %v7217_v26  ;;  %v7529_v28 = vshrl.u32 %v499_v25, 7 }
   0xf   : > { %s369_s20 = scalar_lea.vmem %s10486_s0, %s5598_s17  ;;  %1652 = vst.msk [vmem:[#allocation2 + $0x18] sm:$0xff] %vm417_vm1, %v7213_v6  ;;  %1653 = vst.msk [vmem:[#allocation2 + $0x20] sm:$0xff] %vm417_vm1, %v7213_v6  ;;  %v7534_v30 = vld [vmem:[%s10489_s3] ss:$0 sm:$0xff]  ;;  %v7218_v43 = vmov 1983009808  }
  0x10   : > { %v7127_v2 = vld [vmem:[%s369_s20] sm:$0xff]   ;;  %v7128_v3 = vld [vmem:[%s369_s20 + $0x8] sm:$0xff]   ;;  %v7129_v4 = vld [vmem:[%s369_s20 + $0x10] sm:$0xff]   ;;  %1655 = vst.msk [vmem:[#allocation2 + $0x30] sm:$0xff] %vm417_vm1, %v7213_v6  ;;  %v537_v29 = vunpack.c.0.s8 %v536_v27  ;;  %v1187_v44 = vunpack.c.l.s4 %v7218_v43  ;;  %v7548_v48 = vsub.s32 0, %v7529_v28  ;;  %s7219_s26 = smov 124  }
  0x11   : > { %5729 = vmatprep.mubr.msk.bf16.mxu0 %vm417_vm1, %v7127_v2  ;;  %v7130_v5 = vld [vmem:[%s369_s20 + $0x18] sm:$0xff]   ;;  %1656 = vst.msk [vmem:[#allocation2 + $0x38] sm:$0xff] %vm417_vm1, %v7213_v6  ;;  %1658 = vst.msk [vmem:[#allocation2 + $0x48] sm:$0xff] %vm417_vm1, %v7213_v6  ;;  %s7220_s27 = smov 120   ;;  %s7221_s28 = smov 116   ;;  %vm1768_vm5 = vcmask 31744  }
  0x12   : > { %5730 = vmatmul.mubr.msk.bf16.vlgmr.msra.gmra.mxu0 %vm417_vm1, %v7128_v3  ;;  %1657 = vst.msk [vmem:[#allocation2 + $0x40] sm:$0x3] %vm1650_vm2, %v7213_v6  ;;  %1660 = vst.msk [vmem:[#allocation2 + $0x58] sm:$0x3] %vm1650_vm2, %v7213_v6  ;;  %v7537_v31 = vsub.s32 %v537_v29, %v7529_v28  ;;  %v1188_v58 = vunpack.c.0.s8 %v1187_v44  ;;  %s5599_s29 = sshll.u32 %s10575_s14, 7  ;;  %s7222_s15 = smov 4  }
  0x13   : > { %5733 = vmatprep.mubr.msk.bf16.mxu0 %vm417_vm1, %v7129_v4  ;;  %1659 = vst.msk [vmem:[#allocation2 + $0x50] sm:$0xff] %vm417_vm1, %v7213_v6  ;;  %1661 = vst.msk [vmem:[#allocation2 + $0x60] sm:$0xff] %vm417_vm1, %v7213_v6  ;;  %s7891_s12 = scalar_lea.vmem %s10487_s1, %s5599_s29  ;;  %vm1929_vm8 = vcmask 64544   ;;  %s7223_s16 = smov 24   ;;  %vm3052_vm9 = vcmask 130048   ;;  %vm3085_vm10 = vcmask 195584  }
  0x14   : > { %1662 = vst.msk [vmem:[#allocation2 + $0x68] sm:$0xff] %vm417_vm1, %v7213_v6  ;;  %1664 = vst.msk [vmem:[#allocation2 + $0x78] sm:$0xff] %vm417_vm1, %v7213_v6  ;;  %v1962_v7 = vld [vmem:[#allocation2] sm:$0xff]  ;;  %v1963_v8 = vld [vmem:[#allocation2 + $0x8] sm:$0xff]  ;;  %s7224_s17 = smov 32   ;;  %s7225_s18 = smov 40  }
  0x15   : > { %1663 = vst.msk [vmem:[#allocation2 + $0x70] sm:$0x3] %vm1650_vm2, %v7213_v6  ;;  %1666 = vst.msk [vmem:[#allocation2 + $0x88] sm:$0x3] %vm1650_vm2, %v7213_v6  ;;  %v1964_v9 = vld [vmem:[#allocation2 + $0x10] sm:$0x3] }
  0x16   : > { %1665 = vst.msk [vmem:[#allocation2 + $0x80] sm:$0xff] %vm417_vm1, %v7213_v6  ;;  %1667 = vst.msk [vmem:[#allocation2 + $0x90] sm:$0xff] %vm417_vm1, %v7213_v6  ;;  %v2065_v10 = vrot.slane %v1962_v7, 1  ;;  %v2066_v11 = vrot.slane %v1963_v8, 1  ;;  %v2068_v12 = vrot.slane %v1964_v9, 1  ;;  %v2245_v16 = vrot.slane %v1964_v9, 2 }
  0x17   : > { %1668 = vst.msk [vmem:[#allocation2 + $0x98] sm:$0xff] %vm417_vm1, %v7213_v6  ;;  %1670 = vst.msk [vmem:[#allocation2 + $0xa8] sm:$0xff] %vm417_vm1, %v7213_v6  ;;  %v2242_v17 = vrot.slane %v1962_v7, 2  ;;  %v2243_v18 = vrot.slane %v1963_v8, 2  ;;  %v7564_v9 = vsub.s32 %v1188_v58, %v7529_v28  ;;  %s7226_s19 = smov 56   ;;  %s7227_s20 = smov 64  }
  0x18   : > { %1669 = vst.msk [vmem:[#allocation2 + $0xa0] sm:$0x3] %vm1650_vm2, %v7213_v6  ;;  %1672 = vst.msk [vmem:[#allocation2 + $0xb8] sm:$0x3] %vm1650_vm2, %v7213_v6  ;;  %v2067_v13 = vsel %vm2064_vm3, %v2065_v10, %v2066_v11  ;;  %v2069_v14 = vsel %vm2064_vm3, %v2066_v11, %v2068_v12  ;;  %vm3118_vm11 = vcmask 261120   ;;  %vm3151_vm12 = vcmask 326656  }
  0x19   : > { %1671 = vst.msk [vmem:[#allocation2 + $0xb0] sm:$0xff] %vm417_vm1, %v7213_v6  ;;  %1673 = vst.msk [vmem:[#allocation2 + $0xc0] sm:$0xff] %vm417_vm1, %v7213_v6  ;;  %v5852_v15 = vpack.i.bf16 %v2069_v14, %v2067_v13  ;;  %v2244_v19 = vsel %vm2241_vm4, %v2242_v17, %v2243_v18  ;;  %v2246_v20 = vsel %vm2241_vm4, %v2243_v18, %v2245_v16  ;;  %vm3184_vm13 = vcmask 392192  }
  0x1a   : > { %5734 = vmatmul.mubr.msk.bf16.gmra.mxu0 %vm417_vm1, %v7130_v5  ;;  %1674 = vst.msk [vmem:[#allocation2 + $0xc8] sm:$0xff] %vm417_vm1, %v7213_v6  ;;  %1676 = vst.msk [vmem:[#allocation2 + $0xd8] sm:$0xff] %vm417_vm1, %v7213_v6  ;;  %v5857_v21 = vpack.i.bf16 %v2246_v20, %v2244_v19  ;;  %vm3217_vm14 = vcmask 457728   ;;  %vm3250_vm15 = vcmask 523264  }
  0x1b   : > { %1675 = vst.msk [vmem:[#allocation2 + $0xd0] sm:$0x3] %vm1650_vm2, %v7213_v6  ;;  %1678 = vst.msk [vmem:[#allocation2 + $0xe8] sm:$0x3] %vm1650_vm2, %v7213_v6  ;;  %5853 = vrot.lane.b32.xlu0 %v5852_v15, %s7214_s21 }
  0x1c   : > { %1677 = vst.msk [vmem:[#allocation2 + $0xe0] sm:$0xff] %vm417_vm1, %v7213_v6  ;;  %1679 = vst.msk [vmem:[#allocation2 + $0xf0] sm:$0xff] %vm417_vm1, %v7213_v6 }
  0x1d   : > { %1680 = vst.msk [vmem:[#allocation2 + $0xf8] sm:$0xff] %vm417_vm1, %v7213_v6  ;;  %1682 = vst.msk [vmem:[#allocation2 + $0x108] sm:$0xff] %vm417_vm1, %v7213_v6 }
  0x1e   : > { %1681 = vst.msk [vmem:[#allocation2 + $0x100] sm:$0x3] %vm1650_vm2, %v7213_v6  ;;  %1684 = vst.msk [vmem:[#allocation2 + $0x118] sm:$0x3] %vm1650_vm2, %v7213_v6 }
  0x1f   : > { %1683 = vst.msk [vmem:[#allocation2 + $0x110] sm:$0xff] %vm417_vm1, %v7213_v6  ;;  %1685 = vst.msk [vmem:[#allocation2 + $0x120] sm:$0xff] %vm417_vm1, %v7213_v6  ;;  %5858 = vrot.lane.b32.xlu0 %v5857_v21, %s7215_s22 }
  0x20   : > { %1686 = vst.msk [vmem:[#allocation2 + $0x128] sm:$0xff] %vm417_vm1, %v7213_v6  ;;  %1688 = vst.msk [vmem:[#allocation2 + $0x138] sm:$0xff] %vm417_vm1, %v7213_v6 }
  0x21   : > { %1687 = vst.msk [vmem:[#allocation2 + $0x130] sm:$0x3] %vm1650_vm2, %v7213_v6  ;;  %1690 = vst.msk [vmem:[#allocation2 + $0x148] sm:$0x3] %vm1650_vm2, %v7213_v6 }
  0x22   : > { %1689 = vst.msk [vmem:[#allocation2 + $0x140] sm:$0xff] %vm417_vm1, %v7213_v6  ;;  %1691 = vst.msk [vmem:[#allocation2 + $0x150] sm:$0xff] %vm417_vm1, %v7213_v6 }
  0x23   : > { %1692 = vst.msk [vmem:[#allocation2 + $0x158] sm:$0xff] %vm417_vm1, %v7213_v6  ;;  %1694 = vst.msk [vmem:[#allocation2 + $0x168] sm:$0xff] %vm417_vm1, %v7213_v6 }
  0x24   : > { %1693 = vst.msk [vmem:[#allocation2 + $0x160] sm:$0x3] %vm1650_vm2, %v7213_v6  ;;  %1696 = vst.msk [vmem:[#allocation2 + $0x178] sm:$0x3] %vm1650_vm2, %v7213_v6 }
  0x25   : > { %1695 = vst.msk [vmem:[#allocation2 + $0x170] sm:$0xff] %vm417_vm1, %v7213_v6  ;;  %1697 = vst.msk [vmem:[#allocation2 + $0x180] sm:$0xff] %vm417_vm1, %v7213_v6 }
  0x26   : > { %1698 = vst.msk [vmem:[#allocation2 + $0x188] sm:$0xff] %vm417_vm1, %v7213_v6  ;;  %1700 = vst.msk [vmem:[#allocation2 + $0x198] sm:$0xff] %vm417_vm1, %v7213_v6 }
  0x27   : > { %1699 = vst.msk [vmem:[#allocation2 + $0x190] sm:$0x3] %vm1650_vm2, %v7213_v6  ;;  %1702 = vst.msk [vmem:[#allocation2 + $0x1a8] sm:$0x3] %vm1650_vm2, %v7213_v6 }
  0x28   : > { %1701 = vst.msk [vmem:[#allocation2 + $0x1a0] sm:$0xff] %vm417_vm1, %v7213_v6  ;;  %3658 = vst.msk [vmem:[#allocation3] sm:$0xff] %vm417_vm1, %v7213_v6 }
  0x29   : > { %3659 = vst.msk [vmem:[#allocation3 + $0x8] sm:$0xff] %vm417_vm1, %v7213_v6  ;;  %3661 = vst.msk [vmem:[#allocation3 + $0x18] sm:$0xff] %vm417_vm1, %v7213_v6 }
  0x2a   : > { %3660 = vst.msk [vmem:[#allocation3 + $0x10] sm:$0x3] %vm1650_vm2, %v7213_v6  ;;  %3663 = vst.msk [vmem:[#allocation3 + $0x28] sm:$0x3] %vm1650_vm2, %v7213_v6 }
  0x2b   : > { %3662 = vst.msk [vmem:[#allocation3 + $0x20] sm:$0xff] %vm417_vm1, %v7213_v6  ;;  %3664 = vst.msk [vmem:[#allocation3 + $0x30] sm:$0xff] %vm417_vm1, %v7213_v6 }
  0x2c   : > { %3665 = vst.msk [vmem:[#allocation3 + $0x38] sm:$0xff] %vm417_vm1, %v7213_v6  ;;  %3667 = vst.msk [vmem:[#allocation3 + $0x48] sm:$0xff] %vm417_vm1, %v7213_v6 }
  0x2d   : > { %3666 = vst.msk [vmem:[#allocation3 + $0x40] sm:$0x3] %vm1650_vm2, %v7213_v6  ;;  %3669 = vst.msk [vmem:[#allocation3 + $0x58] sm:$0x3] %vm1650_vm2, %v7213_v6  ;;  %v2013_v22 = vld [vmem:[#allocation2 + $0x198] sm:$0xff] }
  0x2e   : > { %3668 = vst.msk [vmem:[#allocation3 + $0x50] sm:$0xff] %vm417_vm1, %v7213_v6  ;;  %3670 = vst.msk [vmem:[#allocation3 + $0x60] sm:$0xff] %vm417_vm1, %v7213_v6 }
  0x2f   : > { %3671 = vst.msk [vmem:[#allocation3 + $0x68] sm:$0xff] %vm417_vm1, %v7213_v6  ;;  %3673 = vst.msk [vmem:[#allocation3 + $0x78] sm:$0xff] %vm417_vm1, %v7213_v6  ;;  %v2014_v23 = vld [vmem:[#allocation2 + $0x1a0] sm:$0xff] }
  0x30   : > { %3672 = vst.msk [vmem:[#allocation3 + $0x70] sm:$0x3] %vm1650_vm2, %v7213_v6  ;;  %3675 = vst.msk [vmem:[#allocation3 + $0x88] sm:$0x3] %vm1650_vm2, %v7213_v6  ;;  %v5847_v24 = vpack.i.bf16 %v2014_v23, %v2013_v22 }
  0x31   : > { %3674 = vst.msk [vmem:[#allocation3 + $0x80] sm:$0xff] %vm417_vm1, %v7213_v6  ;;  %3676 = vst.msk [vmem:[#allocation3 + $0x90] sm:$0xff] %vm417_vm1, %v7213_v6 }
  0x32   : > { %3677 = vst.msk [vmem:[#allocation3 + $0x98] sm:$0xff] %vm417_vm1, %v7213_v6  ;;  %3679 = vst.msk [vmem:[#allocation3 + $0xa8] sm:$0xff] %vm417_vm1, %v7213_v6  ;;  %5848 = vrot.lane.b32.xlu1 %v5847_v24, %s7216_s23 }
  0x33   : > { %3678 = vst.msk [vmem:[#allocation3 + $0xa0] sm:$0x3] %vm1650_vm2, %v7213_v6  ;;  %3681 = vst.msk [vmem:[#allocation3 + $0xb8] sm:$0x3] %vm1650_vm2, %v7213_v6 }
  0x34   : > { %3680 = vst.msk [vmem:[#allocation3 + $0xb0] sm:$0xff] %vm417_vm1, %v7213_v6  ;;  %3682 = vst.msk [vmem:[#allocation3 + $0xc0] sm:$0xff] %vm417_vm1, %v7213_v6 }
  0x35   : > { %3683 = vst.msk [vmem:[#allocation3 + $0xc8] sm:$0xff] %vm417_vm1, %v7213_v6  ;;  %3685 = vst.msk [vmem:[#allocation3 + $0xd8] sm:$0xff] %vm417_vm1, %v7213_v6 }
  0x36   : > { %3684 = vst.msk [vmem:[#allocation3 + $0xd0] sm:$0x3] %vm1650_vm2, %v7213_v6  ;;  %3687 = vst.msk [vmem:[#allocation3 + $0xe8] sm:$0x3] %vm1650_vm2, %v7213_v6 }
  0x37   : > { %3686 = vst.msk [vmem:[#allocation3 + $0xe0] sm:$0xff] %vm417_vm1, %v7213_v6  ;;  %3688 = vst.msk [vmem:[#allocation3 + $0xf0] sm:$0xff] %vm417_vm1, %v7213_v6 }
  0x38   : > { %3689 = vst.msk [vmem:[#allocation3 + $0xf8] sm:$0xff] %vm417_vm1, %v7213_v6  ;;  %3691 = vst.msk [vmem:[#allocation3 + $0x108] sm:$0xff] %vm417_vm1, %v7213_v6 }
  0x39   : > { %3690 = vst.msk [vmem:[#allocation3 + $0x100] sm:$0x3] %vm1650_vm2, %v7213_v6  ;;  %3693 = vst.msk [vmem:[#allocation3 + $0x118] sm:$0x3] %vm1650_vm2, %v7213_v6 }
  0x3a   : > { %3692 = vst.msk [vmem:[#allocation3 + $0x110] sm:$0xff] %vm417_vm1, %v7213_v6  ;;  %3694 = vst.msk [vmem:[#allocation3 + $0x120] sm:$0xff] %vm417_vm1, %v7213_v6 }
  0x3b   : > { %3695 = vst.msk [vmem:[#allocation3 + $0x128] sm:$0xff] %vm417_vm1, %v7213_v6  ;;  %3697 = vst.msk [vmem:[#allocation3 + $0x138] sm:$0xff] %vm417_vm1, %v7213_v6 }
  0x3c   : > { %3696 = vst.msk [vmem:[#allocation3 + $0x130] sm:$0x3] %vm1650_vm2, %v7213_v6  ;;  %3699 = vst.msk [vmem:[#allocation3 + $0x148] sm:$0x3] %vm1650_vm2, %v7213_v6 }
  0x3d   : > { %3698 = vst.msk [vmem:[#allocation3 + $0x140] sm:$0xff] %vm417_vm1, %v7213_v6  ;;  %3700 = vst.msk [vmem:[#allocation3 + $0x150] sm:$0xff] %vm417_vm1, %v7213_v6 }
  0x3e   : > { %3701 = vst.msk [vmem:[#allocation3 + $0x158] sm:$0xff] %vm417_vm1, %v7213_v6  ;;  %3703 = vst.msk [vmem:[#allocation3 + $0x168] sm:$0xff] %vm417_vm1, %v7213_v6 }
  0x3f   : > { %3702 = vst.msk [vmem:[#allocation3 + $0x160] sm:$0x3] %vm1650_vm2, %v7213_v6  ;;  %3705 = vst.msk [vmem:[#allocation3 + $0x178] sm:$0x3] %vm1650_vm2, %v7213_v6 }
  0x40   : > { %3704 = vst.msk [vmem:[#allocation3 + $0x170] sm:$0xff] %vm417_vm1, %v7213_v6  ;;  %3706 = vst.msk [vmem:[#allocation3 + $0x180] sm:$0xff] %vm417_vm1, %v7213_v6 }
  0x41   : > { %3707 = vst.msk [vmem:[#allocation3 + $0x188] sm:$0xff] %vm417_vm1, %v7213_v6  ;;  %3709 = vst.msk [vmem:[#allocation3 + $0x198] sm:$0xff] %vm417_vm1, %v7213_v6 }
  0x42   : > { %3708 = vst.msk [vmem:[#allocation3 + $0x190] sm:$0x3] %vm1650_vm2, %v7213_v6  ;;  %3711 = vst.msk [vmem:[#allocation3 + $0x1a8] sm:$0x3] %vm1650_vm2, %v7213_v6  ;;  %vm3335_vm2 = vcmask 588800  }
  0x43   : > { %3710 = vst.msk [vmem:[#allocation3 + $0x1a0] sm:$0xff] %vm417_vm1, %v7213_v6 }
  0xd2   : > { %v5731_v32 = vpop.f32.mrf.mxu0 }
  0xd3   : > { %v477_v33 = vadd.f32 %v5731_v32, %v7534_v30 }
  0xd4   : > { %v468_v34 = vpop.f32.mrf.mxu0 }
  0xd5   : > { %v632_v35 = vcombine.high %v477_v33, %v477_v33  ;;  %v639_v36 = vrot.slane %v477_v33, %v7537_v31  ;;  %v469_v37 = vadd.f32 %v7534_v30, %v468_v34 }
  0xd6   : > { %v5732_v49 = vpop.f32.mrf.mxu0 }
  0xd7   : > { %v646_v38 = vrot.slane %v632_v35, %v7537_v31  ;;  %v647_v39 = vcombine.high %v639_v36, %v639_v36  ;;  %v655_v40 = vrot.slane %v639_v36, %v7537_v31  ;;  %v534_v41 = vcombine.high %v469_v37, %v469_v37 }
  0xd8   : > { %v541_v42 = vrot.slane %v469_v37, %v7537_v31  ;;  %v480_v57 = vadd.f32 %v5732_v49, %v7534_v30  ;;  %v471_v8 = vpop.f32.mrf.mxu0 }
  0xd9   : > { %v648_v45 = vcombine.high %v646_v38, %v646_v38  ;;  %v662_v46 = vrot.slane %v646_v38, %v7537_v31  ;;  %v669_v47 = vrot.slane %v647_v39, %v7537_v31  ;;  %v677_v50 = vcombine.high %v655_v40, %v655_v40 }
  0xda   : > { %v548_v51 = vrot.slane %v534_v41, %v7537_v31  ;;  %v549_v52 = vcombine.high %v541_v42, %v541_v42  ;;  %v993_v60 = vrot.slane %v655_v40, %v7548_v48  ;;  %v557_v62 = vrot.slane %v541_v42, %v7537_v31 }
  0xdb   : > { %v676_v53 = vrot.slane %v648_v45, %v7537_v31  ;;  %v679_v54 = vcombine.high %v669_v47, %v669_v47  ;;  %v997_v55 = vrot.slane %v669_v47, %v7548_v48  ;;  %v678_v59 = vcombine.high %v662_v46, %v662_v46 }
  0xdc   : > { %v550_v56 = vcombine.high %v548_v51, %v548_v51  ;;  %v1001_v0 = vrot.slane %v677_v50, %v7548_v48  ;;  %v571_v2 = vrot.slane %v549_v52, %v7537_v31  ;;  %v564_v3 = vrot.slane %v548_v51, %v7537_v31 }
  0xdd   : > { %v1005_v61 = vrot.slane %v679_v54, %v7548_v48  ;;  %v680_v63 = vcombine.high %v676_v53, %v676_v53  ;;  %v1013_v1 = vrot.slane %v676_v53, %v7548_v48  ;;  %v1009_v5 = vrot.slane %v662_v46, %v7548_v48 }
  0xde   : > { %v578_v4 = vrot.slane %v550_v56, %v7537_v31  ;;  %v1252_v6 = vcombine.low %v993_v60, %v997_v55  ;;  %v1017_v10 = vrot.slane %v678_v59, %v7548_v48  ;;  %v579_v11 = vcombine.high %v557_v62, %v557_v62 }
  0xdf   : > { %v1253_v7 = vcombine.low %v1001_v0, %v1005_v61  ;;  %v1021_v12 = vrot.slane %v680_v63, %v7548_v48  ;;  %v7568_v13 = vcombine.low %v1009_v5, %v1013_v1  ;;  %v581_v14 = vcombine.high %v571_v2, %v571_v2 }
  0xe0   : > { %v681_v15 = vcombine.high %v480_v57, %v480_v57  ;;  %v580_v16 = vcombine.high %v564_v3, %v564_v3  ;;  %v582_v17 = vcombine.high %v578_v4, %v578_v4  ;;  %v688_v18 = vrot.slane %v480_v57, %v7537_v31 }
  0xe1   : > { %v472_v19 = vadd.f32 %v7534_v30, %v471_v8  ;;  %v933_v20 = vrot.slane %v571_v2, %v7548_v48  ;;  %v1260_v22 = vrot.slane %v1252_v6, %v7564_v9  ;;  %v1267_v23 = vrot.slane %v1253_v7, %v7564_v9 }
  0xe2   : > { %v695_v21 = vrot.slane %v681_v15, %v7537_v31  ;;  %v949_v24 = vrot.slane %v578_v4, %v7548_v48  ;;  %v696_v25 = vcombine.high %v688_v18, %v688_v18  ;;  %v941_v29 = vrot.slane %v581_v14, %v7548_v48 }
  0xe3   : > { %v583_v26 = vcombine.high %v472_v19, %v472_v19  ;;  %v590_v27 = vrot.slane %v472_v19, %v7537_v31  ;;  %v704_v33 = vrot.slane %v688_v18, %v7537_v31  ;;  %v7580_v34 = vcombine.low %v1260_v22, %v1267_v23 }
  0xe4   : > { %v697_v32 = vcombine.high %v695_v21, %v695_v21  ;;  %v929_v35 = vrot.slane %v557_v62, %v7548_v48  ;;  %v937_v36 = vrot.slane %v579_v11, %v7548_v48  ;;  %v718_v37 = vrot.slane %v696_v25, %v7537_v31 }
  0xe5   : > { %v597_v38 = vrot.slane %v583_v26, %v7537_v31  ;;  %v945_v39 = vrot.slane %v564_v3, %v7548_v48  ;;  %v7588_v40 = vrot.slane %v580_v16, %v7548_v48  ;;  %v711_v41 = vrot.slane %v695_v21, %v7537_v31  ;;  %1480 = vrot.lane.b32.xlu0 %v7580_v34, %s7219_s26 }
  0xe6   : > { %v598_v42 = vcombine.high %v590_v27, %v590_v27  ;;  %v957_v43 = vrot.slane %v582_v17, %v7548_v48  ;;  %v1184_v44 = vcombine.low %v929_v35, %v933_v20  ;;  %v725_v45 = vrot.slane %v697_v32, %v7537_v31 }
  0xe7   : > { %v599_v46 = vcombine.high %v597_v38, %v597_v38  ;;  %v1185_v47 = vcombine.low %v937_v36, %v941_v29  ;;  %v7595_v49 = vcombine.low %v945_v39, %v949_v24  ;;  %v726_v50 = vcombine.high %v704_v33, %v704_v33 }
  0xe8   : > { %v606_v51 = vrot.slane %v590_v27, %v7537_v31  ;;  %v728_v52 = vcombine.high %v718_v37, %v718_v37  ;;  %v613_v53 = vrot.slane %v597_v38, %v7537_v31  ;;  %v620_v54 = vrot.slane %v598_v42, %v7537_v31 }
  0xe9   : > { %v1270_v55 = vcombine.low %v1017_v10, %v1021_v12  ;;  %v727_v56 = vcombine.high %v711_v41, %v711_v41  ;;  %v1025_v57 = vrot.slane %v704_v33, %v7548_v48  ;;  %v627_v58 = vrot.slane %v599_v46, %v7537_v31  ;;  %1544 = vrot.lane.b32.xlu0 %v7580_v34, %s7220_s27 }
  0xea   : > { %v1277_v59 = vrot.slane %v7568_v13, %v7564_v9  ;;  %v729_v60 = vcombine.high %v725_v45, %v725_v45  ;;  %v1041_v61 = vrot.slane %v711_v41, %v7548_v48  ;;  %v628_v62 = vcombine.high %v606_v51, %v606_v51  ;;  %v5735_v13 = vpop.f32.mrf.mxu0 }
  0xeb   : > { %v630_v63 = vcombine.high %v620_v54, %v620_v54  ;;  %v1029_v0 = vrot.slane %v718_v37, %v7548_v48  ;;  %v1033_v1 = vrot.slane %v726_v50, %v7548_v48  ;;  %v1045_v2 = vrot.slane %v725_v45, %v7548_v48 }
  0xec   : > { %v965_v3 = vrot.slane %v620_v54, %v7548_v48  ;;  %v1037_v4 = vrot.slane %v728_v52, %v7548_v48  ;;  %v629_v5 = vcombine.high %v613_v53, %v613_v53  ;;  %v1284_v7 = vrot.slane %v1270_v55, %v7564_v9  ;;  %v484_v22 = vpop.f32.mrf.mxu0 }
  0xed   : > { %v973_v6 = vrot.slane %v630_v63, %v7548_v48  ;;  %v631_v8 = vcombine.high %v627_v58, %v627_v58  ;;  %v961_v10 = vrot.slane %v606_v51, %v7548_v48  ;;  %1592 = vrot.lane.b32.xlu0 %v7580_v34, %s7221_s28  ;;  %v1192_v11 = vrot.slane %v1184_v44, %v7564_v9 }
  0xee   : > { %v1199_v12 = vrot.slane %v1185_v47, %v7564_v9  ;;  %v1053_v14 = vrot.slane %v729_v60, %v7548_v48  ;;  %v969_v15 = vrot.slane %v628_v62, %v7548_v48  ;;  %v981_v16 = vrot.slane %v627_v58, %v7548_v48 }
  0xef   : > { %v7622_v17 = vcombine.low %v1277_v59, %v1284_v7  ;;  %v1049_v18 = vrot.slane %v727_v56, %v7548_v48  ;;  %v1218_v19 = vcombine.low %v961_v10, %v965_v3  ;;  %v1202_v21 = vcombine.low %v7588_v40, %v957_v43 }
  0xf0   : > { %v7625_v20 = vcombine.low %v1192_v11, %v1199_v12  ;;  %v7628_v23 = vcombine.low %v1025_v57, %v1029_v0  ;;  %v1303_v24 = vcombine.low %v1041_v61, %v1045_v2  ;;  %v977_v25 = vrot.slane %v613_v53, %v7548_v48  ;;  %v5736_v0 = vpop.f32.mrf.mxu0 }
  0xf1   : > { %v1219_v26 = vcombine.low %v969_v15, %v973_v6  ;;  %1482 = vrot.lane.b32.xlu1 %v7622_v17, %s7219_s26  ;;  %v1287_v27 = vcombine.low %v1033_v1, %v1037_v4  ;;  %v985_v29 = vrot.slane %v629_v5, %v7548_v48  ;;  %v989_v32 = vrot.slane %v631_v8, %v7548_v48 }
  0xf2   : > { %1472 = vrot.lane.b32.xlu0 %v7625_v20, %s7219_s26  ;;  %v493_v33 = vadd.f32 %v5735_v13, %v7534_v30  ;;  %v7638_v35 = vcombine.low %v977_v25, %v981_v16  ;;  %v1209_v36 = vrot.slane %v7595_v49, %v7564_v9  ;;  %v1304_v37 = vcombine.low %v1049_v18, %v1053_v14  ;;  %v487_v10 = vpop.f32.mrf.mxu0 }
  0xf3   : > { %v485_v38 = vadd.f32 %v7534_v30, %v484_v22  ;;  %v1216_v39 = vrot.slane %v1202_v21, %v7564_v9  ;;  %v1226_v40 = vrot.slane %v1218_v19, %v7564_v9  ;;  %v1233_v43 = vrot.slane %v1219_v26, %v7564_v9 }
  0xf4   : > { %v828_v41 = vcombine.high %v493_v33, %v493_v33  ;;  %v835_v42 = vrot.slane %v493_v33, %v7537_v31  ;;  %v1311_v44 = vrot.slane %v1303_v24, %v7564_v9  ;;  %v1294_v47 = vrot.slane %v7628_v23, %v7564_v9 }
  0xf5   : > { %1546 = vrot.lane.b32.xlu1 %v7622_v17, %s7220_s27  ;;  %v730_v45 = vcombine.high %v485_v38, %v485_v38  ;;  %v737_v46 = vrot.slane %v485_v38, %v7537_v31  ;;  %v1318_v52 = vrot.slane %v1304_v37, %v7564_v9  ;;  %v1301_v53 = vrot.slane %v1287_v27, %v7564_v9 }
  0xf6   : > { %1536 = vrot.lane.b32.xlu0 %v7625_v20, %s7220_s27  ;;  %v842_v49 = vrot.slane %v828_v41, %v7537_v31  ;;  %v843_v50 = vcombine.high %v835_v42, %v835_v42  ;;  %v851_v51 = vrot.slane %v835_v42, %v7537_v31  ;;  %v7666_v60 = vcombine.low %v1209_v36, %v1216_v39 }
  0xf7   : > { %v744_v54 = vrot.slane %v730_v45, %v7537_v31  ;;  %v745_v55 = vcombine.high %v737_v46, %v737_v46  ;;  %v1236_v61 = vcombine.low %v985_v29, %v989_v32  ;;  %v7671_v1 = vcombine.low %v1226_v40, %v1233_v43 }
  0xf8   : > { %v844_v56 = vcombine.high %v842_v49, %v842_v49  ;;  %v7661_v57 = vrot.slane %v842_v49, %v7537_v31  ;;  %v865_v58 = vrot.slane %v843_v50, %v7537_v31  ;;  %v873_v59 = vcombine.high %v851_v51, %v851_v51 }
  0xf9   : > { %1594 = vrot.lane.b32.xlu1 %v7622_v17, %s7221_s28  ;;  %v746_v62 = vcombine.high %v744_v54, %v744_v54  ;;  %v760_v63 = vrot.slane %v744_v54, %v7537_v31  ;;  %v1243_v4 = vrot.slane %v7638_v35, %v7564_v9  ;;  %v7678_v5 = vcombine.low %v1311_v44, %v1318_v52 }
  0xfa   : > { %1584 = vrot.lane.b32.xlu0 %v7625_v20, %s7221_s28  ;;  %v7674_v2 = vrot.slane %v844_v56, %v7537_v31  ;;  %v875_v3 = vcombine.high %v865_v58, %v865_v58  ;;  %v1121_v6 = vrot.slane %v851_v51, %v7548_v48  ;;  %v7682_v7 = vrot.slane %v737_v46, %v7537_v31 }
  0xfb   : > { %v774_v8 = vrot.slane %v746_v62, %v7537_v31  ;;  %v874_v11 = vcombine.high %v7661_v57, %v7661_v57  ;;  %v1125_v12 = vrot.slane %v865_v58, %v7548_v48  ;;  %v1129_v13 = vrot.slane %v873_v59, %v7548_v48 }
  0xfc   : > { %v7690_v14 = vrot.slane %v745_v55, %v7537_v31  ;;  %v876_v15 = vcombine.high %v7674_v2, %v7674_v2  ;;  %v1133_v16 = vrot.slane %v875_v3, %v7548_v48  ;;  %v776_v18 = vcombine.high %v760_v63, %v760_v63 }
  0xfd   : > { %1538 = vrot.lane.b32.xlu1 %v7666_v60, %s7220_s27  ;;  %v778_v19 = vcombine.high %v774_v8, %v774_v8  ;;  %v7699_v21 = vcombine.low %v1294_v47, %v1301_v53  ;;  %v7702_v22 = vrot.slane %v1236_v61, %v7564_v9  ;;  %v496_v23 = vadd.f32 %v5736_v0, %v7534_v30 }
  0xfe   : > { %1474 = vrot.lane.b32.xlu0 %v7666_v60, %s7219_s26  ;;  %v488_v24 = vadd.f32 %v7534_v30, %v487_v10  ;;  %v1137_v25 = vrot.slane %v7661_v57, %v7548_v48  ;;  %v1141_v26 = vrot.slane %v7674_v2, %v7548_v48  ;;  %v775_v27 = vcombine.high %v7682_v7, %v7682_v7 }
  0xff   : > { %v1073_v29 = vrot.slane %v760_v63, %v7548_v48  ;;  %v7713_v32 = vcombine.low %v1121_v6, %v1125_v12  ;;  %v1077_v33 = vrot.slane %v774_v8, %v7548_v48  ;;  %v7717_v36 = vrot.slane %v776_v18, %v7548_v48 }
 0x100   : > { %v7720_v30 = vrot.slane %v778_v19, %v7548_v48  ;;  %v7725_v37 = vrot.slane %v874_v11, %v7548_v48  ;;  %v7728_v38 = vrot.slane %v876_v15, %v7548_v48  ;;  %v1389_v39 = vcombine.low %v1129_v13, %v1133_v16 }
 0x101   : > { %1586 = vrot.lane.b32.xlu1 %v7666_v60, %s7221_s28  ;;  %v777_v40 = vcombine.high %v7690_v14, %v7690_v14  ;;  %v1057_v41 = vrot.slane %v7682_v7, %v7548_v48  ;;  %v7736_v42 = vcombine.low %v1073_v29, %v1077_v33  ;;  %v877_v43 = vcombine.high %v496_v23, %v496_v23 }
 0x102   : > { %1484 = vrot.lane.b32.xlu0 %v7699_v21, %s7219_s26  ;;  %v884_v44 = vrot.slane %v496_v23, %v7537_v31  ;;  %v1061_v45 = vrot.slane %v7690_v14, %v7548_v48  ;;  %v7742_v46 = vrot.slane %v775_v27, %v7548_v48  ;;  %v779_v47 = vcombine.high %v488_v24, %v488_v24 }
 0x103   : > { %v786_v49 = vrot.slane %v488_v24, %v7537_v31  ;;  %v1396_v50 = vrot.slane %v7713_v32, %v7564_v9  ;;  %v891_v51 = vrot.slane %v877_v43, %v7537_v31  ;;  %v1403_v54 = vrot.slane %v1389_v39, %v7564_v9 }
 0x104   : > { %v892_v52 = vcombine.high %v884_v44, %v884_v44  ;;  %v900_v53 = vrot.slane %v884_v44, %v7537_v31  ;;  %v793_v55 = vrot.slane %v779_v47, %v7537_v31  ;;  %v1406_v35 = vcombine.low %v7725_v37, %v7728_v38 }
 0x105   : > { %1476 = vrot.lane.b32.xlu1 %v7671_v1, %s7219_s26  ;;  %v794_v56 = vcombine.high %v786_v49, %v786_v49  ;;  %v802_v58 = vrot.slane %v786_v49, %v7537_v31  ;;  %v893_v59 = vcombine.high %v891_v51, %v891_v51  ;;  %v907_v61 = vrot.slane %v891_v51, %v7537_v31 }
 0x106   : > { %1548 = vrot.lane.b32.xlu0 %v7699_v21, %s7220_s27  ;;  %v914_v62 = vrot.slane %v892_v52, %v7537_v31  ;;  %v922_v63 = vcombine.high %v900_v53, %v900_v53  ;;  %v1153_v0 = vrot.slane %v900_v53, %v7548_v48  ;;  %v795_v3 = vcombine.high %v793_v55, %v793_v55 }
 0x107   : > { %v809_v6 = vrot.slane %v793_v55, %v7537_v31  ;;  %v816_v8 = vrot.slane %v794_v56, %v7537_v31  ;;  %v921_v10 = vrot.slane %v893_v59, %v7537_v31  ;;  %v923_v11 = vcombine.high %v907_v61, %v907_v61 }
 0x108   : > { %v924_v12 = vcombine.high %v914_v62, %v914_v62  ;;  %v1157_v13 = vrot.slane %v914_v62, %v7548_v48  ;;  %v1161_v15 = vrot.slane %v922_v63, %v7548_v48  ;;  %v1169_v16 = vrot.slane %v907_v61, %v7548_v48 }
 0x109   : > { %1486 = vrot.lane.b32.xlu1 %v7678_v5, %s7219_s26  ;;  %v823_v18 = vrot.slane %v795_v3, %v7537_v31  ;;  %v824_v19 = vcombine.high %v802_v58, %v802_v58  ;;  %v925_v23 = vcombine.high %v921_v10, %v921_v10  ;;  %v1173_v27 = vrot.slane %v921_v10, %v7548_v48 }
 0x10a   : > { %1596 = vrot.lane.b32.xlu0 %v7699_v21, %s7221_s28  ;;  %v1165_v24 = vrot.slane %v924_v12, %v7548_v48  ;;  %v1177_v29 = vrot.slane %v923_v11, %v7548_v48  ;;  %v1422_v32 = vcombine.low %v1153_v0, %v1157_v13  ;;  %v825_v33 = vcombine.high %v809_v6, %v809_v6 }
 0x10b   : > { %v826_v39 = vcombine.high %v816_v8, %v816_v8  ;;  %v827_v43 = vcombine.high %v823_v18, %v823_v18  ;;  %v1181_v44 = vrot.slane %v925_v23, %v7548_v48  ;;  %v1439_v49 = vcombine.low %v1169_v16, %v1173_v27 }
 0x10c   : > { %v1423_v47 = vcombine.low %v1161_v15, %v1165_v24  ;;  %v1089_v31 = vrot.slane %v802_v58, %v7548_v48  ;;  %v1093_v51 = vrot.slane %v816_v8, %v7548_v48  ;;  %v1097_v52 = vrot.slane %v824_v19, %v7548_v48 }
 0x10d   : > { %1550 = vrot.lane.b32.xlu1 %v7678_v5, %s7220_s27  ;;  %v1101_v53 = vrot.slane %v826_v39, %v7548_v48  ;;  %v1105_v55 = vrot.slane %v809_v6, %v7548_v48  ;;  %v1069_v56 = vrot.slane %v777_v40, %v7548_v48  ;;  %v1109_v59 = vrot.slane %v823_v18, %v7548_v48 }
 0x10e   : > { %1540 = vrot.lane.b32.xlu0 %v7671_v1, %s7220_s27  ;;  %v1113_v58 = vrot.slane %v825_v33, %v7548_v48  ;;  %v1117_v61 = vrot.slane %v827_v43, %v7548_v48  ;;  %v1354_v62 = vcombine.low %v1089_v31, %v1093_v51  ;;  %v1338_v0 = vcombine.low %v7717_v36, %v7720_v30  ;;  %v5669_v33 = vld [vmem:[%s7891_s12 + $0x28] sm:$0xff]   ;;  %v7925_v31 = vpop.permute.xlu1 %5848 }
 0x10f   : > { %v1355_v63 = vcombine.low %v1097_v52, %v1101_v53  ;;  %v1345_v3 = vrot.slane %v7736_v42, %v7564_v9  ;;  %v7791_v6 = vcombine.low %v1396_v50, %v1403_v54  ;;  %v1371_v8 = vcombine.low %v1105_v55, %v1109_v59  ;;  %10513 = vst [vmem:[#allocation4_spill] sm:$0xff] %v7925_v31  ;;  %v5602_v53 = vld [vmem:[%s7891_s12] sm:$0xff]  }
 0x110   : > { %v1430_v10 = vrot.slane %v1422_v32, %v7564_v9  ;;  %v1437_v40 = vrot.slane %v1423_v47, %v7564_v9  ;;  %v1352_v11 = vrot.slane %v1338_v0, %v7564_v9  ;;  %v1440_v12 = vcombine.low %v1177_v29, %v1181_v44 }
 0x111   : > { %1598 = vrot.lane.b32.xlu1 %v7678_v5, %s7221_s28  ;;  %v1447_v13 = vrot.slane %v1439_v49, %v7564_v9  ;;  %v1362_v36 = vrot.slane %v1354_v62, %v7564_v9  ;;  %v1369_v42 = vrot.slane %v1355_v63, %v7564_v9  ;;  %v1372_v50 = vcombine.low %v1113_v58, %v1117_v61 }
 0x112   : > { %1588 = vrot.lane.b32.xlu0 %v7671_v1, %s7221_s28  ;;  %v7802_v30 = vcombine.low %v1430_v10, %v1437_v40  ;;  %v1379_v54 = vrot.slane %v1371_v8, %v7564_v9  ;;  %v7810_v15 = vcombine.low %v1243_v4, %v7702_v22  ;;  %v7812_v16 = vcombine.low %v1345_v3, %v1352_v11 }
 0x113   : > { %v1454_v18 = vrot.slane %v1440_v12, %v7564_v9  ;;  %v7815_v19 = vcombine.low %v1362_v36, %v1369_v42  ;;  %v1386_v23 = vrot.slane %v1372_v50, %v7564_v9  ;;  %v1405_v24 = vcombine.low %v1137_v25, %v1141_v26  ;;  %v5670_v12 = vld [vmem:[%s7891_s12 + $0x30] sm:$0xff]  }
 0x114   : > { %v1320_v22 = vcombine.low %v1057_v41, %v1061_v45  ;;  %v1321_v2 = vcombine.low %v7742_v46, %v1069_v56  ;;  %v1420_v26 = vrot.slane %v1406_v35, %v7564_v9  ;;  %v7907_v45 = vpop.permute.xlu0 %5853  ;;  %v506_v46 = vand.u32 1, %v7529_v28  ;;  %v5665_v56 = vld [vmem:[%s7891_s12 + $0x8] sm:$0xff]  }
 0x115   : > { %1478 = vrot.lane.b32.xlu1 %v7810_v15, %s7219_s26  ;;  %v7828_v4 = vcombine.low %v1447_v13, %v1454_v18  ;;  %v7839_v57 = vcombine.low %v1379_v54, %v1386_v23  ;;  %v1413_v25 = vrot.slane %v1405_v24, %v7564_v9  ;;  %v501_v43 = vadd.s32 8, %v7529_v28  ;;  %v5671_v54 = vld [vmem:[%s7891_s12 + $0x38] sm:$0xff]  }
 0x116   : > { %1496 = vrot.lane.b32.xlu0 %v7791_v6, %s7219_s26  ;;  %v1328_v48 = vrot.slane %v1320_v22, %v7564_v9  ;;  %v1335_v7 = vrot.slane %v1321_v2, %v7564_v9  ;;  %v5668_v9 = vld [vmem:[%s7891_s12 + $0x20] sm:$0xff]   ;;  %vm7913_vm6 = vcmp.eq.s32.totalorder %v506_v46, 0  ;;  %v5623_v44 = vunpack.c.l.bf16 %v5669_v33  ;;  %v5667_v46 = vld [vmem:[%s7891_s12 + $0x18] sm:$0xff]  }
 0x117   : > { %v7851_v14 = vcombine.low %v1413_v25, %v1420_v26  ;;  %v5619_v38 = vunpack.c.l.bf16 %v5668_v9  ;;  %v5620_v41 = vunpack.c.h.bf16 %v5668_v9  ;;  %v5624_v47 = vunpack.c.h.bf16 %v5669_v33 }
 0x118   : > { %v7855_v37 = vcombine.low %v1328_v48, %v1335_v7  ;;  %v7911_v27 = vpop.permute.xlu0 %5858  ;;  %1779 = vst.msk [vmem:[#allocation2 + $0x91] sm:$0xff] %vm1768_vm5, %v5623_v44  ;;  %v513_v51 = vand.u32 1, %v501_v43  ;;  %v5603_v55 = vunpack.c.l.bf16 %v5602_v53  ;;  %v5607_v58 = vunpack.c.l.bf16 %v5665_v56  ;;  %v5666_v48 = vld [vmem:[%s7891_s12 + $0x10] sm:$0xff]  }
 0x119   : > { %1542 = vrot.lane.b32.xlu1 %v7810_v15, %s7220_s27  ;;  %1777 = vst.msk [vmem:[#allocation2 + $0x79] sm:$0xff] %vm1768_vm5, %v5619_v38  ;;  %1778 = vst.msk [vmem:[#allocation2 + $0x81] sm:$0xff] %vm1768_vm5, %v5620_v41  ;;  %v5604_v8 = vunpack.c.h.bf16 %v5602_v53  ;;  %v5608_v11 = vunpack.c.h.bf16 %v5665_v56  ;;  %v5627_v36 = vunpack.c.l.bf16 %v5670_v12  ;;  %v5628_v42 = vunpack.c.h.bf16 %v5670_v12 }
 0x11a   : > { %1560 = vrot.lane.b32.xlu0 %v7791_v6, %s7220_s27  ;;  %1780 = vst.msk [vmem:[#allocation2 + $0x99] sm:$0xff] %vm1768_vm5, %v5624_v47  ;;  %vm7928_vm7 = vcmp.eq.s32.totalorder %v513_v51, 0  ;;  %1769 = vst.msk [vmem:[#allocation2 + $0x19] sm:$0xff] %vm1768_vm5, %v5603_v55  ;;  %v5632_v23 = vunpack.c.h.bf16 %v5671_v54  ;;  %v5631_v26 = vunpack.c.l.bf16 %v5671_v54  ;;  %v5612_v7 = vunpack.c.h.bf16 %v5666_v48 }
 0x11b   : > { %1771 = vst.msk [vmem:[#allocation2 + $0x31] sm:$0xff] %vm1768_vm5, %v5607_v58  ;;  %1770 = vst.msk [vmem:[#allocation2 + $0x21] sm:$0xff] %vm1768_vm5, %v5604_v8  ;;  %v5615_v33 = vunpack.c.l.bf16 %v5667_v46  ;;  %v5677_v58 = vld [vmem:[%s7891_s12 + $0x68] sm:$0xff]  }
 0x11c   : > { %1772 = vst.msk [vmem:[#allocation2 + $0x39] sm:$0xff] %vm1768_vm5, %v5608_v11  ;;  %1781 = vst.msk [vmem:[#allocation2 + $0xa9] sm:$0xff] %vm1768_vm5, %v5627_v36  ;;  %v5673_v36 = vld [vmem:[%s7891_s12 + $0x48] sm:$0xff]  }
 0x11d   : > { %1590 = vrot.lane.b32.xlu1 %v7810_v15, %s7221_s28  ;;  %1782 = vst.msk [vmem:[#allocation2 + $0xb1] sm:$0xff] %vm1768_vm5, %v5628_v42  ;;  %1784 = vst.msk [vmem:[#allocation2 + $0xc9] sm:$0xff] %vm1768_vm5, %v5632_v23  ;;  %v5640_v54 = vunpack.c.h.bf16 %v5673_v36 }
 0x11e   : > { %1608 = vrot.lane.b32.xlu0 %v7791_v6, %s7221_s28  ;;  %1783 = vst.msk [vmem:[#allocation2 + $0xc1] sm:$0xff] %vm1768_vm5, %v5631_v26  ;;  %1774 = vst.msk [vmem:[#allocation2 + $0x51] sm:$0xff] %vm1768_vm5, %v5612_v7  ;;  %v5679_v7 = vld [vmem:[%s7891_s12 + $0x78] sm:$0xff]  }
 0x11f   : > { %1775 = vst.msk [vmem:[#allocation2 + $0x61] sm:$0xff] %vm1768_vm5, %v5615_v33  ;;  %1788 = vst.msk [vmem:[#allocation2 + $0xf9] sm:$0xff] %vm1768_vm5, %v5640_v54 }
 0x121   : > { %1498 = vrot.lane.b32.xlu1 %v7851_v14, %s7219_s26 }
 0x122   : > { %1488 = vrot.lane.b32.xlu0 %v7855_v37, %s7219_s26 }
 0x125   : > { %1562 = vrot.lane.b32.xlu1 %v7851_v14, %s7220_s27 }
 0x126   : > { %1552 = vrot.lane.b32.xlu0 %v7855_v37, %s7220_s27 }
 0x129   : > { %1610 = vrot.lane.b32.xlu1 %v7851_v14, %s7221_s28 }
 0x12a   : > { %1600 = vrot.lane.b32.xlu0 %v7855_v37, %s7221_s28 }
 0x12d   : > { %1490 = vrot.lane.b32.xlu1 %v7812_v16, %s7219_s26 }
 0x12e   : > { %1500 = vrot.lane.b32.xlu0 %v7802_v30, %s7219_s26 }
 0x131   : > { %1554 = vrot.lane.b32.xlu1 %v7812_v16, %s7220_s27 }
 0x132   : > { %1564 = vrot.lane.b32.xlu0 %v7802_v30, %s7220_s27 }
 0x135   : > { %1602 = vrot.lane.b32.xlu1 %v7812_v16, %s7221_s28 }
 0x136   : > { %1612 = vrot.lane.b32.xlu0 %v7802_v30, %s7221_s28 }
 0x139   : > { %1502 = vrot.lane.b32.xlu1 %v7828_v4, %s7219_s26 }
 0x13a   : > { %1492 = vrot.lane.b32.xlu0 %v7815_v19, %s7219_s26 }
 0x13d   : > { %1566 = vrot.lane.b32.xlu1 %v7828_v4, %s7220_s27 }
 0x13e   : > { %1556 = vrot.lane.b32.xlu0 %v7815_v19, %s7220_s27 }
 0x141   : > { %1614 = vrot.lane.b32.xlu1 %v7828_v4, %s7221_s28 }
 0x142   : > { %1604 = vrot.lane.b32.xlu0 %v7815_v19, %s7221_s28 }
 0x145   : > { %1494 = vrot.lane.b32.xlu1 %v7839_v57, %s7219_s26 }
 0x149   : > { %1558 = vrot.lane.b32.xlu1 %v7839_v57, %s7220_s27 }
 0x14d   : > { %1606 = vrot.lane.b32.xlu1 %v7839_v57, %s7221_s28 }
 0x157   : > { %v1481_v32 = vpop.permute.xlu0 %1480 }
 0x158   : > { %v1524_v39 = vsel %vm7913_vm6, %v7580_v34, %v1481_v32 }
 0x159   : > { %1849 = vrot.lane.b32.xlu0 %v1524_v39, %s7222_s15  ;;  %v5616_v39 = vunpack.c.h.bf16 %v5667_v46 }
 0x15b   : > { %v1545_v49 = vpop.permute.xlu0 %1544  ;;  %1776 = vst.msk [vmem:[#allocation2 + $0x69] sm:$0xff] %vm1768_vm5, %v5616_v39  ;;  %v5674_v39 = vld [vmem:[%s7891_s12 + $0x50] sm:$0xff]  }
 0x15f   : > { %v1593_v52 = vpop.permute.xlu0 %1592 }
 0x160   : > { %v1636_v28 = vsel %vm7913_vm6, %v1545_v49, %v1593_v52  ;;  %v5676_v52 = vld [vmem:[%s7891_s12 + $0x60] sm:$0xff]  }
 0x161   : > { %1853 = vrot.lane.b32.xlu0 %v1636_v28, %s7222_s15  ;;  %v5651_v28 = vunpack.c.l.bf16 %v5676_v52  ;;  %v5652_v55 = vunpack.c.h.bf16 %v5676_v52 }
 0x163   : > { %v1483_v59 = vpop.permute.xlu1 %1482  ;;  %1793 = vst.msk [vmem:[#allocation2 + $0x139] sm:$0xff] %vm1768_vm5, %v5651_v28  ;;  %1794 = vst.msk [vmem:[#allocation2 + $0x141] sm:$0xff] %vm1768_vm5, %v5652_v55 }
 0x164   : > { %v1525_v61 = vsel %vm7928_vm7, %v7622_v17, %v1483_v59  ;;  %v1473_v62 = vpop.permute.xlu0 %1472 }
 0x165   : > { %1851 = vrot.lane.b32.xlu1 %v1525_v61, %s7222_s15  ;;  %v1520_v63 = vsel %vm7913_vm6, %v7625_v20, %v1473_v62  ;;  %v5655_v62 = vunpack.c.l.bf16 %v5677_v58 }
 0x166   : > { %1833 = vrot.lane.b32.xlu0 %v1520_v63, %s7222_s15  ;;  %v5656_v63 = vunpack.c.h.bf16 %v5677_v58 }
 0x167   : > { %v1547_v0 = vpop.permute.xlu1 %1546  ;;  %1795 = vst.msk [vmem:[#allocation2 + $0x151] sm:$0xff] %vm1768_vm5, %v5655_v62 }
 0x168   : > { %v1537_v3 = vpop.permute.xlu0 %1536  ;;  %1796 = vst.msk [vmem:[#allocation2 + $0x159] sm:$0xff] %vm1768_vm5, %v5656_v63 }
 0x16b   : > { %v1595_v10 = vpop.permute.xlu1 %1594 }
 0x16c   : > { %v1637_v17 = vsel %vm7928_vm7, %v1547_v0, %v1595_v10  ;;  %v1585_v40 = vpop.permute.xlu0 %1584 }
 0x16d   : > { %1855 = vrot.lane.b32.xlu1 %v1637_v17, %s7222_s15  ;;  %v1632_v20 = vsel %vm7913_vm6, %v1537_v3, %v1585_v40  ;;  %v5672_v17 = vld [vmem:[%s7891_s12 + $0x40] sm:$0xff]  }
 0x16e   : > { %1837 = vrot.lane.b32.xlu0 %v1632_v20, %s7222_s15  ;;  %v5635_v40 = vunpack.c.l.bf16 %v5672_v17  ;;  %v5636_v20 = vunpack.c.h.bf16 %v5672_v17 }
 0x16f   : > { %v1539_v13 = vpop.permute.xlu1 %1538 }
 0x170   : > { %v1475_v50 = vpop.permute.xlu0 %1474  ;;  %1785 = vst.msk [vmem:[#allocation2 + $0xd9] sm:$0xff] %vm1768_vm5, %v5635_v40  ;;  %1786 = vst.msk [vmem:[#allocation2 + $0xe1] sm:$0xff] %vm1768_vm5, %v5636_v20 }
 0x171   : > { %v1521_v18 = vsel %vm7928_vm7, %v7666_v60, %v1475_v50  ;;  %v5639_v50 = vunpack.c.l.bf16 %v5673_v36 }
 0x172   : > { %1835 = vrot.lane.b32.xlu1 %v1521_v18, %s7222_s15 }
 0x173   : > { %v1587_v24 = vpop.permute.xlu1 %1586  ;;  %1787 = vst.msk [vmem:[#allocation2 + $0xf1] sm:$0xff] %vm1768_vm5, %v5639_v50 }
 0x174   : > { %v1485_v35 = vpop.permute.xlu0 %1484  ;;  %v1633_v22 = vsel %vm7928_vm7, %v1539_v13, %v1587_v24 }
 0x175   : > { %v1526_v2 = vsel %vm7913_vm6, %v7699_v21, %v1485_v35  ;;  %v5611_v21 = vunpack.c.l.bf16 %v5666_v48 }
 0x176   : > { %1839 = vrot.lane.b32.xlu1 %v1633_v22, %s7222_s15  ;;  %1857 = vrot.lane.b32.xlu0 %v1526_v2, %s7222_s15  ;;  %v5678_v22 = vld [vmem:[%s7891_s12 + $0x70] sm:$0xff]  }
 0x177   : > { %v1477_v60 = vpop.permute.xlu1 %1476  ;;  %1773 = vst.msk [vmem:[#allocation2 + $0x49] sm:$0xff] %vm1768_vm5, %v5611_v21  ;;  %v5659_v2 = vunpack.c.l.bf16 %v5678_v22 }
 0x178   : > { %v1549_v25 = vpop.permute.xlu0 %1548  ;;  %v1522_v44 = vsel %vm7913_vm6, %v7671_v1, %v1477_v60  ;;  %v5660_v60 = vunpack.c.h.bf16 %v5678_v22 }
 0x179   : > { %1797 = vst.msk [vmem:[#allocation2 + $0x169] sm:$0xff] %vm1768_vm5, %v5659_v2 }
 0x17a   : > { %1798 = vst.msk [vmem:[#allocation2 + $0x171] sm:$0xff] %vm1768_vm5, %v5660_v60 }
 0x17b   : > { %v1487_v9 = vpop.permute.xlu1 %1486 }
 0x17c   : > { %v1527_v38 = vsel %vm7928_vm7, %v7678_v5, %v1487_v9  ;;  %v1597_v41 = vpop.permute.xlu0 %1596 }
 0x17d   : > { %1859 = vrot.lane.b32.xlu1 %v1527_v38, %s7222_s15  ;;  %v1638_v32 = vsel %vm7913_vm6, %v1549_v25, %v1597_v41  ;;  %v5663_v38 = vunpack.c.l.bf16 %v5679_v7  ;;  %v5664_v41 = vunpack.c.h.bf16 %v5679_v7 }
 0x17e   : > { %1861 = vrot.lane.b32.xlu0 %v1638_v32, %s7222_s15 }
 0x17f   : > { %v1551_v43 = vpop.permute.xlu1 %1550  ;;  %1799 = vst.msk [vmem:[#allocation2 + $0x181] sm:$0xff] %vm1768_vm5, %v5663_v38  ;;  %1800 = vst.msk [vmem:[#allocation2 + $0x189] sm:$0xff] %vm1768_vm5, %v5664_v41 }
 0x180   : > { %v1541_v5 = vpop.permute.xlu0 %1540 }
 0x182   : > { %1841 = vrot.lane.b32.xlu0 %v1522_v44, %s7222_s15 }
 0x183   : > { %v1599_v47 = vpop.permute.xlu1 %1598 }
 0x184   : > { %v1639_v49 = vsel %vm7928_vm7, %v1551_v43, %v1599_v47  ;;  %v1589_v51 = vpop.permute.xlu0 %1588  ;;  %v5643_v43 = vunpack.c.l.bf16 %v5674_v39 }
 0x185   : > { %1863 = vrot.lane.b32.xlu1 %v1639_v49, %s7222_s15  ;;  %v1634_v53 = vsel %vm7913_vm6, %v1541_v5, %v1589_v51  ;;  %v5644_v5 = vunpack.c.h.bf16 %v5674_v39  ;;  %v5675_v51 = vld [vmem:[%s7891_s12 + $0x58] sm:$0xff]  }
 0x186   : > { %1845 = vrot.lane.b32.xlu0 %v1634_v53, %s7222_s15  ;;  %1789 = vst.msk [vmem:[#allocation2 + $0x109] sm:$0xff] %vm1768_vm5, %v5643_v43  ;;  %v5647_v53 = vunpack.c.l.bf16 %v5675_v51  ;;  %v5648_v28 = vunpack.c.h.bf16 %v5675_v51 }
 0x187   : > { %v1479_v56 = vpop.permute.xlu1 %1478  ;;  %1790 = vst.msk [vmem:[#allocation2 + $0x111] sm:$0xff] %vm1768_vm5, %v5644_v5 }
 0x188   : > { %v1523_v1 = vsel %vm7928_vm7, %v7810_v15, %v1479_v56  ;;  %v1497_v59 = vpop.permute.xlu0 %1496  ;;  %1791 = vst.msk [vmem:[#allocation2 + $0x121] sm:$0xff] %vm1768_vm5, %v5647_v53  ;;  %1792 = vst.msk [vmem:[#allocation2 + $0x129] sm:$0xff] %vm1768_vm5, %v5648_v28 }
 0x189   : > { %1843 = vrot.lane.b32.xlu1 %v1523_v1, %s7222_s15  ;;  %v1532_v61 = vsel %vm7913_vm6, %v7791_v6, %v1497_v59 }
 0x18a   : > { %1881 = vrot.lane.b32.xlu0 %v1532_v61, %s7222_s15 }
 0x18b   : > { %v1543_v0 = vpop.permute.xlu1 %1542 }
 0x18c   : > { %v1561_v3 = vpop.permute.xlu0 %1560 }
 0x18f   : > { %v1591_v15 = vpop.permute.xlu1 %1590 }
 0x190   : > { %v1635_v8 = vsel %vm7928_vm7, %v1543_v0, %v1591_v15  ;;  %v1609_v10 = vpop.permute.xlu0 %1608 }
 0x191   : > { %1847 = vrot.lane.b32.xlu1 %v1635_v8, %s7222_s15  ;;  %v1644_v6 = vsel %vm7913_vm6, %v1561_v3, %v1609_v10 }
 0x192   : > { %1885 = vrot.lane.b32.xlu0 %v1644_v6, %s7222_s15 }
 0x193   : > { %v1499_v11 = vpop.permute.xlu1 %1498 }
 0x194   : > { %v1533_v12 = vsel %vm7928_vm7, %v7851_v14, %v1499_v11  ;;  %v1489_v13 = vpop.permute.xlu0 %1488 }
 0x195   : > { %1883 = vrot.lane.b32.xlu1 %v1533_v12, %s7222_s15  ;;  %v1528_v42 = vsel %vm7913_vm6, %v7855_v37, %v1489_v13 }
 0x196   : > { %1865 = vrot.lane.b32.xlu0 %v1528_v42, %s7222_s15 }
 0x197   : > { %v1563_v18 = vpop.permute.xlu1 %1562 }
 0x198   : > { %v1553_v23 = vpop.permute.xlu0 %1552 }
 0x19b   : > { %v1611_v14 = vpop.permute.xlu1 %1610 }
 0x19c   : > { %v1645_v24 = vsel %vm7928_vm7, %v1563_v18, %v1611_v14  ;;  %v1601_v35 = vpop.permute.xlu0 %1600 }
 0x19d   : > { %1887 = vrot.lane.b32.xlu1 %v1645_v24, %s7222_s15  ;;  %v1640_v37 = vsel %vm7913_vm6, %v1553_v23, %v1601_v35 }
 0x19e   : > { %1869 = vrot.lane.b32.xlu0 %v1640_v37, %s7222_s15 }
 0x19f   : > { %v1491_v25 = vpop.permute.xlu1 %1490 }
 0x1a0   : > { %v1529_v26 = vsel %vm7928_vm7, %v7812_v16, %v1491_v25  ;;  %v1501_v48 = vpop.permute.xlu0 %1500 }
 0x1a1   : > { %1867 = vrot.lane.b32.xlu1 %v1529_v26, %s7222_s15  ;;  %v1534_v9 = vsel %vm7913_vm6, %v7802_v30, %v1501_v48 }
 0x1a2   : > { %1889 = vrot.lane.b32.xlu0 %v1534_v9, %s7222_s15 }
 0x1a3   : > { %v1555_v21 = vpop.permute.xlu1 %1554 }
 0x1a4   : > { %v1565_v46 = vpop.permute.xlu0 %1564 }
 0x1a7   : > { %v1603_v16 = vpop.permute.xlu1 %1602 }
 0x1a8   : > { %v1641_v32 = vsel %vm7928_vm7, %v1555_v21, %v1603_v16  ;;  %v1613_v33 = vpop.permute.xlu0 %1612 }
 0x1a9   : > { %1871 = vrot.lane.b32.xlu1 %v1641_v32, %s7222_s15  ;;  %v1646_v30 = vsel %vm7913_vm6, %v1565_v46, %v1613_v33 }
 0x1aa   : > { %1893 = vrot.lane.b32.xlu0 %v1646_v30, %s7222_s15 }
 0x1ab   : > { %v1503_v44 = vpop.permute.xlu1 %1502 }
 0x1ac   : > { %v1535_v47 = vsel %vm7928_vm7, %v7828_v4, %v1503_v44  ;;  %v1493_v49 = vpop.permute.xlu0 %1492 }
 0x1ad   : > { %1891 = vrot.lane.b32.xlu1 %v1535_v47, %s7222_s15  ;;  %v1530_v52 = vsel %vm7913_vm6, %v7815_v19, %v1493_v49 }
 0x1ae   : > { %1873 = vrot.lane.b32.xlu0 %v1530_v52, %s7222_s15 }
 0x1af   : > { %v1567_v55 = vpop.permute.xlu1 %1566 }
 0x1b0   : > { %v1557_v56 = vpop.permute.xlu0 %1556 }
 0x1b3   : > { %v1615_v1 = vpop.permute.xlu1 %1614 }
 0x1b4   : > { %v1647_v4 = vsel %vm7928_vm7, %v1567_v55, %v1615_v1  ;;  %v1605_v59 = vpop.permute.xlu0 %1604 }
 0x1b5   : > { %1895 = vrot.lane.b32.xlu1 %v1647_v4, %s7222_s15  ;;  %v1642_v19 = vsel %vm7913_vm6, %v1557_v56, %v1605_v59 }
 0x1b6   : > { %1877 = vrot.lane.b32.xlu0 %v1642_v19, %s7222_s15 }
 0x1b7   : > { %v1495_v58 = vpop.permute.xlu1 %1494 }
 0x1b8   : > { %v1531_v61 = vsel %vm7928_vm7, %v7839_v57, %v1495_v58 }
 0x1b9   : > { %1875 = vrot.lane.b32.xlu1 %v1531_v61, %s7222_s15 }
 0x1bb   : > { %v1559_v62 = vpop.permute.xlu1 %1558 }
 0x1bf   : > { %v1607_v63 = vpop.permute.xlu1 %1606 }
 0x1c0   : > { %v1643_v0 = vsel %vm7928_vm7, %v1559_v62, %v1607_v63 }
 0x1c1   : > { %1879 = vrot.lane.b32.xlu1 %v1643_v0, %s7222_s15 }
 0x1cb   : > { %v1850_v3 = vpop.permute.xlu0 %1849 }
 0x1cc   : > { %1938 = vst.msk [vmem:[#allocation2 + $0x79] sm:$0xff] %vm1929_vm8, %v1850_v3 }
 0x1d3   : > { %v1854_v29 = vpop.permute.xlu0 %1853  ;;  %v1977_v10 = vld [vmem:[#allocation2 + $0x78] sm:$0xff] }
 0x1d4   : > { %1940 = vst.msk [vmem:[#allocation2 + $0x91] sm:$0xff] %vm1929_vm8, %v1854_v29  ;;  %v2090_v2 = vrot.slane %v1977_v10, 1  ;;  %v2267_v43 = vrot.slane %v1977_v10, 2 }
 0x1d7   : > { %v1852_v15 = vpop.permute.xlu1 %1851 }
 0x1d8   : > { %1939 = vst.msk [vmem:[#allocation2 + $0x81] sm:$0xff] %vm1929_vm8, %v1852_v15  ;;  %v1834_v57 = vpop.permute.xlu0 %1833 }
 0x1d9   : > { %1930 = vst.msk [vmem:[#allocation2 + $0x19] sm:$0xff] %vm1929_vm8, %v1834_v57 }
 0x1db   : > { %v1980_v20 = vld [vmem:[#allocation2 + $0x90] sm:$0xff] }
 0x1dc   : > { %v2095_v48 = vrot.slane %v1980_v20, 1  ;;  %v2272_v30 = vrot.slane %v1980_v20, 2 }
 0x1df   : > { %v1856_v8 = vpop.permute.xlu1 %1855  ;;  %v1978_v17 = vld [vmem:[#allocation2 + $0x80] sm:$0xff]  ;;  %v1979_v42 = vld [vmem:[#allocation2 + $0x88] sm:$0x3] }
 0x1e0   : > { %1941 = vst.msk [vmem:[#allocation2 + $0x99] sm:$0xff] %vm1929_vm8, %v1856_v8  ;;  %v5862_v34 = vpack.i.bf16 %v1978_v17, %v1977_v10  ;;  %v1838_v6 = vpop.permute.xlu0 %1837  ;;  %v8093_v54 = vld [vmem:[#allocation2 + $0x18] sm:$0xff]  ;;  %v2091_v14 = vrot.slane %v1978_v17, 1  ;;  %v2093_v24 = vrot.slane %v1979_v42, 1  ;;  %v2268_v7 = vrot.slane %v1978_v17, 2 }
 0x1e1   : > { %1932 = vst.msk [vmem:[#allocation2 + $0x31] sm:$0xff] %vm1929_vm8, %v1838_v6  ;;  %v2270_v9 = vrot.slane %v1979_v42, 2 }
 0x1e2   : > { %5863 = vrot.lane.b32.xlu0 %v5862_v34, %s7223_s16  ;;  %v2092_v41 = vsel %vm2064_vm3, %v2090_v2, %v2091_v14  ;;  %v2094_v21 = vsel %vm2064_vm3, %v2091_v14, %v2093_v24  ;;  %v2269_v51 = vsel %vm2241_vm4, %v2267_v43, %v2268_v7 }
 0x1e3   : > { %v5897_v44 = vpack.i.bf16 %v2094_v21, %v2092_v41  ;;  %v2271_v52 = vsel %vm2241_vm4, %v2268_v7, %v2270_v9  ;;  %v2247_v41 = vrot.slane %v8093_v54, 2 }
 0x1e4   : > { %v1836_v40 = vpop.permute.xlu1 %1835  ;;  %v5907_v56 = vpack.i.bf16 %v2271_v52, %v2269_v51 }
 0x1e5   : > { %1931 = vst.msk [vmem:[#allocation2 + $0x21] sm:$0xff] %vm1929_vm8, %v1836_v40 }
 0x1e7   : > { %v1981_v11 = vld [vmem:[#allocation2 + $0x98] sm:$0xff]  ;;  %v1982_v50 = vld [vmem:[#allocation2 + $0xa0] sm:$0x3] }
 0x1e8   : > { %v5877_v12 = vpack.i.bf16 %v1981_v11, %v1980_v20  ;;  %v1840_v13 = vpop.permute.xlu1 %1839  ;;  %v1858_v36 = vpop.permute.xlu0 %1857  ;;  %v2096_v35 = vrot.slane %v1981_v11, 1  ;;  %v2098_v22 = vrot.slane %v1982_v50, 1  ;;  %v8102_v25 = vld [vmem:[#allocation2 + $0x30] sm:$0xff]  ;;  %v2273_v32 = vrot.slane %v1981_v11, 2 }
 0x1e9   : > { %1933 = vst.msk [vmem:[#allocation2 + $0x39] sm:$0xff] %vm1929_vm8, %v1840_v13  ;;  %1942 = vst.msk [vmem:[#allocation2 + $0xa9] sm:$0xff] %vm1929_vm8, %v1858_v36  ;;  %v2275_v33 = vrot.slane %v1982_v50, 2  ;;  %v2075_v20 = vrot.slane %v8102_v25, 1 }
 0x1ea   : > { %5878 = vrot.lane.b32.xlu0 %v5877_v12, %s7216_s23  ;;  %5868 = vrot.lane.b32.xlu1 %v5877_v12, %s7223_s16  ;;  %v2097_v46 = vsel %vm2064_vm3, %v2095_v48, %v2096_v35  ;;  %v2099_v16 = vsel %vm2064_vm3, %v2096_v35, %v2098_v22  ;;  %v2274_v47 = vsel %vm2241_vm4, %v2272_v30, %v2273_v32 }
 0x1eb   : > { %v5902_v5 = vpack.i.bf16 %v2099_v16, %v2097_v46  ;;  %v2276_v49 = vsel %vm2241_vm4, %v2273_v32, %v2275_v33  ;;  %v2252_v16 = vrot.slane %v8102_v25, 2 }
 0x1ec   : > { %v8095_v18 = vld [vmem:[#allocation2 + $0x20] sm:$0xff]  ;;  %v5912_v55 = vpack.i.bf16 %v2276_v49, %v2274_v47  ;;  %v1967_v62 = vld [vmem:[#allocation2 + $0x28] sm:$0x3] }
 0x1ed   : > { %v5882_v23 = vpack.i.bf16 %v8095_v18, %v8093_v54  ;;  %v2071_v15 = vrot.slane %v8095_v18, 1  ;;  %v2073_v57 = vrot.slane %v1967_v62, 1  ;;  %v2248_v12 = vrot.slane %v8095_v18, 2 }
 0x1ee   : > { %5873 = vrot.lane.b32.xlu1 %v5862_v34, %s7216_s23  ;;  %v2070_v34 = vrot.slane %v8093_v54, 1  ;;  %v2250_v50 = vrot.slane %v1967_v62, 2 }
 0x1ef   : > { %v1860_v37 = vpop.permute.xlu1 %1859  ;;  %5883 = vrot.lane.b32.xlu0 %v5882_v23, %s7223_s16  ;;  %v2074_v42 = vsel %vm2064_vm3, %v2071_v15, %v2073_v57  ;;  %v2249_v43 = vsel %vm2241_vm4, %v2247_v41, %v2248_v12 }
 0x1f0   : > { %1943 = vst.msk [vmem:[#allocation2 + $0xb1] sm:$0xff] %vm1929_vm8, %v1860_v37  ;;  %v1862_v60 = vpop.permute.xlu0 %1861  ;;  %v8104_v26 = vld [vmem:[#allocation2 + $0x38] sm:$0xff]  ;;  %v1970_v63 = vld [vmem:[#allocation2 + $0x40] sm:$0x3]  ;;  %v8147_v8 = vld [vmem:[#allocation2 + $0xa8] sm:$0xff]  ;;  %v2072_v36 = vsel %vm2064_vm3, %v2070_v34, %v2071_v15 }
 0x1f1   : > { %1944 = vst.msk [vmem:[#allocation2 + $0xc1] sm:$0xff] %vm1929_vm8, %v1862_v60  ;;  %v5892_v38 = vpack.i.bf16 %v8104_v26, %v8102_v25  ;;  %v2076_v10 = vrot.slane %v8104_v26, 1  ;;  %v2078_v17 = vrot.slane %v1970_v63, 1  ;;  %v2253_v22 = vrot.slane %v8104_v26, 2 }
 0x1f2   : > { %v2255_v37 = vrot.slane %v1970_v63, 2  ;;  %v5977_v30 = vpack.i.bf16 %v2074_v42, %v2072_v36  ;;  %v2277_v41 = vrot.slane %v8147_v8, 2 }
 0x1f3   : > { %5893 = vrot.lane.b32.xlu0 %v5892_v38, %s7216_s23  ;;  %5888 = vrot.lane.b32.xlu1 %v5892_v38, %s7223_s16  ;;  %v2077_v35 = vsel %vm2064_vm3, %v2075_v20, %v2076_v10  ;;  %v2079_v18 = vsel %vm2064_vm3, %v2076_v10, %v2078_v17  ;;  %v2254_v47 = vsel %vm2241_vm4, %v2252_v16, %v2253_v22 }
 0x1f4   : > { %v1842_v39 = vpop.permute.xlu0 %1841  ;;  %v5982_v54 = vpack.i.bf16 %v2079_v18, %v2077_v35  ;;  %v2256_v25 = vsel %vm2241_vm4, %v2253_v22, %v2255_v37  ;;  %v2100_v22 = vrot.slane %v8147_v8, 1 }
 0x1f5   : > { %1934 = vst.msk [vmem:[#allocation2 + $0x49] sm:$0xff] %vm1929_vm8, %v1842_v39 }
 0x1f7   : > { %v1864_v53 = vpop.permute.xlu1 %1863  ;;  %5903 = vrot.lane.b32.xlu0 %v5902_v5, %s7214_s21  ;;  %5898 = vrot.lane.b32.xlu1 %v5897_v44, %s7214_s21  ;;  %v8138_v0 = vld [vmem:[#allocation2 + $0xb0] sm:$0xff] }
 0x1f8   : > { %1945 = vst.msk [vmem:[#allocation2 + $0xc9] sm:$0xff] %vm1929_vm8, %v1864_v53  ;;  %v1846_v28 = vpop.permute.xlu0 %1845  ;;  %v8140_v3 = vld [vmem:[#allocation2 + $0xc0] sm:$0xff]  ;;  %v5957_v6 = vpack.i.bf16 %v8138_v0, %v8147_v8 }
 0x1f9   : > { %1936 = vst.msk [vmem:[#allocation2 + $0x61] sm:$0xff] %vm1929_vm8, %v1846_v28 }
 0x1fb   : > { %v1844_v1 = vpop.permute.xlu1 %1843  ;;  %5913 = vrot.lane.b32.xlu0 %v5912_v55, %s7215_s22  ;;  %5908 = vrot.lane.b32.xlu1 %v5907_v56, %s7215_s22 }
 0x1fc   : > { %1935 = vst.msk [vmem:[#allocation2 + $0x51] sm:$0xff] %vm1929_vm8, %v1844_v1  ;;  %v1882_v4 = vpop.permute.xlu0 %1881  ;;  %v5992_v1 = vpack.i.bf16 %v2256_v25, %v2254_v47  ;;  %v8226_v42 = vld [vmem:[#allocation2 + $0x48] sm:$0xff] }
 0x1fd   : > { %1954 = vst.msk [vmem:[#allocation2 + $0x139] sm:$0xff] %vm1929_vm8, %v1882_v4 }
 0x1ff   : > { %5918 = vrot.lane.b32.xlu0 %v5897_v44, %s7224_s17  ;;  %5923 = vrot.lane.b32.xlu1 %v5902_v5, %s7224_s17  ;;  %v8142_v29 = vld [vmem:[#allocation2 + $0xc8] sm:$0xff] }
 0x200   : > { %v5962_v40 = vpack.i.bf16 %v8142_v29, %v8140_v3 }
 0x203   : > { %v1848_v59 = vpop.permute.xlu1 %1847  ;;  %5928 = vrot.lane.b32.xlu0 %v5907_v56, %s7225_s18  ;;  %5933 = vrot.lane.b32.xlu1 %v5912_v55, %s7225_s18 }
 0x204   : > { %1937 = vst.msk [vmem:[#allocation2 + $0x69] sm:$0xff] %vm1929_vm8, %v1848_v59  ;;  %v1886_v19 = vpop.permute.xlu0 %1885  ;;  %v8156_v11 = vld [vmem:[#allocation2 + $0x138] sm:$0xff] }
 0x205   : > { %1956 = vst.msk [vmem:[#allocation2 + $0x151] sm:$0xff] %vm1929_vm8, %v1886_v19  ;;  %v2130_v2 = vrot.slane %v8156_v11, 1  ;;  %v2307_v7 = vrot.slane %v8156_v11, 2 }
 0x207   : > { %v1884_v58 = vpop.permute.xlu1 %1883  ;;  %5943 = vrot.lane.b32.xlu0 %v5902_v5, %s7226_s19  ;;  %5938 = vrot.lane.b32.xlu1 %v5897_v44, %s7226_s19  ;;  %v2251_v5 = vsel %vm2241_vm4, %v2248_v12, %v2250_v50  ;;  %v1985_v12 = vld [vmem:[#allocation2 + $0xb8] sm:$0x3]  ;;  %v8228_v50 = vld [vmem:[#allocation2 + $0x50] sm:$0xff] }
 0x208   : > { %1955 = vst.msk [vmem:[#allocation2 + $0x141] sm:$0xff] %vm1929_vm8, %v1884_v58  ;;  %v1866_v61 = vpop.permute.xlu0 %1865  ;;  %v5987_v4 = vpack.i.bf16 %v2251_v5, %v2249_v43  ;;  %v6037_v37 = vpack.i.bf16 %v8228_v50, %v8226_v42 }
 0x209   : > { %1946 = vst.msk [vmem:[#allocation2 + $0xd9] sm:$0xff] %vm1929_vm8, %v1866_v61 }
 0x20b   : > { %5953 = vrot.lane.b32.xlu0 %v5912_v55, %s7227_s20  ;;  %5948 = vrot.lane.b32.xlu1 %v5907_v56, %s7227_s20  ;;  %v8218_v20 = vld [vmem:[#allocation2 + $0x68] sm:$0xff] }
 0x20c   : > { %v8186_v44 = vld [vmem:[#allocation2 + $0x150] sm:$0xff] }
 0x20d   : > { %v2135_v28 = vrot.slane %v8186_v44, 1  ;;  %v2312_v59 = vrot.slane %v8186_v44, 2 }
 0x20f   : > { %v1888_v13 = vpop.permute.xlu1 %1887  ;;  %5958 = vrot.lane.b32.xlu0 %v5957_v6, %s7223_s16  ;;  %5963 = vrot.lane.b32.xlu1 %v5962_v40, %s7223_s16  ;;  %v8163_v23 = vld [vmem:[#allocation2 + $0x140] sm:$0xff]  ;;  %v2003_v14 = vld [vmem:[#allocation2 + $0x148] sm:$0x3] }
 0x210   : > { %1957 = vst.msk [vmem:[#allocation2 + $0x159] sm:$0xff] %vm1929_vm8, %v1888_v13  ;;  %v1870_v24 = vpop.permute.xlu0 %1869  ;;  %v2131_v60 = vrot.slane %v8163_v23, 1  ;;  %v2133_v48 = vrot.slane %v2003_v14, 1  ;;  %v2308_v9 = vrot.slane %v8163_v23, 2  ;;  %v2310_v38 = vrot.slane %v2003_v14, 2  ;;  %v8222_v13 = vld [vmem:[#allocation2 + $0x60] sm:$0xff] }
 0x211   : > { %1948 = vst.msk [vmem:[#allocation2 + $0xf1] sm:$0xff] %vm1929_vm8, %v1870_v24  ;;  %v6032_v36 = vpack.i.bf16 %v8218_v20, %v8222_v13  ;;  %v2101_v14 = vrot.slane %v8138_v0, 1  ;;  %v2103_v24 = vrot.slane %v1985_v12, 1 }
 0x212   : > { %v2132_v26 = vsel %vm2064_vm3, %v2130_v2, %v2131_v60  ;;  %v2134_v32 = vsel %vm2064_vm3, %v2131_v60, %v2133_v48  ;;  %v2309_v33 = vsel %vm2241_vm4, %v2307_v7, %v2308_v9  ;;  %v2311_v39 = vsel %vm2241_vm4, %v2308_v9, %v2310_v38  ;;  %v1988_v38 = vld [vmem:[#allocation2 + $0xd0] sm:$0x3] }
 0x213   : > { %v1868_v21 = vpop.permute.xlu1 %1867  ;;  %5973 = vrot.lane.b32.xlu0 %v5962_v40, %s7216_s23  ;;  %5968 = vrot.lane.b32.xlu1 %v5957_v6, %s7216_s23  ;;  %v8190_v49 = vpack.i.bf16 %v2134_v32, %v2132_v26  ;;  %v8192_v51 = vpack.i.bf16 %v2311_v39, %v2309_v33  ;;  %v2102_v2 = vsel %vm2064_vm3, %v2100_v22, %v2101_v14  ;;  %v2278_v48 = vrot.slane %v8138_v0, 2  ;;  %v7134_v22 = vld [vmem:[%s10490_s4 + $0x8] sm:$0xff]  }
 0x214   : > { %1947 = vst.msk [vmem:[#allocation2 + $0xe1] sm:$0xff] %vm1929_vm8, %v1868_v21  ;;  %v1890_v46 = vpop.permute.xlu0 %1889  ;;  %v2104_v60 = vsel %vm2064_vm3, %v2101_v14, %v2103_v24  ;;  %v2280_v7 = vrot.slane %v1985_v12, 2  ;;  %v2105_v26 = vrot.slane %v8140_v3, 1  ;;  %v2106_v0 = vrot.slane %v8142_v29, 1  ;;  %v7133_v24 = vld [vmem:[%s10490_s4 + $0x10] sm:$0xff]  }
 0x215   : > { %1958 = vst.msk [vmem:[#allocation2 + $0x169] sm:$0xff] %vm1929_vm8, %v1890_v46  ;;  %v6047_v21 = vpack.i.bf16 %v2104_v60, %v2102_v2  ;;  %v2279_v46 = vsel %vm2241_vm4, %v2277_v41, %v2278_v48  ;;  %v2108_v32 = vrot.slane %v1988_v38, 1  ;;  %v2282_v39 = vrot.slane %v8140_v3, 2 }
 0x216   : > { %v2281_v16 = vsel %vm2241_vm4, %v2278_v48, %v2280_v7  ;;  %v2285_v43 = vrot.slane %v1988_v38, 2  ;;  %v7141_v48 = vld [vmem:[#allocation2 + $0x1a0] sm:$0xff] }
 0x217   : > { %5983 = vrot.lane.b32.xlu0 %v5982_v54, %s7214_s21  ;;  %5978 = vrot.lane.b32.xlu1 %v5977_v30, %s7214_s21  ;;  %v8196_v52 = vld [vmem:[#allocation2 + $0x158] sm:$0xff]  ;;  %v2006_v53 = vld [vmem:[#allocation2 + $0x160] sm:$0x3]  ;;  %v6057_v33 = vpack.i.bf16 %v2281_v16, %v2279_v46  ;;  %v2109_v8 = vsel %vm2064_vm3, %v2106_v0, %v2108_v32  ;;  %v2819_v7 = vrot.slane %v7141_v48, 1  ;;  %v2015_v16 = vld [vmem:[#allocation2 + $0x1a8] sm:$0x3] }
 0x218   : > { %v2136_v55 = vrot.slane %v8196_v52, 1  ;;  %v2138_v56 = vrot.slane %v2006_v53, 1  ;;  %v2313_v19 = vrot.slane %v8196_v52, 2  ;;  %v2315_v58 = vrot.slane %v2006_v53, 2 }
 0x21a   : > { %v2137_v63 = vsel %vm2064_vm3, %v2135_v28, %v2136_v55  ;;  %v2139_v15 = vsel %vm2064_vm3, %v2136_v55, %v2138_v56  ;;  %v2314_v57 = vsel %vm2241_vm4, %v2312_v59, %v2313_v19  ;;  %v2316_v10 = vsel %vm2241_vm4, %v2313_v19, %v2315_v58 }
 0x21b   : > { %v1872_v61 = vpop.permute.xlu1 %1871  ;;  %5993 = vrot.lane.b32.xlu0 %v5992_v1, %s7215_s22  ;;  %5988 = vrot.lane.b32.xlu1 %v5987_v4, %s7215_s22  ;;  %v8212_v34 = vpack.i.bf16 %v2139_v15, %v2137_v63  ;;  %v8216_v40 = vpack.i.bf16 %v2316_v10, %v2314_v57  ;;  %v6112_v28 = vpack.i.bf16 %v8196_v52, %v8186_v44  ;;  %v2080_v55 = vrot.slane %v8226_v42, 1  ;;  %v1976_v63 = vld [vmem:[#allocation2 + $0x70] sm:$0x3] }
 0x21c   : > { %1949 = vst.msk [vmem:[#allocation2 + $0xf9] sm:$0xff] %vm1929_vm8, %v1872_v61  ;;  %v1894_v62 = vpop.permute.xlu0 %1893  ;;  %v2081_v56 = vrot.slane %v8228_v50, 1  ;;  %v6117_v59 = vpack.i.bf16 %v8163_v23, %v8156_v11  ;;  %v2257_v19 = vrot.slane %v8226_v42, 2  ;;  %v2258_v44 = vrot.slane %v8228_v50, 2  ;;  %v7132_v11 = vld [vmem:[%s10490_s4 + $0x18] sm:$0xff]  }
 0x21d   : > { %1960 = vst.msk [vmem:[#allocation2 + $0x181] sm:$0xff] %vm1929_vm8, %v1894_v62  ;;  %v2086_v10 = vrot.slane %v8218_v20, 1  ;;  %v2263_v50 = vrot.slane %v8218_v20, 2  ;;  %v2265_v14 = vrot.slane %v1976_v63, 2 }
 0x21e   : > { %v2082_v52 = vsel %vm2064_vm3, %v2080_v55, %v2081_v56  ;;  %v2259_v15 = vsel %vm2241_vm4, %v2257_v19, %v2258_v44  ;;  %v1989_v55 = vld [vmem:[#allocation2 + $0xd8] sm:$0xff] }
 0x21f   : > { %v1892_v17 = vpop.permute.xlu1 %1891  ;;  %5998 = vrot.lane.b32.xlu0 %v5977_v30, %s7224_s17  ;;  %6003 = vrot.lane.b32.xlu1 %v5982_v54, %s7224_s17  ;;  %v2283_v30 = vrot.slane %v8142_v29, 2  ;;  %v1973_v29 = vld [vmem:[#allocation2 + $0x58] sm:$0x3]  ;;  %v2266_v20 = vsel %vm2241_vm4, %v2263_v50, %v2265_v14  ;;  %v2110_v14 = vrot.slane %v1989_v55, 1 }
 0x220   : > { %1959 = vst.msk [vmem:[#allocation2 + $0x171] sm:$0xff] %vm1929_vm8, %v1892_v17  ;;  %v1874_v6 = vpop.permute.xlu0 %1873  ;;  %v2260_v61 = vrot.slane %v1973_v29, 2  ;;  %v2088_v17 = vrot.slane %v1976_v63, 1 }
 0x221   : > { %1950 = vst.msk [vmem:[#allocation2 + $0x109] sm:$0xff] %vm1929_vm8, %v1874_v6  ;;  %v2284_v25 = vsel %vm2241_vm4, %v2282_v39, %v2283_v30  ;;  %v2286_v53 = vsel %vm2241_vm4, %v2283_v30, %v2285_v43  ;;  %v2085_v6 = vrot.slane %v8222_v13, 1  ;;  %v2821_v39 = vrot.slane %v2015_v16, 1 }
 0x222   : > { %v6062_v3 = vpack.i.bf16 %v2286_v53, %v2284_v25  ;;  %v2261_v57 = vsel %vm2241_vm4, %v2258_v44, %v2260_v61  ;;  %v2089_v42 = vsel %vm2064_vm3, %v2086_v10, %v2088_v17 }
 0x223   : > { %6008 = vrot.lane.b32.xlu0 %v5987_v4, %s7225_s18  ;;  %6013 = vrot.lane.b32.xlu1 %v5992_v1, %s7225_s18  ;;  %v7131_v4 = vld [vmem:[%s10490_s4 + $0x20] ss:$0 sps:$4 sm:$0xff]   ;;  %v6137_v12 = vpack.i.bf16 %v2261_v57, %v2259_v15  ;;  %v8339_v30 = vsel %vm2064_vm3, %v2819_v7, %v2821_v39  ;;  %v1991_v15 = vld [vmem:[#allocation2 + $0xe8] sm:$0x3] }
 0x224   : > { %5822 = vmatprep.subr.msk.bf16.mxu1 %vm430_vm0, %v7131_v4  ;;  %v3385_v62 = vsel %vm430_vm0, %v7131_v4, 0  ;;  %v8397_v57 = vld [vmem:[#allocation2 + $0x180] sm:$0xff] }
 0x225   : > { %5738 = vmatpush3.bf16.msra.mxu1 %v3385_v62 }
 0x226   : > { %5739 = vmatprep.subr.bf16.mxu1 %v7132_v11 }
 0x227   : > { %v1896_v35 = vpop.permute.xlu1 %1895  ;;  %6018 = vrot.lane.b32.xlu0 %v5982_v54, %s7226_s19  ;;  %6033 = vrot.lane.b32.xlu1 %v6032_v36, %s7223_s16  ;;  %v2107_v54 = vsel %vm2064_vm3, %v2105_v26, %v2106_v0  ;;  %v2920_v26 = vrot.slane %v7141_v48, 2  ;;  %v2287_v48 = vrot.slane %v1989_v55, 2 }
 0x228   : > { %1961 = vst.msk [vmem:[#allocation2 + $0x189] sm:$0xff] %vm1929_vm8, %v1896_v35  ;;  %v1878_v18 = vpop.permute.xlu0 %1877  ;;  %v6052_v47 = vpack.i.bf16 %v2109_v8, %v2107_v54  ;;  %v2262_v35 = vrot.slane %v8222_v13, 2  ;;  %v7135_v13 = vld [vmem:[%s10490_s4] sm:$0xff]   ;;  %v8332_v54 = vld [vmem:[#allocation2 + $0xf0] sm:$0xff]  ;;  %v8334_v8 = vld [vmem:[#allocation2 + $0xf8] sm:$0xff] }
 0x229   : > { %1952 = vst.msk [vmem:[#allocation2 + $0x121] sm:$0xff] %vm1929_vm8, %v1878_v18  ;;  %5740 = vmatpush3.bf16.msra.mxu1 %v7132_v11  ;;  %v6192_v53 = vpack.i.bf16 %v8334_v8, %v8332_v54  ;;  %v2116_v39 = vrot.slane %v8334_v8, 1  ;;  %v8507_v31 = vld [vmem:[#allocation2 + $0x108] sm:$0xff] }
 0x22a   : > { %5741 = vmatprep.subr.bf16.mxu1 %v7133_v24 }
 0x22b   : > { %v1876_v9 = vpop.permute.xlu1 %1875  ;;  %6023 = vrot.lane.b32.xlu0 %v5992_v1, %s7227_s20  ;;  %6038 = vrot.lane.b32.xlu1 %v6037_v37, %s7216_s23  ;;  %v2083_v1 = vrot.slane %v1973_v29, 1  ;;  %v1990_v29 = vld [vmem:[#allocation2 + $0xe0] sm:$0xff] }
 0x22c   : > { %1951 = vst.msk [vmem:[#allocation2 + $0x111] sm:$0xff] %vm1929_vm8, %v1876_v9  ;;  %v7142_v9 = vld [vmem:[#allocation2 + $0x198] sm:$0xff] }
 0x22d   : > { %v2084_v58 = vsel %vm2064_vm3, %v2081_v56, %v2083_v1  ;;  %5742 = vmatpush3.bf16.msra.mxu1 %v7133_v24  ;;  %v2818_v38 = vrot.slane %v7142_v9, 1  ;;  %v2919_v46 = vrot.slane %v7142_v9, 2 }
 0x22e   : > { %v6127_v23 = vpack.i.bf16 %v2084_v58, %v2082_v52  ;;  %5743 = vmatprep.subr.bf16.mxu1 %v7134_v22 }
 0x22f   : > { %6028 = vrot.lane.b32.xlu0 %v6037_v37, %s7223_s16  ;;  %6048 = vrot.lane.b32.xlu1 %v6047_v21, %s7214_s21  ;;  %v2264_v37 = vsel %vm2241_vm4, %v2262_v35, %v2263_v50  ;;  %v8326_v0 = vsel %vm2064_vm3, %v2818_v38, %v2819_v7  ;;  %v8410_v50 = vld [vmem:[#allocation2 + $0x168] sm:$0xff] }
 0x230   : > { %v6142_v60 = vpack.i.bf16 %v2266_v20, %v2264_v37  ;;  %v2288_v20 = vrot.slane %v1990_v29, 2 }
 0x231   : > { %5744 = vmatpush3.bf16.msra.mxu1 %v7134_v22 }
 0x232   : > { %5745 = vmatprep.subr.bf16.mxu1 %v7135_v13 }
 0x233   : > { %v1880_v5 = vpop.permute.xlu1 %1879  ;;  %6043 = vrot.lane.b32.xlu0 %v6032_v36, %s7216_s23  ;;  %6058 = vrot.lane.b32.xlu1 %v6057_v33, %s7215_s22  ;;  %v2087_v36 = vsel %vm2064_vm3, %v2085_v6, %v2086_v10 }
 0x234   : > { %1953 = vst.msk [vmem:[#allocation2 + $0x129] sm:$0xff] %vm1929_vm8, %v1880_v5  ;;  %v6132_v18 = vpack.i.bf16 %v2089_v42, %v2087_v36  ;;  %v8344_v5 = vsel %vm2241_vm4, %v2919_v46, %v2920_v26  ;;  %v2111_v36 = vrot.slane %v1990_v29, 1  ;;  %v2113_v42 = vrot.slane %v1991_v15, 1 }
 0x235   : > { %5746 = vmatpush3.bf16.msra.mxu1 %v7135_v13  ;;  %10516 = vst [vmem:[#allocation5_spill] sm:$0xff] %v8344_v5  ;;  %v2290_v13 = vrot.slane %v1991_v15, 2  ;;  %v2289_v46 = vsel %vm2241_vm4, %v2287_v48, %v2288_v20 }
 0x236   : > { %v2112_v22 = vsel %vm2064_vm3, %v2110_v14, %v2111_v36  ;;  %v2114_v37 = vsel %vm2064_vm3, %v2111_v36, %v2113_v42  ;;  %v2293_v42 = vrot.slane %v8334_v8, 2  ;;  %v5856_v8 = vunpack.i.h.bf16 %v7907_v45 }
 0x237   : > { %6053 = vrot.lane.b32.xlu0 %v6052_v47, %s7214_s21  ;;  %6073 = vrot.lane.b32.xlu1 %v6052_v47, %s7224_s17  ;;  %v6267_v38 = vpack.i.bf16 %v2114_v37, %v2112_v22 }
 0x23b   : > { %6063 = vrot.lane.b32.xlu0 %v6062_v3, %s7215_s22  ;;  %6083 = vrot.lane.b32.xlu1 %v6062_v3, %s7225_s18  ;;  %v8483_v43 = vld [vmem:[#allocation2 + $0x128] sm:$0xff] }
 0x23f   : > { %6068 = vrot.lane.b32.xlu0 %v6047_v21, %s7224_s17  ;;  %6088 = vrot.lane.b32.xlu1 %v6047_v21, %s7226_s19 }
 0x243   : > { %6078 = vrot.lane.b32.xlu0 %v6057_v33, %s7225_s18  ;;  %6098 = vrot.lane.b32.xlu1 %v6057_v33, %s7227_s20 }
 0x247   : > { %6093 = vrot.lane.b32.xlu0 %v6052_v47, %s7226_s19  ;;  %6113 = vrot.lane.b32.xlu1 %v6112_v28, %s7223_s16 }
 0x24b   : > { %6103 = vrot.lane.b32.xlu0 %v6062_v3, %s7227_s20  ;;  %6118 = vrot.lane.b32.xlu1 %v6117_v59, %s7216_s23  ;;  %v2922_v3 = vrot.slane %v2015_v16, 2  ;;  %v2291_v16 = vsel %vm2241_vm4, %v2288_v20, %v2290_v13 }
 0x24f   : > { %6108 = vrot.lane.b32.xlu0 %v6117_v59, %s7223_s16  ;;  %6128 = vrot.lane.b32.xlu1 %v6127_v23, %s7214_s21  ;;  %v6197_v59 = vpack.i.bf16 %v1990_v29, %v1989_v55  ;;  %v6277_v55 = vpack.i.bf16 %v2291_v16, %v2289_v46  ;;  %v7144_v16 = vld [vmem:[#allocation2] sm:$0xff] }
 0x253   : > { %6123 = vrot.lane.b32.xlu0 %v6112_v28, %s7216_s23  ;;  %6138 = vrot.lane.b32.xlu1 %v6137_v12, %s7215_s22  ;;  %v8355_v28 = vsel %vm2241_vm4, %v2920_v26, %v2922_v3  ;;  %v2115_v26 = vrot.slane %v8332_v54, 1 }
 0x254   : > { %v8315_v2 = vpop.permute.xlu0 %5863  ;;  %10517 = vst [vmem:[#allocation6_spill] sm:$0xff] %v8355_v28 }
 0x255   : > { %v2117_v15 = vsel %vm2064_vm3, %v2115_v26, %v2116_v39  ;;  %v7143_v26 = vld [vmem:[#allocation2 + $0x8] sm:$0xff] }
 0x256   : > { %v3021_v46 = vsel %vm417_vm1, %v7143_v26, %v5856_v8 }
 0x257   : > { %6133 = vrot.lane.b32.xlu0 %v6132_v18, %s7214_s21  ;;  %6153 = vrot.lane.b32.xlu1 %v6132_v18, %s7224_s17 }
 0x25b   : > { %6143 = vrot.lane.b32.xlu0 %v6142_v60, %s7215_s22  ;;  %6163 = vrot.lane.b32.xlu1 %v6142_v60, %s7225_s18 }
 0x25c   : > { %v8319_v41 = vpop.permute.xlu1 %5868  ;;  %v8321_v21 = vpop.permute.xlu0 %5878 }
 0x25f   : > { %6148 = vrot.lane.b32.xlu0 %v6127_v23, %s7224_s17  ;;  %6168 = vrot.lane.b32.xlu1 %v6127_v23, %s7226_s19  ;;  %v8391_v23 = vld [vmem:[#allocation2 + $0x188] sm:$0xff] }
 0x260   : > { %v8328_v32 = vpop.permute.xlu1 %5873  ;;  %v6252_v6 = vpack.i.bf16 %v8391_v23, %v8397_v57 }
 0x261   : > { %v8330_v33 = vpop.permute.xlu0 %5883 }
 0x263   : > { %6158 = vrot.lane.b32.xlu0 %v6137_v12, %s7225_s18  ;;  %6178 = vrot.lane.b32.xlu1 %v6137_v12, %s7227_s20  ;;  %v8405_v12 = vld [vmem:[#allocation2 + $0x170] sm:$0xff] }
 0x265   : > { %v8346_v47 = vpop.permute.xlu1 %5888  ;;  %v8348_v25 = vpop.permute.xlu0 %5893 }
 0x267   : > { %6173 = vrot.lane.b32.xlu0 %v6132_v18, %s7226_s19  ;;  %6193 = vrot.lane.b32.xlu1 %v6192_v53, %s7223_s16  ;;  %v6257_v18 = vpack.i.bf16 %v8405_v12, %v8410_v50 }
 0x269   : > { %v8359_v1 = vpop.permute.xlu1 %5898  ;;  %v8361_v4 = vpop.permute.xlu0 %5903 }
 0x26b   : > { %6183 = vrot.lane.b32.xlu0 %v6142_v60, %s7227_s20  ;;  %6198 = vrot.lane.b32.xlu1 %v6197_v59, %s7216_s23  ;;  %v1994_v60 = vld [vmem:[#allocation2 + $0x100] sm:$0x3] }
 0x26c   : > { %v2295_v14 = vrot.slane %v1994_v60, 2 }
 0x26d   : > { %v8365_v19 = vpop.permute.xlu1 %5908  ;;  %v8367_v44 = vpop.permute.xlu0 %5913 }
 0x26f   : > { %6188 = vrot.lane.b32.xlu0 %v6197_v59, %s7223_s16  ;;  %6208 = vrot.lane.b32.xlu1 %v8190_v49, %s7214_s21  ;;  %v2292_v59 = vrot.slane %v8332_v54, 2  ;;  %v2296_v54 = vsel %vm2241_vm4, %v2293_v42, %v2295_v14 }
 0x271   : > { %v8372_v52 = vpop.permute.xlu1 %5923  ;;  %v8374_v58 = vpop.permute.xlu0 %5918  ;;  %v2294_v20 = vsel %vm2241_vm4, %v2292_v59, %v2293_v42  ;;  %v5886_v59 = vunpack.i.h.bf16 %v8330_v33 }
 0x272   : > { %v8459_v48 = vpack.i.bf16 %v2296_v54, %v2294_v20 }
 0x273   : > { %6203 = vrot.lane.b32.xlu0 %v6192_v53, %s7216_s23  ;;  %6218 = vrot.lane.b32.xlu1 %v8192_v51, %s7215_s22  ;;  %v2118_v53 = vrot.slane %v1994_v60, 1 }
 0x275   : > { %v8379_v61 = vpop.permute.xlu1 %5933  ;;  %v8381_v62 = vpop.permute.xlu0 %5928  ;;  %v2119_v36 = vsel %vm2064_vm3, %v2116_v39, %v2118_v53  ;;  %v5860_v53 = vunpack.i.l.bf16 %v7911_v27 }
 0x276   : > { %v8447_v37 = vpack.i.bf16 %v2119_v36, %v2117_v15  ;;  %v5885_v15 = vunpack.i.l.bf16 %v8330_v33 }
 0x277   : > { %6213 = vrot.lane.b32.xlu0 %v8212_v34, %s7214_s21  ;;  %6233 = vrot.lane.b32.xlu1 %v8212_v34, %s7224_s17 }
 0x279   : > { %v8387_v63 = vpop.permute.xlu1 %5938  ;;  %v8389_v11 = vpop.permute.xlu0 %5943 }
 0x27b   : > { %6223 = vrot.lane.b32.xlu0 %v8216_v40, %s7215_s22  ;;  %6243 = vrot.lane.b32.xlu1 %v8216_v40, %s7225_s18 }
 0x27d   : > { %v8399_v10 = vpop.permute.xlu1 %5948  ;;  %v8401_v17 = vpop.permute.xlu0 %5953 }
 0x27f   : > { %6228 = vrot.lane.b32.xlu0 %v8190_v49, %s7224_s17  ;;  %6253 = vrot.lane.b32.xlu1 %v6252_v6, %s7223_s16 }
 0x281   : > { %v8412_v24 = vpop.permute.xlu1 %5963  ;;  %v8414_v35 = vpop.permute.xlu0 %5958 }
 0x282   : > { %10518 = vst [vmem:[#allocation7_spill] sm:$0xff] %v8412_v24 }
 0x283   : > { %6238 = vrot.lane.b32.xlu0 %v8192_v51, %s7225_s18  ;;  %6258 = vrot.lane.b32.xlu1 %v6257_v18, %s7216_s23 }
 0x285   : > { %v8423_v7 = vpop.permute.xlu1 %5968  ;;  %v8425_v9 = vpop.permute.xlu0 %5973 }
 0x286   : > { %10519 = vst [vmem:[#allocation8_spill] sm:$0xff] %v8425_v9  ;;  %v2140_v9 = vrot.slane %v8410_v50, 1 }
 0x287   : > { %6248 = vrot.lane.b32.xlu0 %v6257_v18, %s7223_s16  ;;  %6268 = vrot.lane.b32.xlu1 %v6267_v38, %s7214_s21 }
 0x289   : > { %v8433_v3 = vpop.permute.xlu1 %5978  ;;  %v8435_v29 = vpop.permute.xlu0 %5983 }
 0x28b   : > { %6263 = vrot.lane.b32.xlu0 %v6252_v6, %s7216_s23  ;;  %6278 = vrot.lane.b32.xlu1 %v6277_v55, %s7215_s22  ;;  %v5855_v6 = vunpack.i.l.bf16 %v7907_v45  ;;  %v5861_v45 = vunpack.i.h.bf16 %v7911_v27 }
 0x28d   : > { %v8443_v18 = vpop.permute.xlu1 %5988  ;;  %v8445_v22 = vpop.permute.xlu0 %5993  ;;  %v3020_v39 = vsel %vm417_vm1, %v7144_v16, %v5855_v6  ;;  %v3054_v27 = vsel %vm3052_vm9, %v3021_v46, %v5861_v45 }
 0x28e   : > { %v3053_v8 = vsel %vm3052_vm9, %v3020_v39, %v5860_v53  ;;  %v3087_v6 = vsel %vm3085_vm10, %v3054_v27, %v5886_v59  ;;  %v5896_v59 = vunpack.i.h.bf16 %v8348_v25 }
 0x28f   : > { %6273 = vrot.lane.b32.xlu0 %v8447_v37, %s7214_s21  ;;  %6293 = vrot.lane.b32.xlu1 %v8447_v37, %s7224_s17  ;;  %v3086_v33 = vsel %vm3085_vm10, %v3053_v8, %v5885_v15  ;;  %v5895_v15 = vunpack.i.l.bf16 %v8348_v25 }
 0x291   : > { %v8457_v13 = vpop.permute.xlu1 %6003  ;;  %v5999_v60 = vpop.permute.xlu0 %5998 }
 0x292   : > { %v6001_v14 = vunpack.i.h.bf16 %v5999_v60  ;;  %v6000_v20 = vunpack.i.l.bf16 %v5999_v60 }
 0x293   : > { %6283 = vrot.lane.b32.xlu0 %v8459_v48, %s7215_s22  ;;  %6303 = vrot.lane.b32.xlu1 %v8459_v48, %s7225_s18 }
 0x294   : > { %v3119_v60 = vsel %vm3118_vm11, %v3086_v33, %v6000_v20  ;;  %v8491_v20 = vld [vmem:[#allocation2 + $0x120] sm:$0xff] }
 0x295   : > { %v8471_v36 = vpop.permute.xlu1 %6013  ;;  %v6009_v42 = vpop.permute.xlu0 %6008 }
 0x296   : > { %v6011_v54 = vunpack.i.h.bf16 %v6009_v42  ;;  %v6010_v56 = vunpack.i.l.bf16 %v6009_v42  ;;  %v3120_v42 = vsel %vm3118_vm11, %v3087_v6, %v6001_v14 }
 0x297   : > { %6288 = vrot.lane.b32.xlu0 %v6267_v38, %s7224_s17  ;;  %6308 = vrot.lane.b32.xlu1 %v6267_v38, %s7226_s19  ;;  %v2009_v38 = vld [vmem:[#allocation2 + $0x178] sm:$0x3] }
 0x298   : > { %v3152_v39 = vsel %vm3151_vm12, %v3119_v60, %v6010_v56  ;;  %v3153_v46 = vsel %vm3151_vm12, %v3120_v42, %v6011_v54  ;;  %v6332_v56 = vpack.i.bf16 %v8483_v43, %v8491_v20  ;;  %v2141_v54 = vrot.slane %v8405_v12, 1 }
 0x299   : > { %v8479_v26 = vpop.permute.xlu1 %6033  ;;  %v6019_v16 = vpop.permute.xlu0 %6018  ;;  %v2143_v27 = vrot.slane %v2009_v38, 1  ;;  %v3186_v25 = vsel %vm3184_vm13, %v3153_v46, %v5896_v59 }
 0x29a   : > { %v6021_v45 = vunpack.i.h.bf16 %v6019_v16  ;;  %v6020_v53 = vunpack.i.l.bf16 %v6019_v16  ;;  %v3185_v16 = vsel %vm3184_vm13, %v3152_v39, %v5895_v15  ;;  %v2318_v15 = vrot.slane %v8405_v12, 2 }
 0x29b   : > { %6298 = vrot.lane.b32.xlu0 %v6277_v55, %s7225_s18  ;;  %6313 = vrot.lane.b32.xlu1 %v6277_v55, %s7227_s20  ;;  %v8498_v55 = vld [vmem:[#allocation2 + $0x110] sm:$0xff] }
 0x29c   : > { %v3218_v60 = vsel %vm3217_vm14, %v3185_v16, %v6020_v53  ;;  %v3219_v42 = vsel %vm3217_vm14, %v3186_v25, %v6021_v45  ;;  %v2142_v53 = vsel %vm2064_vm3, %v2140_v9, %v2141_v54  ;;  %v2144_v45 = vsel %vm2064_vm3, %v2141_v54, %v2143_v27  ;;  %v2012_v16 = vld [vmem:[#allocation2 + $0x190] sm:$0x3] }
 0x29d   : > { %v8493_v14 = vpop.permute.xlu1 %6038  ;;  %v6024_v8 = vpop.permute.xlu0 %6023  ;;  %v8530_v9 = vpack.i.bf16 %v2144_v45, %v2142_v53  ;;  %v2518_v54 = vrot.slane %v8391_v23, 1  ;;  %v2520_v12 = vrot.slane %v2012_v16, 1 }
 0x29e   : > { %v6026_v6 = vunpack.i.h.bf16 %v6024_v8  ;;  %v6025_v33 = vunpack.i.l.bf16 %v6024_v8 }
 0x29f   : > { %6318 = vrot.lane.b32.xlu0 %v8447_v37, %s7226_s19  ;;  %6333 = vrot.lane.b32.xlu1 %v6332_v56, %s7223_s16  ;;  %v6337_v37 = vpack.i.bf16 %v8498_v55, %v8507_v31  ;;  %v2521_v45 = vsel %vm2064_vm3, %v2518_v54, %v2520_v12  ;;  %v2298_v12 = vrot.slane %v8498_v55, 2 }
 0x2a0   : > { %v3251_v24 = vsel %vm3250_vm15, %v3218_v60, %v6025_v33  ;;  %v3252_v8 = vsel %vm3250_vm15, %v3219_v42, %v6026_v6  ;;  %v2320_v33 = vrot.slane %v2009_v38, 2  ;;  %v2317_v6 = vrot.slane %v8410_v50, 2 }
 0x2a1   : > { %v8512_v39 = vpop.permute.xlu1 %6048  ;;  %v8514_v46 = vpop.permute.xlu0 %6028  ;;  %v3283_v59 = vpack.c.bf16 %v3252_v8, %v3251_v24  ;;  %v2517_v50 = vrot.slane %v8397_v57, 1  ;;  %v2621_v60 = vrot.slane %v2012_v16, 2 }
 0x2a2   : > { %10520 = vst [vmem:[#allocation9_spill] sm:$0xff] %v8512_v39  ;;  %v2319_v38 = vsel %vm2241_vm4, %v2317_v6, %v2318_v15  ;;  %v2321_v27 = vsel %vm2241_vm4, %v2318_v15, %v2320_v33  ;;  %v2618_v15 = vrot.slane %v8397_v57, 2  ;;  %v1997_v33 = vld [vmem:[#allocation2 + $0x118] sm:$0x3] }
 0x2a3   : > { %6323 = vrot.lane.b32.xlu0 %v8459_v48, %s7227_s20  ;;  %6338 = vrot.lane.b32.xlu1 %v6337_v37, %s7216_s23  ;;  %v2619_v48 = vrot.slane %v8391_v23, 2  ;;  %v2519_v53 = vsel %vm2064_vm3, %v2517_v50, %v2518_v54  ;;  %v2000_v23 = vld [vmem:[#allocation2 + $0x130] sm:$0x3]  ;;  %v2121_v54 = vrot.slane %v8498_v55, 1  ;;  %v2123_v57 = vrot.slane %v1997_v33, 1 }
 0x2a4   : > { %5747 = vmatprep.mubr.msk.bf16.mxu1 %vm3335_vm2, %v3283_v59  ;;  %v8544_v59 = vpack.i.bf16 %v2321_v27, %v2319_v38  ;;  %v2300_v50 = vrot.slane %v1997_v33, 2  ;;  %v2125_v55 = vrot.slane %v8491_v20, 1  ;;  %v2302_v33 = vrot.slane %v8491_v20, 2 }
 0x2a5   : > { %v8526_v25 = vpop.permute.xlu1 %6058  ;;  %v8528_v24 = vpop.permute.xlu0 %6043  ;;  %v2620_v16 = vsel %vm2241_vm4, %v2618_v15, %v2619_v48  ;;  %v2622_v6 = vsel %vm2241_vm4, %v2619_v48, %v2621_v60  ;;  %v2120_v48 = vrot.slane %v8507_v31, 1  ;;  %v2297_v60 = vrot.slane %v8507_v31, 2 }
 0x2a6   : > { %10521 = vst [vmem:[#allocation10_spill] sm:$0xff] %v8526_v25  ;;  %v8570_v15 = vpack.i.bf16 %v2622_v6, %v2620_v16  ;;  %v2301_v25 = vsel %vm2241_vm4, %v2298_v12, %v2300_v50 }
 0x2a7   : > { %6348 = vrot.lane.b32.xlu1 %v8530_v9, %s7214_s21  ;;  %6328 = vrot.lane.b32.xlu0 %v6337_v37, %s7223_s16  ;;  %v8552_v37 = vpack.i.bf16 %v2521_v45, %v2519_v53  ;;  %v2303_v53 = vrot.slane %v8483_v43, 2  ;;  %v2305_v45 = vrot.slane %v2000_v23, 2 }
 0x2a9   : > { %v8540_v42 = vpop.permute.xlu1 %6073  ;;  %v8542_v8 = vpop.permute.xlu0 %6053  ;;  %v2304_v6 = vsel %vm2241_vm4, %v2302_v33, %v2303_v53  ;;  %v2306_v20 = vsel %vm2241_vm4, %v2303_v53, %v2305_v45  ;;  %v5900_v53 = vunpack.i.l.bf16 %v8359_v1  ;;  %v5911_v45 = vunpack.i.h.bf16 %v8365_v19 }
 0x2aa   : > { %10522 = vst [vmem:[#allocation11_spill] sm:$0xff] %v8540_v42  ;;  %10523 = vst [vmem:[#allocation12_spill] sm:$0xff] %v8542_v8  ;;  %v2126_v8 = vrot.slane %v8483_v43, 1  ;;  %v2299_v42 = vsel %vm2241_vm4, %v2297_v60, %v2298_v12  ;;  %v5910_v60 = vunpack.i.l.bf16 %v8365_v19  ;;  %v5906_v19 = vunpack.i.h.bf16 %v8361_v4 }
 0x2ab   : > { %6353 = vrot.lane.b32.xlu1 %v8544_v59, %s7215_s22  ;;  %6343 = vrot.lane.b32.xlu0 %v6332_v56, %s7216_s23  ;;  %v2128_v56 = vrot.slane %v2000_v23, 1  ;;  %v2122_v23 = vsel %vm2064_vm3, %v2120_v48, %v2121_v54 }
 0x2ac   : > { %v2127_v31 = vsel %vm2064_vm3, %v2125_v55, %v2126_v8  ;;  %v5870_v55 = vunpack.i.l.bf16 %v8319_v41 }
 0x2ad   : > { %v8556_v38 = vpop.permute.xlu1 %6083  ;;  %v8558_v27 = vpop.permute.xlu0 %6063  ;;  %v2129_v16 = vsel %vm2064_vm3, %v2126_v8, %v2128_v56  ;;  %v8600_v8 = vpack.i.bf16 %v2306_v20, %v2304_v6  ;;  %v5901_v56 = vunpack.i.h.bf16 %v8359_v1  ;;  %v7145_v6 = vld [vmem:[#allocation2 + $0x80] sm:$0xff]  ;;  %v5915_v1 = vunpack.i.l.bf16 %v8367_v44 }
 0x2ae   : > { %10524 = vst [vmem:[#allocation13_spill] sm:$0xff] %v8556_v38  ;;  %10525 = vst [vmem:[#allocation14_spill] sm:$0xff] %v8558_v27  ;;  %v2124_v38 = vsel %vm2064_vm3, %v2121_v54, %v2123_v57  ;;  %v8592_v54 = vpack.i.bf16 %v2301_v25, %v2299_v42  ;;  %v8598_v50 = vpack.i.bf16 %v2129_v16, %v2127_v31  ;;  %v7146_v25 = vld [vmem:[#allocation2 + $0x78] sm:$0xff] }
 0x2af   : > { %6363 = vrot.lane.b32.xlu1 %v8552_v37, %s7224_s17  ;;  %6358 = vrot.lane.b32.xlu0 %v8530_v9, %s7224_s17  ;;  %v8590_v48 = vpack.i.bf16 %v2124_v38, %v2122_v23  ;;  %v5871_v38 = vunpack.i.h.bf16 %v8319_v41  ;;  %v5905_v23 = vunpack.i.l.bf16 %v8361_v4  ;;  %v3031_v20 = vsel %vm417_vm1, %v7145_v6, %v5901_v56  ;;  %v7148_v6 = vld [vmem:[#allocation2 + $0x90] sm:$0xff] }
 0x2b0   : > { %v3030_v42 = vsel %vm417_vm1, %v7146_v25, %v5900_v53  ;;  %v5916_v41 = vunpack.i.h.bf16 %v8367_v44  ;;  %v3064_v39 = vsel %vm3052_vm9, %v3031_v20, %v5911_v45  ;;  %v5926_v4 = vunpack.i.h.bf16 %v8372_v52 }
 0x2b1   : > { %v8574_v27 = vpop.permute.xlu1 %6088  ;;  %v8576_v43 = vpop.permute.xlu0 %6068  ;;  %v3063_v33 = vsel %vm3052_vm9, %v3030_v42, %v5910_v60  ;;  %v5936_v44 = vunpack.i.h.bf16 %v8379_v61  ;;  %v5935_v60 = vunpack.i.l.bf16 %v8379_v61  ;;  %v7147_v42 = vld [vmem:[#allocation2 + $0x98] sm:$0xff]  ;;  %v3032_v20 = vsel %vm417_vm1, %v7148_v6, %v5905_v23  ;;  %v7156_v23 = vld [vmem:[#allocation2 + $0x60] sm:$0xff] }
 0x2b2   : > { %v3065_v56 = vsel %vm3052_vm9, %v3032_v20, %v5915_v1  ;;  %v3096_v61 = vsel %vm3085_vm10, %v3063_v33, %v5870_v55  ;;  %v3097_v45 = vsel %vm3085_vm10, %v3064_v39, %v5871_v38  ;;  %v7149_v20 = vld [vmem:[#allocation2 + $0x18] sm:$0xff]  ;;  %v5996_v33 = vunpack.i.h.bf16 %v8445_v22 }
 0x2b3   : > { %6373 = vrot.lane.b32.xlu1 %v8570_v15, %s7225_s18  ;;  %6368 = vrot.lane.b32.xlu0 %v8544_v59, %s7225_s18 }
 0x2b5   : > { %v8594_v57 = vpop.permute.xlu1 %6098  ;;  %v8596_v12 = vpop.permute.xlu0 %6078 }
 0x2b7   : > { %6378 = vrot.lane.b32.xlu1 %v8590_v48, %s7214_s21  ;;  %6383 = vrot.lane.b32.xlu0 %v8598_v50, %s7214_s21 }
 0x2b9   : > { %v8618_v31 = vpop.permute.xlu1 %6113  ;;  %v8620_v16 = vpop.permute.xlu0 %6093 }
 0x2ba   : > { %10526 = vst [vmem:[#allocation15_spill] sm:$0xff] %v8618_v31  ;;  %10527 = vst [vmem:[#allocation16_spill] sm:$0xff] %v8620_v16  ;;  %v5925_v31 = vunpack.i.l.bf16 %v8372_v52  ;;  %v3033_v52 = vsel %vm417_vm1, %v7147_v42, %v5906_v19  ;;  %v3130_v16 = vsel %vm3118_vm11, %v3097_v45, %v5926_v4  ;;  %v5980_v4 = vunpack.i.l.bf16 %v8433_v3 }
 0x2bb   : > { %6388 = vrot.lane.b32.xlu1 %v8592_v54, %s7215_s22  ;;  %6393 = vrot.lane.b32.xlu0 %v8600_v8, %s7215_s22  ;;  %v3066_v53 = vsel %vm3052_vm9, %v3033_v52, %v5916_v41  ;;  %v8662_v55 = vsel %vm3151_vm12, %v3130_v16, %v5936_v44  ;;  %v5960_v41 = vunpack.i.l.bf16 %v8414_v35  ;;  %v5961_v16 = vunpack.i.h.bf16 %v8414_v35 }
 0x2bc   : > { %v3129_v25 = vsel %vm3118_vm11, %v3096_v61, %v5925_v31  ;;  %v5981_v44 = vunpack.i.h.bf16 %v8433_v3  ;;  %v5991_v61 = vunpack.i.h.bf16 %v8443_v18  ;;  %v5985_v52 = vunpack.i.l.bf16 %v8435_v29  ;;  %v7150_v3 = vld [vmem:[#allocation2 + $0x20] sm:$0xff] }
 0x2bd   : > { %v8642_v5 = vpop.permute.xlu1 %6118  ;;  %v8644_v28 = vpop.permute.xlu0 %6103  ;;  %v8659_v1 = vsel %vm3151_vm12, %v3129_v25, %v5935_v60  ;;  %v5990_v25 = vunpack.i.l.bf16 %v8443_v18  ;;  %v5986_v60 = vunpack.i.h.bf16 %v8435_v29  ;;  %v8691_v6 = vsel %vm3085_vm10, %v3065_v56, %v5960_v41 }
 0x2be   : > { %v3022_v18 = vsel %vm417_vm1, %v7149_v20, %v5980_v4  ;;  %v5995_v31 = vunpack.i.l.bf16 %v8445_v22  ;;  %v8699_v35 = vsel %vm3085_vm10, %v3066_v53, %v5961_v16  ;;  %v3023_v19 = vsel %vm417_vm1, %v7150_v3, %v5981_v44  ;;  %v7151_v53 = vld [vmem:[#allocation2 + $0x38] sm:$0xff]  ;;  %v7152_v44 = vld [vmem:[#allocation2 + $0x30] sm:$0xff] }
 0x2bf   : > { %6403 = vrot.lane.b32.xlu1 %v8598_v50, %s7224_s17  ;;  %6398 = vrot.lane.b32.xlu0 %v8590_v48, %s7224_s17  ;;  %v3055_v29 = vsel %vm3052_vm9, %v3022_v18, %v5990_v25  ;;  %v6005_v56 = vunpack.i.l.bf16 %v8457_v13  ;;  %v3056_v20 = vsel %vm3052_vm9, %v3023_v19, %v5991_v61  ;;  %v6006_v22 = vunpack.i.h.bf16 %v8457_v13 }
 0x2c0   : > { %v3025_v16 = vsel %vm417_vm1, %v7151_v53, %v5986_v60  ;;  %v3024_v25 = vsel %vm417_vm1, %v7152_v44, %v5985_v52  ;;  %v6016_v3 = vunpack.i.h.bf16 %v8471_v36  ;;  %v6015_v18 = vunpack.i.l.bf16 %v8471_v36 }
 0x2c1   : > { %v8670_v45 = vpop.permute.xlu1 %6128  ;;  %v8672_v42 = vpop.permute.xlu0 %6108  ;;  %v3057_v19 = vsel %vm3052_vm9, %v3024_v25, %v5995_v31  ;;  %v3058_v13 = vsel %vm3052_vm9, %v3025_v16, %v5996_v33  ;;  %v10529_v61 = vunpack.i.l.bf16 %v8346_v47  ;;  %v10530_v60 = vunpack.i.h.bf16 %v8346_v47 }
 0x2c2   : > { %v6131_v36 = vunpack.i.h.bf16 %v8670_v45 }
 0x2c3   : > { %6413 = vrot.lane.b32.xlu1 %v8600_v8, %s7225_s18  ;;  %6408 = vrot.lane.b32.xlu0 %v8592_v54, %s7225_s18  ;;  %v3089_v52 = vsel %vm3085_vm10, %v3056_v20, %v10530_v60  ;;  %v6041_v20 = vunpack.i.h.bf16 %v8493_v14 }
 0x2c4   : > { %v3122_v31 = vsel %vm3118_vm11, %v3089_v52, %v6006_v22  ;;  %v7153_v22 = vld [vmem:[#allocation2 + $0x48] sm:$0xff] }
 0x2c5   : > { %v6139_v39 = vpop.permute.xlu1 %6138  ;;  %v8696_v38 = vpop.permute.xlu0 %6123 }
 0x2c6   : > { %10528 = vst [vmem:[#allocation17_spill] sm:$0xff] %v8696_v38  ;;  %v6140_v44 = vunpack.i.l.bf16 %v6139_v39  ;;  %v6141_v33 = vunpack.i.h.bf16 %v6139_v39  ;;  %v6040_v39 = vunpack.i.l.bf16 %v8493_v14 }
 0x2c7   : > { %6418 = vrot.lane.b32.xlu1 %v8590_v48, %s7226_s19  ;;  %6438 = vrot.lane.b32.xlu0 %v8598_v50, %s7226_s19  ;;  %v3088_v48 = vsel %vm3085_vm10, %v3055_v29, %v10529_v61  ;;  %v6130_v50 = vunpack.i.l.bf16 %v8670_v45  ;;  %v3155_v29 = vsel %vm3151_vm12, %v3122_v31, %v6016_v3  ;;  %v6035_v45 = vunpack.i.l.bf16 %v8479_v26  ;;  %v7155_v31 = vld [vmem:[#allocation2 + $0x68] sm:$0xff] }
 0x2c8   : > { %v3121_v53 = vsel %vm3118_vm11, %v3088_v48, %v6005_v56  ;;  %v6036_v56 = vunpack.i.h.bf16 %v8479_v26  ;;  %v6030_v26 = vunpack.i.l.bf16 %v8514_v46 }
 0x2c9   : > { %v6154_v4 = vpop.permute.xlu1 %6153  ;;  %v6134_v41 = vpop.permute.xlu0 %6133  ;;  %v3154_v47 = vsel %vm3151_vm12, %v3121_v53, %v6015_v18 }
 0x2ca   : > { %v6136_v16 = vunpack.i.h.bf16 %v6134_v41  ;;  %v6135_v25 = vunpack.i.l.bf16 %v6134_v41  ;;  %v6031_v41 = vunpack.i.h.bf16 %v8514_v46 }
 0x2cb   : > { %6423 = vrot.lane.b32.xlu1 %v8592_v54, %s7227_s20  ;;  %6443 = vrot.lane.b32.xlu0 %v8600_v8, %s7227_s20  ;;  %v3026_v54 = vsel %vm417_vm1, %v7153_v22, %v6130_v50  ;;  %v7154_v8 = vld [vmem:[#allocation2 + $0x50] sm:$0xff]  ;;  %v6156_v50 = vunpack.i.h.bf16 %v6154_v4 }
 0x2cc   : > { %v3027_v18 = vsel %vm417_vm1, %v7154_v8, %v6131_v36  ;;  %v3059_v3 = vsel %vm3052_vm9, %v3026_v54, %v6140_v44  ;;  %v3029_v14 = vsel %vm417_vm1, %v7155_v31, %v6136_v16  ;;  %v3028_v38 = vsel %vm417_vm1, %v7156_v23, %v6135_v25 }
 0x2cd   : > { %v6164_v61 = vpop.permute.xlu1 %6163  ;;  %v6144_v48 = vpop.permute.xlu0 %6143  ;;  %v3060_v53 = vsel %vm3052_vm9, %v3027_v18, %v6141_v33  ;;  %v6155_v36 = vunpack.i.l.bf16 %v6154_v4  ;;  %v10531_v54 = vunpack.i.l.bf16 %v8315_v2  ;;  %v10532_v23 = vunpack.i.h.bf16 %v8315_v2 }
 0x2ce   : > { %v6146_v60 = vunpack.i.h.bf16 %v6144_v48  ;;  %v6145_v52 = vunpack.i.l.bf16 %v6144_v48  ;;  %v6166_v22 = vunpack.i.h.bf16 %v6164_v61  ;;  %v6165_v33 = vunpack.i.l.bf16 %v6164_v61 }
 0x2cf   : > { %6428 = vrot.lane.b32.xlu1 %v8190_v49, %s7226_s19  ;;  %6448 = vrot.lane.b32.xlu0 %v8212_v34, %s7226_s19  ;;  %v3188_v34 = vsel %vm3184_vm13, %v3155_v29, %v6041_v20  ;;  %v3187_v4 = vsel %vm3184_vm13, %v3154_v47, %v6040_v39  ;;  %v10534_v61 = vunpack.i.h.bf16 %v8374_v58  ;;  %v3093_v2 = vsel %vm3085_vm10, %v3060_v53, %v6036_v56 }
 0x2d0   : > { %v3061_v44 = vsel %vm3052_vm9, %v3028_v38, %v6145_v52  ;;  %v3062_v46 = vsel %vm3052_vm9, %v3029_v14, %v6146_v60  ;;  %v10533_v38 = vunpack.i.l.bf16 %v8374_v58  ;;  %v3092_v60 = vsel %vm3085_vm10, %v3059_v3, %v6035_v45 }
 0x2d1   : > { %v3094_v16 = vsel %vm3085_vm10, %v3061_v44, %v10531_v54  ;;  %v3095_v25 = vsel %vm3085_vm10, %v3062_v46, %v10532_v23  ;;  %v6169_v49 = vpop.permute.xlu1 %6168  ;;  %v6149_v48 = vpop.permute.xlu0 %6148  ;;  %v3090_v47 = vsel %vm3085_vm10, %v3057_v19, %v6030_v26  ;;  %v3091_v29 = vsel %vm3085_vm10, %v3058_v13, %v6031_v41 }
 0x2d2   : > { %v3127_v8 = vsel %vm3118_vm11, %v3094_v16, %v10533_v38  ;;  %v3128_v18 = vsel %vm3118_vm11, %v3095_v25, %v10534_v61  ;;  %v6171_v52 = vunpack.i.h.bf16 %v6169_v49  ;;  %v6170_v31 = vunpack.i.l.bf16 %v6169_v49 }
 0x2d3   : > { %6433 = vrot.lane.b32.xlu1 %v8192_v51, %s7227_s20  ;;  %6458 = vrot.lane.b32.xlu0 %v8216_v40, %s7227_s20  ;;  %v3125_v58 = vsel %vm3118_vm11, %v3092_v60, %v6155_v36  ;;  %v3126_v20 = vsel %vm3118_vm11, %v3093_v2, %v6156_v50  ;;  %v10535_v39 = vunpack.i.l.bf16 %v8381_v62  ;;  %v10536_v51 = vunpack.i.h.bf16 %v8381_v62 }
 0x2d4   : > { %v3158_v45 = vsel %vm3151_vm12, %v3125_v58, %v6165_v33  ;;  %v3159_v56 = vsel %vm3151_vm12, %v3126_v20, %v6166_v22  ;;  %v6151_v26 = vunpack.i.h.bf16 %v6149_v48  ;;  %v6150_v13 = vunpack.i.l.bf16 %v6149_v48 }
 0x2d5   : > { %v3160_v3 = vsel %vm3151_vm12, %v3127_v8, %v10535_v39  ;;  %v3161_v40 = vsel %vm3151_vm12, %v3128_v18, %v10536_v51  ;;  %v6179_v53 = vpop.permute.xlu1 %6178  ;;  %v6159_v19 = vpop.permute.xlu0 %6158  ;;  %v3221_v50 = vsel %vm3217_vm14, %v3188_v34, %v6171_v52  ;;  %v3220_v36 = vsel %vm3217_vm14, %v3187_v4, %v6170_v31 }
 0x2d6   : > { %v6181_v41 = vunpack.i.h.bf16 %v6179_v53  ;;  %v6180_v14 = vunpack.i.l.bf16 %v6179_v53  ;;  %v6161_v44 = vunpack.i.h.bf16 %v6159_v19  ;;  %v6160_v46 = vunpack.i.l.bf16 %v6159_v19 }
 0x2d7   : > { %6453 = vrot.lane.b32.xlu1 %v8530_v9, %s7226_s19  ;;  %6468 = vrot.lane.b32.xlu0 %v8552_v37, %s7226_s19  ;;  %v6046_v62 = vunpack.i.h.bf16 %v8528_v24  ;;  %v6045_v22 = vunpack.i.l.bf16 %v8528_v24  ;;  %v6091_v16 = vunpack.i.h.bf16 %v8574_v27  ;;  %v10537_v23 = vunpack.i.l.bf16 %v8328_v32 }
 0x2d8   : > { %v3253_v33 = vsel %vm3250_vm15, %v3220_v36, %v6180_v14  ;;  %v3254_v54 = vsel %vm3250_vm15, %v3221_v50, %v6181_v41  ;;  %v10538_v49 = vunpack.i.h.bf16 %v8328_v32  ;;  %v3123_v24 = vsel %vm3118_vm11, %v3090_v47, %v6150_v13 }
 0x2d9   : > { %v3191_v25 = vsel %vm3184_vm13, %v3158_v45, %v10537_v23  ;;  %v8801_v48 = vpop.permute.xlu1 %6193  ;;  %v6174_v37 = vpop.permute.xlu0 %6173  ;;  %v3284_v34 = vpack.c.bf16 %v3254_v54, %v3253_v33  ;;  %v3124_v4 = vsel %vm3118_vm11, %v3091_v29, %v6151_v26  ;;  %v10539_v38 = vunpack.i.l.bf16 %v8321_v21 }
 0x2da   : > { %v3192_v9 = vsel %vm3184_vm13, %v3159_v56, %v10538_v49  ;;  %v10540_v61 = vunpack.i.h.bf16 %v8321_v21  ;;  %v3156_v32 = vsel %vm3151_vm12, %v3123_v24, %v6160_v46  ;;  %v3157_v60 = vsel %vm3151_vm12, %v3124_v4, %v6161_v44  ;;  %v10550_v24 = vld [vmem:[#allocation16_spill] sm:$0xff] }
 0x2db   : > { %v3193_v8 = vsel %vm3184_vm13, %v3160_v3, %v10539_v38  ;;  %v6176_v2 = vunpack.i.h.bf16 %v6174_v37  ;;  %v6175_v52 = vunpack.i.l.bf16 %v6174_v37  ;;  %6463 = vrot.lane.b32.xlu1 %v8544_v59, %s7227_s20  ;;  %6478 = vrot.lane.b32.xlu0 %v8570_v15, %s7227_s20  ;;  %v6071_v31 = vunpack.i.h.bf16 %v8576_v43  ;;  %v10552_v38 = vld [vmem:[#allocation5_spill] sm:$0xff] }
 0x2dc   : > { %v3194_v18 = vsel %vm3184_vm13, %v3161_v40, %v10540_v61  ;;  %v6070_v47 = vunpack.i.l.bf16 %v8576_v43  ;;  %5748 = vmatmul.mubr.msk.bf16.vlgmr.msra.gmra.mxu1 %vm3335_vm2, %v3284_v34  ;;  %v10541_v21 = vunpack.i.l.bf16 %v8387_v63  ;;  %v10542_v58 = vunpack.i.h.bf16 %v8387_v63 }
 0x2dd   : > { %v6081_v45 = vunpack.i.h.bf16 %v8596_v12  ;;  %v6080_v59 = vunpack.i.l.bf16 %v8596_v12  ;;  %v8828_v56 = vpop.permute.xlu1 %6198  ;;  %v6184_v15 = vpop.permute.xlu0 %6183  ;;  %v10543_v39 = vunpack.i.l.bf16 %v8389_v11  ;;  %v10544_v3 = vunpack.i.h.bf16 %v8389_v11 }
 0x2de   : > { %v3224_v29 = vsel %vm3217_vm14, %v3191_v25, %v10541_v21  ;;  %v3225_v20 = vsel %vm3217_vm14, %v3192_v9, %v10542_v58  ;;  %v3189_v40 = vsel %vm3184_vm13, %v3156_v32, %v6045_v22  ;;  %v3190_v63 = vsel %vm3184_vm13, %v3157_v60, %v6046_v62 }
 0x2df   : > { %v3226_v43 = vsel %vm3217_vm14, %v3193_v8, %v10543_v39  ;;  %v3227_v51 = vsel %vm3217_vm14, %v3194_v18, %v10544_v3  ;;  %v6186_v53 = vunpack.i.h.bf16 %v6184_v15  ;;  %v6185_v19 = vunpack.i.l.bf16 %v6184_v15  ;;  %v10554_v18 = vld [vmem:[#allocation8_spill] sm:$0xff] }
 0x2e0   : > { %v3222_v26 = vsel %vm3217_vm14, %v3189_v40, %v6175_v52  ;;  %v3223_v12 = vsel %vm3217_vm14, %v3190_v63, %v6176_v2  ;;  %v10545_v13 = vpack.i.bf16 %v8339_v30, %v8326_v0  ;;  %v10546_v41 = vunpack.i.l.bf16 %v8399_v10 }
 0x2e1   : > { %v10547_v14 = vunpack.i.h.bf16 %v8399_v10  ;;  %v3255_v36 = vsel %vm3250_vm15, %v3222_v26, %v6185_v19  ;;  %v3256_v44 = vsel %vm3250_vm15, %v3223_v12, %v6186_v53  ;;  %v10548_v46 = vunpack.i.l.bf16 %v8401_v17  ;;  %v8863_v54 = vpop.permute.xlu1 %6208  ;;  %v8865_v23 = vpop.permute.xlu0 %6188 }
 0x2e2   : > { %6473 = vrot.lane.b32.xlu1 %v10545_v13, %s7226_s19  ;;  %v3257_v11 = vsel %vm3250_vm15, %v3224_v29, %v10546_v41  ;;  %v10549_v22 = vunpack.i.h.bf16 %v8401_v17  ;;  %v6090_v30 = vunpack.i.l.bf16 %v8574_v27  ;;  %v3131_v33 = vsel %vm3118_vm11, %v8691_v6, %v6070_v47 }
 0x2e3   : > { %v3258_v50 = vsel %vm3250_vm15, %v3225_v20, %v10547_v14  ;;  %v3259_v62 = vsel %vm3250_vm15, %v3226_v43, %v10548_v46  ;;  %v3132_v10 = vsel %vm3118_vm11, %v8699_v35, %v6071_v31  ;;  %v3285_v25 = vpack.c.bf16 %v3256_v44, %v3255_v36  ;;  %v10551_v35 = vld [vmem:[#allocation6_spill] sm:$0xff] }
 0x2e4   : > { %v3260_v0 = vsel %vm3250_vm15, %v3227_v51, %v10549_v22  ;;  %v6101_v49 = vunpack.i.h.bf16 %v8594_v57  ;;  %v6100_v9 = vunpack.i.l.bf16 %v8594_v57  ;;  %v3164_v17 = vsel %vm3151_vm12, %v3131_v33, %v6080_v59  ;;  %v10558_v22 = vld [vmem:[#allocation10_spill] sm:$0xff] }
 0x2e5   : > { %v3286_v37 = vpack.c.bf16 %v3258_v50, %v3257_v11  ;;  %v3165_v34 = vsel %vm3151_vm12, %v3132_v10, %v6081_v45  ;;  %v6096_v4 = vunpack.i.h.bf16 %v10550_v24  ;;  %v6095_v6 = vunpack.i.l.bf16 %v10550_v24  ;;  %5751 = vmatprep.mubr.msk.bf16.mxu1 %vm3335_vm2, %v3285_v25  ;;  %v8891_v29 = vpop.permute.xlu1 %6218  ;;  %v8893_v58 = vpop.permute.xlu0 %6203  ;;  %v10557_v50 = vld [vmem:[#allocation9_spill] sm:$0xff]  ;;  %v7157_v33 = vld [vmem:[#allocation2 + $0xb0] sm:$0xff]  ;;  %v10559_v24 = vld [vmem:[#allocation11_spill] sm:$0xff] }
 0x2e6   : > { %v10553_v8 = vpack.i.bf16 %v10551_v35, %v10552_v38  ;;  %v3287_v61 = vpack.c.bf16 %v3260_v0, %v3259_v62  ;;  %v5976_v32 = vunpack.i.h.bf16 %v10554_v18  ;;  %v5975_v57 = vunpack.i.l.bf16 %v10554_v18  ;;  %v7158_v25 = vld [vmem:[#allocation2 + $0xa8] sm:$0xff]  ;;  %v10560_v35 = vld [vmem:[#allocation7_spill] sm:$0xff] }
 0x2e7   : > { %v6106_v60 = vunpack.i.h.bf16 %v8644_v28  ;;  %v6105_v2 = vunpack.i.l.bf16 %v8644_v28  ;;  %5752 = vmatmul.mubr.msk.bf16.gmra.mxu1 %vm3335_vm2, %v3286_v37  ;;  %v10555_v52 = vunpack.i.h.bf16 %v8423_v7  ;;  %v10556_v47 = vunpack.i.l.bf16 %v8423_v7 }
 0x2e8   : > { %6483 = vrot.lane.b32.xlu1 %v10553_v8, %s7227_s20  ;;  %5755 = vmatprep.mubr.msk.bf16.mxu1 %vm3335_vm2, %v3287_v61  ;;  %v3197_v45 = vsel %vm3184_vm13, %v3164_v17, %v5975_v57  ;;  %v6051_v36 = vunpack.i.h.bf16 %v10557_v50  ;;  %v6050_v44 = vunpack.i.l.bf16 %v10557_v50  ;;  %v6061_v0 = vunpack.i.h.bf16 %v10558_v22  ;;  %v10561_v61 = vld [vmem:[#allocation12_spill] sm:$0xff]  ;;  %v10562_v57 = vld [vmem:[#allocation13_spill] sm:$0xff]  ;;  %v10563_v50 = vld [vmem:[#allocation14_spill] sm:$0xff] }
 0x2e9   : > { %v3196_v31 = vsel %vm3184_vm13, %v8662_v55, %v10555_v52  ;;  %v3195_v21 = vsel %vm3184_vm13, %v8659_v1, %v10556_v47  ;;  %v3198_v55 = vsel %vm3184_vm13, %v3165_v34, %v5976_v32  ;;  %v3230_v59 = vsel %vm3217_vm14, %v3197_v45, %v6095_v6  ;;  %v8908_v43 = vpop.permute.xlu1 %6233 }
 0x2ea   : > { %v3229_v28 = vsel %vm3217_vm14, %v3196_v31, %v6091_v16  ;;  %v3228_v20 = vsel %vm3217_vm14, %v3195_v21, %v6090_v30  ;;  %v3231_v15 = vsel %vm3217_vm14, %v3198_v55, %v6096_v4  ;;  %v3263_v39 = vsel %vm3250_vm15, %v3230_v59, %v6105_v2  ;;  %v8910_v16 = vpop.permute.xlu0 %6213  ;;  %v7160_v59 = vld [vmem:[#allocation2 + $0xc0] sm:$0xff] }
 0x2eb   : > { %v3261_v7 = vsel %vm3250_vm15, %v3228_v20, %v6100_v9  ;;  %v3262_v1 = vsel %vm3250_vm15, %v3229_v28, %v6101_v49  ;;  %v3264_v27 = vsel %vm3250_vm15, %v3231_v15, %v6106_v60  ;;  %v6060_v30 = vunpack.i.l.bf16 %v10558_v22 }
 0x2ec   : > { %v3288_v3 = vpack.c.bf16 %v3262_v1, %v3261_v7  ;;  %v3289_v51 = vpack.c.bf16 %v3264_v27, %v3263_v39  ;;  %v3035_v10 = vsel %vm417_vm1, %v7157_v33, %v6051_v36  ;;  %v3034_v49 = vsel %vm417_vm1, %v7158_v25, %v6050_v44  ;;  %v7159_v7 = vld [vmem:[#allocation2 + $0xc8] sm:$0xff] }
 0x2ed   : > { %v8913_v40 = vpop.permute.xlu1 %6243  ;;  %v3067_v37 = vsel %vm3052_vm9, %v3034_v49, %v6060_v30  ;;  %v3068_v34 = vsel %vm3052_vm9, %v3035_v10, %v6061_v0  ;;  %v6076_v4 = vunpack.i.h.bf16 %v10559_v24  ;;  %v6075_v6 = vunpack.i.l.bf16 %v10559_v24 }
 0x2ee   : > { %v8915_v63 = vpop.permute.xlu0 %6223  ;;  %v5966_v38 = vunpack.i.h.bf16 %v10560_v35  ;;  %v5965_v8 = vunpack.i.l.bf16 %v10560_v35  ;;  %v6056_v18 = vunpack.i.h.bf16 %v10561_v61  ;;  %v6055_v32 = vunpack.i.l.bf16 %v10561_v61 }
 0x2ef   : > { %5756 = vmatmul.mubr.msk.bf16.gmra.mxu1 %vm3335_vm2, %v3288_v3  ;;  %v6086_v60 = vunpack.i.h.bf16 %v10562_v57  ;;  %v6085_v2 = vunpack.i.l.bf16 %v10562_v57  ;;  %v6201_v47 = vunpack.i.h.bf16 %v8828_v56  ;;  %v6200_v21 = vunpack.i.l.bf16 %v8828_v56 }
 0x2f0   : > { %5759 = vmatprep.mubr.msk.bf16.mxu1 %vm3335_vm2, %v3289_v51  ;;  %v3100_v52 = vsel %vm3085_vm10, %v3067_v37, %v5965_v8  ;;  %v3101_v31 = vsel %vm3085_vm10, %v3068_v34, %v5966_v38  ;;  %v3037_v1 = vsel %vm417_vm1, %v7159_v7, %v6056_v18  ;;  %v3036_v15 = vsel %vm417_vm1, %v7160_v59, %v6055_v32 }
 0x2f1   : > { %v8918_v53 = vpop.permute.xlu1 %6253  ;;  %v3133_v45 = vsel %vm3118_vm11, %v3100_v52, %v6075_v6  ;;  %v3134_v55 = vsel %vm3118_vm11, %v3101_v31, %v6076_v4  ;;  %v6066_v56 = vunpack.i.h.bf16 %v10563_v50  ;;  %v6065_v36 = vunpack.i.l.bf16 %v10563_v50 }
 0x2f2   : > { %v8920_v19 = vpop.permute.xlu0 %6228  ;;  %v3166_v3 = vsel %vm3151_vm12, %v3133_v45, %v6085_v2  ;;  %v3167_v51 = vsel %vm3151_vm12, %v3134_v55, %v6086_v60  ;;  %v6191_v0 = vunpack.i.h.bf16 %v8865_v23  ;;  %v6190_v30 = vunpack.i.l.bf16 %v8865_v23 }
 0x2f3   : > { %v3200_v44 = vsel %vm3184_vm13, %v3167_v51, %v6201_v47  ;;  %v3199_v22 = vsel %vm3184_vm13, %v3166_v3, %v6200_v21  ;;  %v3069_v38 = vsel %vm3052_vm9, %v3036_v15, %v6065_v36  ;;  %v3070_v8 = vsel %vm3052_vm9, %v3037_v1, %v6066_v56 }
 0x2f4   : > { %v3102_v18 = vsel %vm3085_vm10, %v3069_v38, %v6190_v30  ;;  %v3103_v32 = vsel %vm3085_vm10, %v3070_v8, %v6191_v0  ;;  %v6206_v45 = vunpack.i.h.bf16 %v8893_v58  ;;  %v6205_v55 = vunpack.i.l.bf16 %v8893_v58 }
 0x2f5   : > { %v8922_v26 = vpop.permute.xlu1 %6258  ;;  %v6210_v7 = vunpack.i.l.bf16 %v8863_v54  ;;  %v6211_v51 = vunpack.i.h.bf16 %v8863_v54  ;;  %v6220_v50 = vunpack.i.l.bf16 %v8891_v29  ;;  %v6221_v58 = vunpack.i.h.bf16 %v8891_v29 }
 0x2f6   : > { %v8924_v12 = vpop.permute.xlu0 %6238  ;;  %v6120_v29 = vunpack.i.l.bf16 %v8642_v5  ;;  %v6236_v38 = vunpack.i.h.bf16 %v8908_v43  ;;  %v6235_v8 = vunpack.i.l.bf16 %v8908_v43 }
 0x2f9   : > { %v8926_v13 = vpop.permute.xlu1 %6268 }
 0x2fa   : > { %v8928_v41 = vpop.permute.xlu0 %6248 }
 0x2fd   : > { %v8930_v11 = vpop.permute.xlu1 %6278 }
 0x2fe   : > { %v8932_v14 = vpop.permute.xlu0 %6263 }
 0x301   : > { %v8936_v46 = vpop.permute.xlu1 %6293 }
 0x302   : > { %v8938_v62 = vpop.permute.xlu0 %6273 }
 0x305   : > { %v8944_v9 = vpop.permute.xlu1 %6303 }
 0x306   : > { %v8946_v17 = vpop.permute.xlu0 %6283 }
 0x309   : > { %v6309_v28 = vpop.permute.xlu1 %6308 }
 0x30a   : > { %v6289_v20 = vpop.permute.xlu0 %6288  ;;  %v6311_v39 = vunpack.i.h.bf16 %v6309_v28  ;;  %v6310_v27 = vunpack.i.l.bf16 %v6309_v28 }
 0x30b   : > { %v6291_v25 = vunpack.i.h.bf16 %v6289_v20  ;;  %v6290_v49 = vunpack.i.l.bf16 %v6289_v20 }
 0x30c   : > { %v3233_v24 = vsel %vm3217_vm14, %v3200_v44, %v6311_v39  ;;  %v3232_v4 = vsel %vm3217_vm14, %v3199_v22, %v6310_v27 }
 0x30d   : > { %v6314_v33 = vpop.permute.xlu1 %6313  ;;  %v3135_v52 = vsel %vm3118_vm11, %v3102_v18, %v6290_v49  ;;  %v3136_v31 = vsel %vm3118_vm11, %v3103_v32, %v6291_v25  ;;  %v7161_v49 = vld [vmem:[#allocation2 + $0x138] sm:$0xff]  ;;  %v6215_v18 = vunpack.i.l.bf16 %v8910_v16  ;;  %v6246_v32 = vunpack.i.h.bf16 %v8913_v40 }
 0x30e   : > { %v6299_v10 = vpop.permute.xlu0 %6298  ;;  %v6316_v37 = vunpack.i.h.bf16 %v6314_v33  ;;  %v6315_v34 = vunpack.i.l.bf16 %v6314_v33 }
 0x30f   : > { %v6301_v6 = vunpack.i.h.bf16 %v6299_v10  ;;  %v6300_v35 = vunpack.i.l.bf16 %v6299_v10  ;;  %v10564_v10 = vld [vmem:[#allocation15_spill] sm:$0xff] }
 0x310   : > { %v3265_v61 = vsel %vm3250_vm15, %v3232_v4, %v6315_v34  ;;  %v3266_v23 = vsel %vm3250_vm15, %v3233_v24, %v6316_v37  ;;  %v6116_v25 = vunpack.i.h.bf16 %v10564_v10  ;;  %v6115_v54 = vunpack.i.l.bf16 %v10564_v10  ;;  %v7162_v24 = vld [vmem:[#allocation2 + $0x140] sm:$0xff] }
 0x311   : > { %v8982_v57 = vpop.permute.xlu1 %6333  ;;  %v3290_v2 = vpack.c.bf16 %v3266_v23, %v3265_v61  ;;  %v3168_v47 = vsel %vm3151_vm12, %v3135_v52, %v6300_v35  ;;  %v3169_v21 = vsel %vm3151_vm12, %v3136_v31, %v6301_v6  ;;  %v3046_v37 = vsel %vm417_vm1, %v7161_v49, %v6210_v7  ;;  %v7171_v49 = vld [vmem:[#allocation2 + $0x108] sm:$0xff] }
 0x312   : > { %v6319_v60 = vpop.permute.xlu0 %6318  ;;  %v3201_v15 = vsel %vm3184_vm13, %v3168_v47, %v6205_v55  ;;  %v3202_v39 = vsel %vm3184_vm13, %v3169_v21, %v6206_v45  ;;  %v6121_v34 = vunpack.i.h.bf16 %v8642_v5  ;;  %v3047_v4 = vsel %vm417_vm1, %v7162_v24, %v6211_v51  ;;  %v10565_v47 = vld [vmem:[#allocation17_spill] sm:$0xff] }
 0x313   : > { %v6321_v28 = vunpack.i.h.bf16 %v6319_v60  ;;  %v6320_v20 = vunpack.i.l.bf16 %v6319_v60  ;;  %5760 = vmatmul.mubr.msk.bf16.gmra.mxu1 %vm3335_vm2, %v3290_v2  ;;  %v3079_v6 = vsel %vm3052_vm9, %v3046_v37, %v6220_v50  ;;  %v3080_v35 = vsel %vm3052_vm9, %v3047_v4, %v6221_v58  ;;  %v7165_v4 = vld [vmem:[#allocation2 + $0xd8] sm:$0xff] }
 0x314   : > { %v6216_v61 = vunpack.i.h.bf16 %v8910_v16  ;;  %v6111_v23 = vunpack.i.h.bf16 %v8672_v42  ;;  %v6245_v60 = vunpack.i.l.bf16 %v8913_v40  ;;  %v6110_v31 = vunpack.i.l.bf16 %v8672_v42 }
 0x315   : > { %v8992_v1 = vpop.permute.xlu1 %6338  ;;  %v3234_v56 = vsel %vm3217_vm14, %v3201_v15, %v6320_v20  ;;  %v3235_v36 = vsel %vm3217_vm14, %v3202_v39, %v6321_v28  ;;  %v6126_v21 = vunpack.i.h.bf16 %v10565_v47  ;;  %v6125_v43 = vunpack.i.l.bf16 %v10565_v47  ;;  %v7163_v15 = vld [vmem:[#allocation2 + $0x158] sm:$0xff] }
 0x316   : > { %v6324_v59 = vpop.permute.xlu0 %6323  ;;  %v6196_v28 = vunpack.i.h.bf16 %v8801_v48  ;;  %v3112_v20 = vsel %vm3085_vm10, %v3079_v6, %v6115_v54  ;;  %v3113_v16 = vsel %vm3085_vm10, %v3080_v35, %v6116_v25  ;;  %v6226_v45 = vunpack.i.h.bf16 %v8915_v63  ;;  %v7170_v25 = vld [vmem:[#allocation2 + $0x120] sm:$0xff] }
 0x317   : > { %v6326_v27 = vunpack.i.h.bf16 %v6324_v59  ;;  %v6325_v3 = vunpack.i.l.bf16 %v6324_v59  ;;  %v6225_v40 = vunpack.i.l.bf16 %v8915_v63  ;;  %v6195_v55 = vunpack.i.l.bf16 %v8801_v48 }
 0x318   : > { %v3145_v7 = vsel %vm3118_vm11, %v3112_v20, %v6235_v8  ;;  %v3146_v59 = vsel %vm3118_vm11, %v3113_v16, %v6236_v38  ;;  %v3049_v39 = vsel %vm417_vm1, %v7163_v15, %v6216_v61  ;;  %v6261_v48 = vunpack.i.h.bf16 %v8922_v26 }
 0x319   : > { %v3267_v44 = vsel %vm3250_vm15, %v3234_v56, %v6325_v3  ;;  %v3268_v22 = vsel %vm3250_vm15, %v3235_v36, %v6326_v27  ;;  %v9003_v0 = vpop.permute.xlu1 %6348  ;;  %v7164_v27 = vld [vmem:[#allocation2 + $0x150] sm:$0xff]  ;;  %v3178_v51 = vsel %vm3151_vm12, %v3145_v7, %v6245_v60  ;;  %v3179_v50 = vsel %vm3151_vm12, %v3146_v59, %v6246_v32  ;;  %v7166_v32 = vld [vmem:[#allocation2 + $0xe0] sm:$0xff] }
 0x31a   : > { %v9005_v30 = vpop.permute.xlu0 %6328  ;;  %v3291_v33 = vpack.c.bf16 %v3268_v22, %v3267_v44  ;;  %v3048_v3 = vsel %vm417_vm1, %v7164_v27, %v6215_v18  ;;  %v6270_v56 = vunpack.i.l.bf16 %v8926_v13  ;;  %v6260_v58 = vunpack.i.l.bf16 %v8922_v26 }
 0x31b   : > { %v6271_v44 = vunpack.i.h.bf16 %v8926_v13  ;;  %v6280_v22 = vunpack.i.l.bf16 %v8930_v11  ;;  %v3082_v10 = vsel %vm3052_vm9, %v3049_v39, %v6226_v45  ;;  %v6281_v54 = vunpack.i.h.bf16 %v8930_v11 }
 0x31c   : > { %5763 = vmatprep.mubr.msk.bf16.mxu1 %vm3335_vm2, %v3291_v33  ;;  %v3081_v33 = vsel %vm3052_vm9, %v3048_v3, %v6225_v40  ;;  %v6231_v37 = vunpack.i.h.bf16 %v8920_v19  ;;  %v6230_v24 = vunpack.i.l.bf16 %v8920_v19  ;;  %v6241_v26 = vunpack.i.h.bf16 %v8924_v12 }
 0x31d   : > { %v9023_v2 = vpop.permute.xlu1 %6353  ;;  %v6240_v13 = vunpack.i.l.bf16 %v8924_v12  ;;  %v3038_v6 = vsel %vm417_vm1, %v7165_v4, %v6270_v56  ;;  %v6251_v35 = vunpack.i.h.bf16 %v8928_v41  ;;  %v6250_v38 = vunpack.i.l.bf16 %v8928_v41 }
 0x31e   : > { %v9025_v52 = vpop.permute.xlu0 %6343  ;;  %v9068_v61 = vsel %vm3184_vm13, %v3179_v50, %v6261_v48  ;;  %v9071_v18 = vsel %vm3184_vm13, %v3178_v51, %v6260_v58  ;;  %v3039_v60 = vsel %vm417_vm1, %v7166_v32, %v6271_v44  ;;  %v3071_v20 = vsel %vm3052_vm9, %v3038_v6, %v6280_v22 }
 0x31f   : > { %v3072_v16 = vsel %vm3052_vm9, %v3039_v60, %v6281_v54  ;;  %v6296_v45 = vunpack.i.h.bf16 %v8936_v46  ;;  %v6295_v41 = vunpack.i.l.bf16 %v8936_v46  ;;  %v6275_v40 = vunpack.i.l.bf16 %v8938_v62  ;;  %v7168_v54 = vld [vmem:[#allocation2 + $0xf8] sm:$0xff] }
 0x320   : > { %v6276_v7 = vunpack.i.h.bf16 %v8938_v62  ;;  %v6306_v59 = vunpack.i.h.bf16 %v8944_v9  ;;  %v6305_v15 = vunpack.i.l.bf16 %v8944_v9  ;;  %v6285_v39 = vunpack.i.l.bf16 %v8946_v17 }
 0x321   : > { %v9043_v36 = vpop.permute.xlu1 %6363  ;;  %v9084_v27 = vsel %vm3085_vm10, %v3081_v33, %v6250_v38  ;;  %v9087_v3 = vsel %vm3085_vm10, %v3082_v10, %v6251_v35  ;;  %v6286_v51 = vunpack.i.h.bf16 %v8946_v17  ;;  %v6341_v46 = vunpack.i.h.bf16 %v8992_v1  ;;  %v7167_v33 = vld [vmem:[#allocation2 + $0xf0] sm:$0xff] }
 0x322   : > { %v9045_v63 = vpop.permute.xlu0 %6358  ;;  %v3104_v9 = vsel %vm3085_vm10, %v3071_v20, %v6195_v55  ;;  %v3105_v58 = vsel %vm3085_vm10, %v3072_v16, %v6196_v28  ;;  %v3040_v10 = vsel %vm417_vm1, %v7167_v33, %v6275_v40  ;;  %v6340_v17 = vunpack.i.l.bf16 %v8992_v1 }
 0x323   : > { %v3137_v44 = vsel %vm3118_vm11, %v3104_v9, %v6295_v41  ;;  %v3138_v22 = vsel %vm3118_vm11, %v3105_v58, %v6296_v45  ;;  %v3041_v4 = vsel %vm417_vm1, %v7168_v54, %v6276_v7  ;;  %v3073_v55 = vsel %vm3052_vm9, %v3040_v10, %v6285_v39  ;;  %v9111_v7 = vld [vmem:[#allocation3] sm:$0xff] }
 0x324   : > { %v3170_v6 = vsel %vm3151_vm12, %v3137_v44, %v6305_v15  ;;  %v3171_v35 = vsel %vm3151_vm12, %v3138_v22, %v6306_v59  ;;  %v3074_v28 = vsel %vm3052_vm9, %v3041_v4, %v6286_v51  ;;  %v6336_v38 = vunpack.i.h.bf16 %v8982_v57  ;;  %v9113_v59 = vld [vmem:[#allocation3 + $0x8] sm:$0xff]  ;;  %v9115_v15 = vld [vmem:[#allocation3 + $0x10] sm:$0x3] }
 0x325   : > { %v9063_v8 = vpop.permute.xlu1 %6373  ;;  %v6335_v32 = vunpack.i.l.bf16 %v8982_v57  ;;  %v9107_v60 = vsel %vm3184_vm13, %v3171_v35, %v6341_v46  ;;  %v6331_v16 = vunpack.i.h.bf16 %v9005_v30  ;;  %v6330_v45 = vunpack.i.l.bf16 %v9005_v30  ;;  %v7169_v35 = vld [vmem:[#allocation2 + $0x128] sm:$0xff] }
 0x326   : > { %v9065_v11 = vpop.permute.xlu0 %6368  ;;  %v9118_v39 = vsel %vm3184_vm13, %v3170_v6, %v6340_v17  ;;  %v3847_v10 = vrot.slane %v9111_v7, 1  ;;  %v3848_v54 = vrot.slane %v9113_v59, 1  ;;  %v3850_v17 = vrot.slane %v9115_v15, 1 }
 0x327   : > { %v3106_v4 = vsel %vm3085_vm10, %v3073_v55, %v6330_v45  ;;  %v3107_v6 = vsel %vm3085_vm10, %v3074_v28, %v6331_v16  ;;  %v6355_v9 = vunpack.i.l.bf16 %v9023_v2  ;;  %v7172_v55 = vld [vmem:[#allocation2 + $0x110] sm:$0xff] }
 0x329   : > { %v6379_v50 = vpop.permute.xlu1 %6378 }
 0x32a   : > { %v6384_v56 = vpop.permute.xlu0 %6383  ;;  %v6380_v57 = vunpack.i.l.bf16 %v6379_v50  ;;  %v6381_v44 = vunpack.i.h.bf16 %v6379_v50 }
 0x32b   : > { %v6386_v41 = vunpack.i.h.bf16 %v6384_v56  ;;  %v6385_v40 = vunpack.i.l.bf16 %v6384_v56 }
 0x32c   : > { %v3042_v62 = vsel %vm417_vm1, %v7171_v49, %v6380_v57  ;;  %v3043_v28 = vsel %vm417_vm1, %v7172_v55, %v6381_v44  ;;  %v3849_v57 = vsel %vm2064_vm3, %v3847_v10, %v3848_v54 }
 0x32d   : > { %v6389_v20 = vpop.permute.xlu1 %6388  ;;  %v3044_v50 = vsel %vm417_vm1, %v7170_v25, %v6385_v40 }
 0x32e   : > { %v6394_v1 = vpop.permute.xlu0 %6393  ;;  %v6390_v30 = vunpack.i.l.bf16 %v6389_v20  ;;  %v6391_v22 = vunpack.i.h.bf16 %v6389_v20 }
 0x32f   : > { %v6396_v51 = vunpack.i.h.bf16 %v6394_v1  ;;  %v6395_v46 = vunpack.i.l.bf16 %v6394_v1  ;;  %v3045_v1 = vsel %vm417_vm1, %v7169_v35, %v6386_v41  ;;  %v3796_v41 = vld [vmem:[#allocation3 + $0x198] sm:$0xff]  ;;  %v3797_v35 = vld [vmem:[#allocation3 + $0x1a0] sm:$0xff] }
 0x330   : > { %v3075_v16 = vsel %vm3052_vm9, %v3042_v62, %v6390_v30  ;;  %v3076_v25 = vsel %vm3052_vm9, %v3043_v28, %v6391_v22  ;;  %v6346_v22 = vunpack.i.h.bf16 %v9025_v52 }
 0x331   : > { %v9122_v56 = vpop.permute.xlu1 %6403  ;;  %v3077_v48 = vsel %vm3052_vm9, %v3044_v50, %v6395_v46  ;;  %v3078_v58 = vsel %vm3052_vm9, %v3045_v1, %v6396_v51  ;;  %v3851_v51 = vsel %vm2064_vm3, %v3848_v54, %v3850_v17  ;;  %v6497_v50 = vpack.i.bf16 %v3797_v35, %v3796_v41 }
 0x332   : > { %v6399_v33 = vpop.permute.xlu0 %6398  ;;  %v3110_v46 = vsel %vm3085_vm10, %v3077_v48, %v6110_v31  ;;  %v3111_v62 = vsel %vm3085_vm10, %v3078_v58, %v6111_v23  ;;  %v6487_v1 = vpack.i.bf16 %v3851_v51, %v3849_v57  ;;  %v3108_v10 = vsel %vm3085_vm10, %v3075_v16, %v6335_v32 }
 0x333   : > { %v6400_v45 = vunpack.i.l.bf16 %v6399_v33  ;;  %v6401_v40 = vunpack.i.h.bf16 %v6399_v33  ;;  %v6345_v33 = vunpack.i.l.bf16 %v9025_v52  ;;  %v3109_v54 = vsel %vm3085_vm10, %v3076_v25, %v6336_v38  ;;  %6498 = vrot.lane.b32.xlu1 %v6497_v50, %s7216_s23 }
 0x334   : > { %v6406_v17 = vunpack.i.h.bf16 %v9122_v56  ;;  %v3143_v42 = vsel %vm3118_vm11, %v3110_v46, %v6230_v24  ;;  %v3144_v23 = vsel %vm3118_vm11, %v3111_v62, %v6231_v37  ;;  %6488 = vrot.lane.b32.xlu0 %v6487_v1, %s7214_s21  ;;  %v6405_v38 = vunpack.i.l.bf16 %v9122_v56 }
 0x335   : > { %v9139_v20 = vpop.permute.xlu1 %6413  ;;  %v3139_v31 = vsel %vm3118_vm11, %v3106_v4, %v6400_v45  ;;  %v3140_v52 = vsel %vm3118_vm11, %v3107_v6, %v6401_v40  ;;  %v4023_v37 = vrot.slane %v9111_v7, 2  ;;  %v4024_v6 = vrot.slane %v9113_v59, 2 }
 0x336   : > { %v6409_v49 = vpop.permute.xlu0 %6408  ;;  %v3142_v16 = vsel %vm3118_vm11, %v3109_v54, %v6406_v17  ;;  %v6416_v45 = vunpack.i.h.bf16 %v9139_v20  ;;  %v6415_v41 = vunpack.i.l.bf16 %v9139_v20  ;;  %v4026_v7 = vrot.slane %v9115_v15, 2 }
 0x337   : > { %v6411_v44 = vunpack.i.h.bf16 %v6409_v49  ;;  %v6410_v30 = vunpack.i.l.bf16 %v6409_v49  ;;  %v4025_v57 = vsel %vm2241_vm4, %v4023_v37, %v4024_v6  ;;  %v3141_v50 = vsel %vm3118_vm11, %v3108_v10, %v6405_v38 }
 0x338   : > { %v6371_v37 = vunpack.i.h.bf16 %v9065_v11 }
 0x339   : > { %v3172_v48 = vsel %vm3151_vm12, %v3139_v31, %v6410_v30  ;;  %v6419_v58 = vpop.permute.xlu1 %6418  ;;  %v3173_v4 = vsel %vm3151_vm12, %v3140_v52, %v6411_v44 }
 0x33a   : > { %v6439_v32 = vpop.permute.xlu0 %6438  ;;  %v6421_v55 = vunpack.i.h.bf16 %v6419_v58  ;;  %v6420_v28 = vunpack.i.l.bf16 %v6419_v58  ;;  %v3205_v56 = vsel %vm3184_vm13, %v3172_v48, %v6345_v33  ;;  %v3206_v25 = vsel %vm3184_vm13, %v3173_v4, %v6346_v22 }
 0x33b   : > { %v6441_v24 = vunpack.i.h.bf16 %v6439_v32  ;;  %v6440_v19 = vunpack.i.l.bf16 %v6439_v32  ;;  %v3174_v48 = vsel %vm3151_vm12, %v3141_v50, %v6415_v41  ;;  %v3175_v58 = vsel %vm3151_vm12, %v3142_v16, %v6416_v45 }
 0x33c   : > { %v3237_v35 = vsel %vm3217_vm14, %v9107_v60, %v6421_v55  ;;  %v3236_v20 = vsel %vm3217_vm14, %v9118_v39, %v6420_v28  ;;  %v4027_v60 = vsel %vm2241_vm4, %v4024_v6, %v4026_v7  ;;  %v3176_v32 = vsel %vm3151_vm12, %v3143_v42, %v6240_v13 }
 0x33d   : > { %v6424_v40 = vpop.permute.xlu1 %6423  ;;  %v3238_v44 = vsel %vm3217_vm14, %v3205_v56, %v6440_v19  ;;  %v3239_v30 = vsel %vm3217_vm14, %v3206_v25, %v6441_v24  ;;  %v6492_v52 = vpack.i.bf16 %v4027_v60, %v4025_v57  ;;  %v3177_v4 = vsel %vm3151_vm12, %v3144_v23, %v6241_v26 }
 0x33e   : > { %v6444_v49 = vpop.permute.xlu0 %6443  ;;  %v6426_v59 = vunpack.i.h.bf16 %v6424_v40  ;;  %v6425_v51 = vunpack.i.l.bf16 %v6424_v40  ;;  %v6361_v24 = vunpack.i.h.bf16 %v9045_v63  ;;  %v6360_v19 = vunpack.i.l.bf16 %v9045_v63 }
 0x33f   : > { %v6446_v46 = vunpack.i.h.bf16 %v6444_v49  ;;  %v6445_v62 = vunpack.i.l.bf16 %v6444_v49  ;;  %6493 = vrot.lane.b32.xlu0 %v6492_v52, %s7215_s22  ;;  %v6370_v13 = vunpack.i.l.bf16 %v9065_v11  ;;  %v3207_v12 = vsel %vm3184_vm13, %v3174_v48, %v6120_v29 }
 0x340   : > { %v3269_v22 = vsel %vm3250_vm15, %v3236_v20, %v6425_v51  ;;  %v3270_v33 = vsel %vm3250_vm15, %v3237_v35, %v6426_v59  ;;  %v3208_v26 = vsel %vm3184_vm13, %v3175_v58, %v6121_v34  ;;  %v3209_v42 = vsel %vm3184_vm13, %v3176_v32, %v6125_v43  ;;  %v7173_v51 = vld [vmem:[#allocation2 + $0x170] sm:$0xff]  ;;  %v7174_v20 = vld [vmem:[#allocation2 + $0x168] sm:$0xff] }
 0x341   : > { %v3271_v1 = vsel %vm3250_vm15, %v3238_v44, %v6445_v62  ;;  %v3272_v15 = vsel %vm3250_vm15, %v3239_v30, %v6446_v46  ;;  %v6429_v54 = vpop.permute.xlu1 %6428  ;;  %v3292_v31 = vpack.c.bf16 %v3270_v33, %v3269_v22  ;;  %v3210_v63 = vsel %vm3184_vm13, %v3177_v4, %v6126_v21 }
 0x342   : > { %v6449_v17 = vpop.permute.xlu0 %6448  ;;  %v3293_v39 = vpack.c.bf16 %v3272_v15, %v3271_v1  ;;  %v6431_v55 = vunpack.i.h.bf16 %v6429_v54  ;;  %v6430_v28 = vunpack.i.l.bf16 %v6429_v54  ;;  %v3147_v25 = vsel %vm3118_vm11, %v9084_v27, %v6360_v19 }
 0x343   : > { %v6451_v10 = vunpack.i.h.bf16 %v6449_v17  ;;  %v6450_v38 = vunpack.i.l.bf16 %v6449_v17  ;;  %5764 = vmatmul.mubr.msk.bf16.gmra.mxu1 %vm3335_vm2, %v3292_v31  ;;  %v3148_v40 = vsel %vm3118_vm11, %v9087_v3, %v6361_v24  ;;  %v10566_v46 = vunpack.i.h.bf16 %v9003_v0 }
 0x344   : > { %5767 = vmatprep.mubr.msk.bf16.mxu1 %vm3335_vm2, %v3293_v39  ;;  %v3240_v29 = vsel %vm3217_vm14, %v3207_v12, %v6430_v28  ;;  %v3241_v5 = vsel %vm3217_vm14, %v3208_v26, %v6431_v55  ;;  %v10567_v44 = vunpack.i.l.bf16 %v9003_v0  ;;  %v3180_v60 = vsel %vm3151_vm12, %v3147_v25, %v6370_v13 }
 0x345   : > { %v6434_v23 = vpop.permute.xlu1 %6433  ;;  %v3242_v34 = vsel %vm3217_vm14, %v3209_v42, %v6450_v38  ;;  %v3243_v56 = vsel %vm3217_vm14, %v3210_v63, %v6451_v10  ;;  %v3051_v62 = vsel %vm417_vm1, %v7173_v51, %v10566_v46  ;;  %v3181_v27 = vsel %vm3151_vm12, %v3148_v40, %v6371_v37  ;;  %v9292_v46 = vld [vmem:[%s10492_s6] ss:$0 sm:$0xff] }
 0x346   : > { %v6459_v11 = vpop.permute.xlu0 %6458  ;;  %v6436_v6 = vunpack.i.h.bf16 %v6434_v23  ;;  %v6435_v16 = vunpack.i.l.bf16 %v6434_v23  ;;  %v3050_v30 = vsel %vm417_vm1, %v7174_v20, %v10567_v44  ;;  %v10568_v50 = vunpack.i.h.bf16 %v9023_v2 }
 0x347   : > { %v6461_v45 = vunpack.i.h.bf16 %v6459_v11  ;;  %v6460_v41 = vunpack.i.l.bf16 %v6459_v11  ;;  %v3083_v15 = vsel %vm3052_vm9, %v3050_v30, %v6355_v9  ;;  %v6366_v54 = vunpack.i.h.bf16 %v9043_v36 }
 0x348   : > { %v3273_v43 = vsel %vm3250_vm15, %v3240_v29, %v6435_v16  ;;  %v3274_v47 = vsel %vm3250_vm15, %v3241_v5, %v6436_v6  ;;  %v3084_v0 = vsel %vm3052_vm9, %v3051_v62, %v10568_v50  ;;  %v6365_v17 = vunpack.i.l.bf16 %v9043_v36  ;;  %v10573_v5 = vld [vmem:[#allocation4_spill] sm:$0xff] }
 0x349   : > { %v3275_v21 = vsel %vm3250_vm15, %v3242_v34, %v6460_v41  ;;  %v3276_v35 = vsel %vm3250_vm15, %v3243_v56, %v6461_v45  ;;  %v6454_v49 = vpop.permute.xlu1 %6453  ;;  %v3294_v7 = vpack.c.bf16 %v3274_v47, %v3273_v43  ;;  %v6376_v31 = vunpack.i.h.bf16 %v9063_v8 }
 0x34a   : > { %v6469_v57 = vpop.permute.xlu0 %6468  ;;  %v3295_v59 = vpack.c.bf16 %v3276_v35, %v3275_v21  ;;  %v6456_v22 = vunpack.i.h.bf16 %v6454_v49  ;;  %v6455_v3 = vunpack.i.l.bf16 %v6454_v49  ;;  %v6375_v39 = vunpack.i.l.bf16 %v9063_v8 }
 0x34b   : > { %v6471_v33 = vunpack.i.h.bf16 %v6469_v57  ;;  %v6470_v1 = vunpack.i.l.bf16 %v6469_v57  ;;  %5768 = vmatmul.mubr.msk.bf16.gmra.mxu1 %vm3335_vm2, %v3294_v7  ;;  %v10569_v52 = vunpack.i.l.bf16 %v8932_v14  ;;  %v10570_v9 = vunpack.i.h.bf16 %v8932_v14 }
 0x34c   : > { %5771 = vmatprep.mubr.msk.bf16.mxu1 %vm3335_vm2, %v3295_v59  ;;  %v3245_v10 = vsel %vm3217_vm14, %v9068_v61, %v6456_v22  ;;  %v3244_v8 = vsel %vm3217_vm14, %v9071_v18, %v6455_v3  ;;  %v10571_v12 = vunpack.i.l.bf16 %v8918_v53  ;;  %v10572_v61 = vunpack.i.h.bf16 %v8918_v53  ;;  %v9287_v59 = vld [vmem:[%s10491_s5] ss:$0 sm:$0xff] }
 0x34d   : > { %v3213_v48 = vsel %vm3184_vm13, %v3180_v60, %v10569_v52  ;;  %v3214_v2 = vsel %vm3184_vm13, %v3181_v27, %v10570_v9  ;;  %v6464_v58 = vpop.permute.xlu1 %6463  ;;  %v5851_v34 = vunpack.i.h.bf16 %v10573_v5  ;;  %v5850_v53 = vunpack.i.l.bf16 %v10573_v5 }
 0x34e   : > { %v6479_v32 = vpop.permute.xlu0 %6478  ;;  %v6466_v4 = vunpack.i.h.bf16 %v6464_v58  ;;  %v6465_v55 = vunpack.i.l.bf16 %v6464_v58  ;;  %v3246_v38 = vsel %vm3217_vm14, %v3213_v48, %v6470_v1  ;;  %v3247_v24 = vsel %vm3217_vm14, %v3214_v2, %v6471_v33 }
 0x34f   : > { %v6481_v28 = vunpack.i.h.bf16 %v6479_v32  ;;  %v6480_v36 = vunpack.i.l.bf16 %v6479_v32  ;;  %v3116_v26 = vsel %vm3085_vm10, %v3083_v15, %v10571_v12  ;;  %v3117_v18 = vsel %vm3085_vm10, %v3084_v0, %v10572_v61 }
 0x350   : > { %v3277_v14 = vsel %vm3250_vm15, %v3244_v8, %v6465_v55  ;;  %v3278_v19 = vsel %vm3250_vm15, %v3245_v10, %v6466_v4  ;;  %v3149_v11 = vsel %vm3118_vm11, %v3116_v26, %v6365_v17  ;;  %v3150_v6 = vsel %vm3118_vm11, %v3117_v18, %v6366_v54 }
 0x351   : > { %v3279_v37 = vsel %vm3250_vm15, %v3246_v38, %v6480_v36  ;;  %v3280_v13 = vsel %vm3250_vm15, %v3247_v24, %v6481_v28  ;;  %v3296_v63 = vpack.c.bf16 %v3278_v19, %v3277_v14  ;;  %v3182_v16 = vsel %vm3151_vm12, %v3149_v11, %v6375_v39 }
 0x352   : > { %v3297_v23 = vpack.c.bf16 %v3280_v13, %v3279_v37  ;;  %v3183_v45 = vsel %vm3151_vm12, %v3150_v6, %v6376_v31  ;;  %v3215_v43 = vsel %vm3184_vm13, %v3182_v16, %v5850_v53 }
 0x353   : > { %5772 = vmatmul.mubr.msk.bf16.gmra.mxu1 %vm3335_vm2, %v3296_v63  ;;  %v3216_v47 = vsel %vm3184_vm13, %v3183_v45, %v5851_v34 }
 0x354   : > { %v6474_v42 = vpop.permute.xlu1 %6473  ;;  %5775 = vmatprep.mubr.msk.bf16.mxu1 %vm3335_vm2, %v3297_v23 }
 0x355   : > { %v6476_v41 = vunpack.i.h.bf16 %v6474_v42  ;;  %v6475_v29 = vunpack.i.l.bf16 %v6474_v42 }
 0x357   : > { %v3249_v25 = vsel %vm3217_vm14, %v3216_v47, %v6476_v41  ;;  %v3248_v40 = vsel %vm3217_vm14, %v3215_v43, %v6475_v29 }
 0x35a   : > { %v6484_v56 = vpop.permute.xlu1 %6483 }
 0x35b   : > { %v6486_v21 = vunpack.i.h.bf16 %v6484_v56  ;;  %v6485_v35 = vunpack.i.l.bf16 %v6484_v56 }
 0x35d   : > { %v3281_v49 = vsel %vm3250_vm15, %v3248_v40, %v6485_v35  ;;  %v3282_v57 = vsel %vm3250_vm15, %v3249_v25, %v6486_v21 }
 0x35e   : > { %v3298_v7 = vpack.c.bf16 %v3282_v57, %v3281_v49 }
 0x360   : > { %5776 = vmatmul.mubr.msk.bf16.gmra.mxu1 %vm3335_vm2, %v3298_v7 }
 0x39c   : > { %v5749_v51 = vpop.f32.mrf.mxu1 }
 0x39d   : > { %v3557_v62 = vmul.f32 %v5749_v51, %v9287_v59 }
 0x39e   : > { %v3421_v20 = vpop.f32.mrf.mxu1 }
 0x39f   : > { %v3596_v44 = vadd.f32 %v9292_v46, %v3557_v62  ;;  %v3555_v30 = vmul.f32 %v9287_v59, %v3421_v20 }
 0x3a0   : > { %v5750_v60 = vpop.f32.mrf.mxu1 }
 0x3a1   : > { %v3628_v27 = vmax.f32 %v3596_v44, 0.0  ;;  %v3594_v22 = vadd.f32 %v9292_v46, %v3555_v30  ;;  %v3558_v3 = vmul.f32 %v5750_v60, %v9287_v59 }
 0x3a2   : > { %v3424_v33 = vpop.f32.mrf.mxu1 }
 0x3a3   : > { %3715 = vst.msk [vmem:[#allocation3 + $0x31] sm:$0xff] %vm417_vm1, %v3628_v27  ;;  %v3626_v1 = vmax.f32 %v3594_v22, 0.0  ;;  %v3597_v15 = vadd.f32 %v9292_v46, %v3558_v3  ;;  %v3556_v50 = vmul.f32 %v9287_v59, %v3424_v33 }
 0x3a5   : > { %3713 = vst.msk [vmem:[#allocation3 + $0x19] sm:$0xff] %vm417_vm1, %v3626_v1  ;;  %v3629_v54 = vmax.f32 %v3597_v15, 0.0  ;;  %v3595_v17 = vadd.f32 %v9292_v46, %v3556_v50 }
 0x3a7   : > { %v5753_v0 = vpop.f32.mrf.mxu1  ;;  %3716 = vst.msk [vmem:[#allocation3 + $0x39] sm:$0xff] %vm417_vm1, %v3629_v54  ;;  %v3627_v52 = vmax.f32 %v3595_v17, 0.0 }
 0x3a8   : > { %v3561_v31 = vmul.f32 %v5753_v0, %v9287_v59 }
 0x3a9   : > { %v3437_v39 = vpop.f32.mrf.mxu1  ;;  %3714 = vst.msk [vmem:[#allocation3 + $0x21] sm:$0xff] %vm417_vm1, %v3627_v52 }
 0x3aa   : > { %v3600_v48 = vadd.f32 %v9292_v46, %v3561_v31  ;;  %v3559_v9 = vmul.f32 %v9287_v59, %v3437_v39  ;;  %v3751_v19 = vld [vmem:[#allocation3 + $0x30] sm:$0xff] }
 0x3ab   : > { %v5754_v2 = vpop.f32.mrf.mxu1  ;;  %v3857_v6 = vrot.slane %v3751_v19, 1  ;;  %v4033_v49 = vrot.slane %v3751_v19, 2 }
 0x3ac   : > { %v3632_v58 = vmax.f32 %v3600_v48, 0.0  ;;  %v3598_v32 = vadd.f32 %v9292_v46, %v3559_v9  ;;  %v3562_v4 = vmul.f32 %v5754_v2, %v9287_v59  ;;  %v9320_v23 = vld [vmem:[#allocation3 + $0x18] sm:$0xff] }
 0x3ad   : > { %v3440_v55 = vpop.f32.mrf.mxu1  ;;  %v3852_v3 = vrot.slane %v9320_v23, 1  ;;  %v4028_v0 = vrot.slane %v9320_v23, 2 }
 0x3ae   : > { %3719 = vst.msk [vmem:[#allocation3 + $0x61] sm:$0xff] %vm417_vm1, %v3632_v58  ;;  %v3630_v28 = vmax.f32 %v3598_v32, 0.0  ;;  %v3601_v36 = vadd.f32 %v9292_v46, %v3562_v4  ;;  %v3560_v10 = vmul.f32 %v9287_v59, %v3440_v55  ;;  %v3752_v13 = vld [vmem:[#allocation3 + $0x38] sm:$0xff]  ;;  %v3753_v12 = vld [vmem:[#allocation3 + $0x40] sm:$0x3] }
 0x3af   : > { %v5757_v8 = vpop.f32.mrf.mxu1  ;;  %v6502_v42 = vpack.i.bf16 %v3752_v13, %v3751_v19  ;;  %v3858_v16 = vrot.slane %v3752_v13, 1  ;;  %v3860_v45 = vrot.slane %v3753_v12, 1  ;;  %v4034_v47 = vrot.slane %v3752_v13, 2 }
 0x3b0   : > { %3717 = vst.msk [vmem:[#allocation3 + $0x49] sm:$0xff] %vm417_vm1, %v3630_v28  ;;  %v3633_v38 = vmax.f32 %v3601_v36, 0.0  ;;  %v3599_v24 = vadd.f32 %v9292_v46, %v3560_v10  ;;  %v3565_v14 = vmul.f32 %v5757_v8, %v9287_v59  ;;  %v9322_v11 = vld [vmem:[#allocation3 + $0x20] sm:$0xff]  ;;  %v4036_v21 = vrot.slane %v3753_v12, 2  ;;  %v3750_v62 = vld [vmem:[#allocation3 + $0x28] sm:$0x3] }
 0x3b1   : > { %v3453_v37 = vpop.f32.mrf.mxu1  ;;  %6503 = vrot.lane.b32.xlu1 %v6502_v42, %s7223_s16  ;;  %v6512_v34 = vpack.i.bf16 %v9322_v11, %v9320_v23  ;;  %v3859_v56 = vsel %vm2064_vm3, %v3857_v6, %v3858_v16  ;;  %v3861_v43 = vsel %vm2064_vm3, %v3858_v16, %v3860_v45  ;;  %v4035_v20 = vsel %vm2241_vm4, %v4033_v49, %v4034_v47  ;;  %v7136_v36 = vld [vmem:[%s10493_s7 + $0x20] ss:$0 sps:$4 sm:$0xff]   ;;  %v7139_v45 = vld [vmem:[%s10493_s7 + $0x8] sm:$0xff]  }
 0x3b2   : > { %3720 = vst.msk [vmem:[#allocation3 + $0x69] sm:$0xff] %vm417_vm1, %v3633_v38  ;;  %v3631_v26 = vmax.f32 %v3599_v24, 0.0  ;;  %v3604_v61 = vadd.f32 %v9292_v46, %v3565_v14  ;;  %v3563_v18 = vmul.f32 %v9287_v59, %v3453_v37  ;;  %v6517_v51 = vpack.i.bf16 %v3861_v43, %v3859_v56  ;;  %5823 = vmatprep.subr.msk.bf16.mxu0 %vm430_vm0, %v7136_v36  ;;  %v7137_v14 = vld [vmem:[%s10493_s7 + $0x18] sm:$0xff]  }
 0x3b3   : > { %v5758_v63 = vpop.f32.mrf.mxu1  ;;  %6513 = vrot.lane.b32.xlu0 %v6512_v34, %s7223_s16  ;;  %v4037_v44 = vsel %vm2241_vm4, %v4034_v47, %v4036_v21  ;;  %v3853_v60 = vrot.slane %v9322_v11, 1  ;;  %v3855_v27 = vrot.slane %v3750_v62, 1  ;;  %v4029_v15 = vrot.slane %v9322_v11, 2 }
 0x3b4   : > { %3718 = vst.msk [vmem:[#allocation3 + $0x51] sm:$0xff] %vm417_vm1, %v3631_v26  ;;  %v3636_v41 = vmax.f32 %v3604_v61, 0.0  ;;  %v3602_v29 = vadd.f32 %v9292_v46, %v3563_v18  ;;  %v3566_v5 = vmul.f32 %v5758_v63, %v9287_v59  ;;  %v6522_v22 = vpack.i.bf16 %v4037_v44, %v4035_v20  ;;  %v7138_v61 = vld [vmem:[%s10493_s7 + $0x10] sm:$0xff]  }
 0x3b5   : > { %v3456_v53 = vpop.f32.mrf.mxu1  ;;  %6508 = vrot.lane.b32.xlu1 %v6502_v42, %s7216_s23  ;;  %v3854_v33 = vsel %vm2064_vm3, %v3852_v3, %v3853_v60  ;;  %v3856_v1 = vsel %vm2064_vm3, %v3853_v60, %v3855_v27  ;;  %v4031_v50 = vrot.slane %v3750_v62, 2  ;;  %v4030_v17 = vsel %vm2241_vm4, %v4028_v0, %v4029_v15  ;;  %v3757_v32 = vld [vmem:[#allocation3 + $0x60] sm:$0xff] }
 0x3b6   : > { %3723 = vst.msk [vmem:[#allocation3 + $0x91] sm:$0xff] %vm417_vm1, %v3636_v41  ;;  %v3634_v35 = vmax.f32 %v3602_v29, 0.0  ;;  %v3605_v25 = vadd.f32 %v9292_v46, %v3566_v5  ;;  %v3564_v40 = vmul.f32 %v9287_v59, %v3456_v53  ;;  %v6547_v54 = vpack.i.bf16 %v3856_v1, %v3854_v33 }
 0x3b7   : > { %6518 = vrot.lane.b32.xlu0 %v6517_v51, %s7214_s21  ;;  %v4032_v31 = vsel %vm2241_vm4, %v4029_v15, %v4031_v50  ;;  %v9360_v2 = vld [vmem:[#allocation3 + $0x48] sm:$0xff]  ;;  %v3867_v28 = vrot.slane %v3757_v32, 1  ;;  %v4043_v19 = vrot.slane %v3757_v32, 2  ;;  %v5158_v37 = vsel %vm430_vm0, %v7136_v36, 0 }
 0x3b8   : > { %3721 = vst.msk [vmem:[#allocation3 + $0x79] sm:$0xff] %vm417_vm1, %v3634_v35  ;;  %v3637_v57 = vmax.f32 %v3605_v25, 0.0  ;;  %v3603_v7 = vadd.f32 %v9292_v46, %v3564_v40  ;;  %v6552_v52 = vpack.i.bf16 %v4032_v31, %v4030_v17  ;;  %5780 = vmatpush3.bf16.msra.mxu0 %v5158_v37  ;;  %v3862_v43 = vrot.slane %v9360_v2, 1 }
 0x3b9   : > { %6538 = vrot.lane.b32.xlu1 %v6517_v51, %s7226_s19  ;;  %v3758_v48 = vld [vmem:[#allocation3 + $0x68] sm:$0xff]  ;;  %v3759_v9 = vld [vmem:[#allocation3 + $0x70] sm:$0x3]  ;;  %5781 = vmatprep.subr.bf16.mxu0 %v7137_v14  ;;  %v4038_v27 = vrot.slane %v9360_v2, 2 }
 0x3ba   : > { %3724 = vst.msk [vmem:[#allocation3 + $0x99] sm:$0xff] %vm417_vm1, %v3637_v57  ;;  %v3635_v30 = vmax.f32 %v3603_v7, 0.0  ;;  %v3868_v4 = vrot.slane %v3758_v48, 1  ;;  %v3870_v55 = vrot.slane %v3759_v9, 1  ;;  %v4044_v38 = vrot.slane %v3758_v48, 2  ;;  %v7140_v7 = vld [vmem:[%s10493_s7] sm:$0xff]  }
 0x3bb   : > { %6523 = vrot.lane.b32.xlu0 %v6522_v22, %s7215_s22  ;;  %v9357_v39 = vld [vmem:[#allocation3 + $0x50] sm:$0xff]  ;;  %v4046_v24 = vrot.slane %v3759_v9, 2  ;;  %v6567_v18 = vpack.i.bf16 %v3758_v48, %v3757_v32  ;;  %v3756_v6 = vld [vmem:[#allocation3 + $0x58] sm:$0x3] }
 0x3bc   : > { %3722 = vst.msk [vmem:[#allocation3 + $0x81] sm:$0xff] %vm417_vm1, %v3635_v30  ;;  %v6577_v58 = vpack.i.bf16 %v9357_v39, %v9360_v2  ;;  %v3869_v10 = vsel %vm2064_vm3, %v3867_v28, %v3868_v4  ;;  %v3871_v8 = vsel %vm2064_vm3, %v3868_v4, %v3870_v55  ;;  %v4045_v12 = vsel %vm2241_vm4, %v4043_v19, %v4044_v38 }
 0x3bd   : > { %6543 = vrot.lane.b32.xlu1 %v6522_v22, %s7227_s20  ;;  %v6587_v13 = vpack.i.bf16 %v3871_v8, %v3869_v10  ;;  %v4047_v26 = vsel %vm2241_vm4, %v4044_v38, %v4046_v24  ;;  %5782 = vmatpush3.bf16.msra.mxu0 %v7137_v14  ;;  %v3863_v29 = vrot.slane %v9357_v39, 1  ;;  %v3865_v53 = vrot.slane %v3756_v6, 1 }
 0x3be   : > { %v6592_v42 = vpack.i.bf16 %v4047_v26, %v4045_v12  ;;  %5783 = vmatprep.subr.bf16.mxu0 %v7138_v61  ;;  %v4039_v49 = vrot.slane %v9357_v39, 2  ;;  %v4041_v57 = vrot.slane %v3756_v6, 2  ;;  %v3763_v39 = vld [vmem:[#allocation3 + $0x90] sm:$0xff] }
 0x3bf   : > { %6528 = vrot.lane.b32.xlu0 %v6517_v51, %s7224_s17  ;;  %v3864_v40 = vsel %vm2064_vm3, %v3862_v43, %v3863_v29  ;;  %v3866_v44 = vsel %vm2064_vm3, %v3863_v29, %v3865_v53  ;;  %v3760_v17 = vld [vmem:[#allocation3 + $0x78] sm:$0xff]  ;;  %v3877_v9 = vrot.slane %v3763_v39, 1  ;;  %v4053_v55 = vrot.slane %v3763_v39, 2 }
 0x3c0   : > { %v4040_v33 = vsel %vm2241_vm4, %v4038_v27, %v4039_v49  ;;  %v4042_v1 = vsel %vm2241_vm4, %v4039_v49, %v4041_v57  ;;  %v3872_v37 = vrot.slane %v3760_v17, 1 }
 0x3c1   : > { %6548 = vrot.lane.b32.xlu1 %v6547_v54, %s7214_s21  ;;  %5784 = vmatpush3.bf16.msra.mxu0 %v7138_v61  ;;  %v6632_v15 = vpack.i.bf16 %v4042_v1, %v4040_v33  ;;  %v3764_v0 = vld [vmem:[#allocation3 + $0x98] sm:$0xff] }
 0x3c2   : > { %5785 = vmatprep.subr.bf16.mxu0 %v7139_v45  ;;  %v4054_v32 = vrot.slane %v3764_v0, 2  ;;  %v6647_v8 = vpack.i.bf16 %v3764_v0, %v3763_v39 }
 0x3c3   : > { %6533 = vrot.lane.b32.xlu0 %v6522_v22, %s7225_s18  ;;  %v6627_v22 = vpack.i.bf16 %v3866_v44, %v3864_v40  ;;  %v3761_v50 = vld [vmem:[#allocation3 + $0x80] sm:$0xff]  ;;  %v3762_v24 = vld [vmem:[#allocation3 + $0x88] sm:$0x3] }
 0x3c4   : > { %v6657_v31 = vpack.i.bf16 %v3761_v50, %v3760_v17  ;;  %v4055_v36 = vsel %vm2241_vm4, %v4053_v55, %v4054_v32  ;;  %v3873_v14 = vrot.slane %v3761_v50, 1  ;;  %v3875_v19 = vrot.slane %v3762_v24, 1 }
 0x3c5   : > { %6553 = vrot.lane.b32.xlu1 %v6552_v52, %s7215_s22  ;;  %5786 = vmatpush3.bf16.msra.mxu0 %v7139_v45  ;;  %v4049_v26 = vrot.slane %v3761_v50, 2  ;;  %v4051_v61 = vrot.slane %v3762_v24, 2 }
 0x3c6   : > { %5787 = vmatprep.subr.bf16.mxu0 %v7140_v7  ;;  %v3876_v12 = vsel %vm2064_vm3, %v3873_v14, %v3875_v19 }
 0x3c7   : > { %6578 = vrot.lane.b32.xlu0 %v6577_v58, %s7223_s16  ;;  %v4052_v6 = vsel %vm2241_vm4, %v4049_v26, %v4051_v61 }
 0x3c9   : > { %6558 = vrot.lane.b32.xlu1 %v6547_v54, %s7224_s17  ;;  %5788 = vmatpush3.bf16.msra.mxu0 %v7140_v7  ;;  %v3765_v54 = vld [vmem:[#allocation3 + $0xa0] sm:$0x3] }
 0x3ca   : > { %v3880_v48 = vrot.slane %v3765_v54, 1  ;;  %v4056_v4 = vrot.slane %v3765_v54, 2 }
 0x3cb   : > { %6583 = vrot.lane.b32.xlu0 %v6577_v58, %s7216_s23 }
 0x3cc   : > { %v4057_v10 = vsel %vm2241_vm4, %v4054_v32, %v4056_v4 }
 0x3cd   : > { %6563 = vrot.lane.b32.xlu1 %v6552_v52, %s7225_s18  ;;  %v3878_v52 = vrot.slane %v3764_v0, 1  ;;  %v6672_v38 = vpack.i.bf16 %v4057_v10, %v4055_v36 }
 0x3cf   : > { %6588 = vrot.lane.b32.xlu0 %v6587_v13, %s7214_s21  ;;  %v3879_v2 = vsel %vm2064_vm3, %v3877_v9, %v3878_v52  ;;  %v3881_v58 = vsel %vm2064_vm3, %v3878_v52, %v3880_v48 }
 0x3d0   : > { %v6667_v28 = vpack.i.bf16 %v3881_v58, %v3879_v2 }
 0x3d1   : > { %6568 = vrot.lane.b32.xlu1 %v6567_v18, %s7223_s16 }
 0x3d3   : > { %6593 = vrot.lane.b32.xlu0 %v6592_v42, %s7215_s22  ;;  %v5761_v63 = vpop.f32.mrf.mxu1 }
 0x3d4   : > { %v3569_v16 = vmul.f32 %v5761_v63, %v9287_v59 }
 0x3d5   : > { %6573 = vrot.lane.b32.xlu1 %v6567_v18, %s7216_s23  ;;  %v3469_v41 = vpop.f32.mrf.mxu1  ;;  %v4048_v18 = vrot.slane %v3760_v17, 2 }
 0x3d6   : > { %v3608_v5 = vadd.f32 %v9292_v46, %v3569_v16  ;;  %v3567_v34 = vmul.f32 %v9287_v59, %v3469_v41 }
 0x3d7   : > { %6598 = vrot.lane.b32.xlu0 %v6587_v13, %s7224_s17  ;;  %v5762_v56 = vpop.f32.mrf.mxu1  ;;  %v4050_v63 = vsel %vm2241_vm4, %v4048_v18, %v4049_v26 }
 0x3d8   : > { %v3640_v47 = vmax.f32 %v3608_v5, 0.0  ;;  %v3606_v21 = vadd.f32 %v9292_v46, %v3567_v34  ;;  %v3570_v35 = vmul.f32 %v5762_v56, %v9287_v59  ;;  %v6712_v16 = vpack.i.bf16 %v4052_v6, %v4050_v63 }
 0x3d9   : > { %6608 = vrot.lane.b32.xlu1 %v6587_v13, %s7226_s19  ;;  %v3472_v25 = vpop.f32.mrf.mxu1  ;;  %v3874_v13 = vsel %vm2064_vm3, %v3872_v37, %v3873_v14 }
 0x3da   : > { %3727 = vst.msk [vmem:[#allocation3 + $0xc1] sm:$0xff] %vm417_vm1, %v3640_v47  ;;  %v3638_v51 = vmax.f32 %v3606_v21, 0.0  ;;  %v3609_v62 = vadd.f32 %v9292_v46, %v3570_v35  ;;  %v3568_v20 = vmul.f32 %v9287_v59, %v3472_v25 }
 0x3db   : > { %6603 = vrot.lane.b32.xlu0 %v6592_v42, %s7225_s18 }
 0x3dc   : > { %3725 = vst.msk [vmem:[#allocation3 + $0xa9] sm:$0xff] %vm417_vm1, %v3638_v51  ;;  %v3641_v30 = vmax.f32 %v3609_v62, 0.0  ;;  %v3607_v60 = vadd.f32 %v9292_v46, %v3568_v20 }
 0x3dd   : > { %6613 = vrot.lane.b32.xlu1 %v6592_v42, %s7227_s20  ;;  %v6707_v42 = vpack.i.bf16 %v3876_v12, %v3874_v13 }
 0x3de   : > { %3728 = vst.msk [vmem:[#allocation3 + $0xc9] sm:$0xff] %vm417_vm1, %v3641_v30  ;;  %v3639_v3 = vmax.f32 %v3607_v60, 0.0 }
 0x3df   : > { %6628 = vrot.lane.b32.xlu0 %v6627_v22, %s7226_s19 }
 0x3e0   : > { %3726 = vst.msk [vmem:[#allocation3 + $0xb1] sm:$0xff] %vm417_vm1, %v3639_v3 }
 0x3e1   : > { %6618 = vrot.lane.b32.xlu1 %v6627_v22, %s7214_s21  ;;  %v3769_v56 = vld [vmem:[#allocation3 + $0xc0] sm:$0xff] }
 0x3e2   : > { %v3887_v57 = vrot.slane %v3769_v56, 1 }
 0x3e3   : > { %6633 = vrot.lane.b32.xlu0 %v6632_v15, %s7227_s20  ;;  %v9448_v53 = vld [vmem:[#allocation3 + $0xa8] sm:$0xff] }
 0x3e5   : > { %6623 = vrot.lane.b32.xlu1 %v6632_v15, %s7215_s22  ;;  %v3770_v41 = vld [vmem:[#allocation3 + $0xc8] sm:$0xff]  ;;  %v3771_v5 = vld [vmem:[#allocation3 + $0xd0] sm:$0x3] }
 0x3e6   : > { %v3888_v21 = vrot.slane %v3770_v41, 1  ;;  %v3890_v40 = vrot.slane %v3771_v5, 1  ;;  %v4064_v30 = vrot.slane %v3770_v41, 2  ;;  %v4066_v60 = vrot.slane %v3771_v5, 2 }
 0x3e7   : > { %6658 = vrot.lane.b32.xlu0 %v6657_v31, %s7223_s16  ;;  %v9444_v45 = vld [vmem:[#allocation3 + $0xb0] sm:$0xff]  ;;  %v6727_v32 = vpack.i.bf16 %v3770_v41, %v3769_v56  ;;  %v3768_v19 = vld [vmem:[#allocation3 + $0xb8] sm:$0x3]  ;;  %v3882_v41 = vrot.slane %v9448_v53, 1 }
 0x3e8   : > { %v6737_v47 = vpack.i.bf16 %v9444_v45, %v9448_v53  ;;  %v3889_v44 = vsel %vm2064_vm3, %v3887_v57, %v3888_v21  ;;  %v3891_v33 = vsel %vm2064_vm3, %v3888_v21, %v3890_v40  ;;  %v4067_v2 = vsel %vm2241_vm4, %v4064_v30, %v4066_v60  ;;  %v9503_v57 = vpop.permute.xlu0 %6488 }
 0x3e9   : > { %6638 = vrot.lane.b32.xlu1 %v6627_v22, %s7224_s17  ;;  %v3883_v61 = vrot.slane %v9444_v45, 1  ;;  %v3885_v6 = vrot.slane %v3768_v19, 1  ;;  %v4061_v21 = vrot.slane %v3768_v19, 2 }
 0x3eb   : > { %6663 = vrot.lane.b32.xlu0 %v6657_v31, %s7216_s23  ;;  %v6747_v31 = vpack.i.bf16 %v3891_v33, %v3889_v44 }
 0x3ed   : > { %6643 = vrot.lane.b32.xlu1 %v6632_v15, %s7225_s18  ;;  %v4063_v15 = vrot.slane %v3769_v56, 2 }
 0x3ef   : > { %6668 = vrot.lane.b32.xlu0 %v6667_v28, %s7214_s21  ;;  %v4065_v39 = vsel %vm2241_vm4, %v4063_v15, %v4064_v30  ;;  %v9511_v30 = vpop.permute.xlu1 %6498 }
 0x3f0   : > { %v6752_v10 = vpack.i.bf16 %v4067_v2, %v4065_v39 }
 0x3f1   : > { %6648 = vrot.lane.b32.xlu1 %v6647_v8, %s7223_s16 }
 0x3f3   : > { %6673 = vrot.lane.b32.xlu0 %v6672_v38, %s7215_s22 }
 0x3f5   : > { %6653 = vrot.lane.b32.xlu1 %v6647_v8, %s7216_s23 }
 0x3f7   : > { %6678 = vrot.lane.b32.xlu0 %v6667_v28, %s7224_s17 }
 0x3f9   : > { %6688 = vrot.lane.b32.xlu1 %v6667_v28, %s7226_s19 }
 0x3fb   : > { %6683 = vrot.lane.b32.xlu0 %v6672_v38, %s7225_s18 }
 0x3fd   : > { %6693 = vrot.lane.b32.xlu1 %v6672_v38, %s7227_s20 }
 0x3ff   : > { %6708 = vrot.lane.b32.xlu0 %v6707_v42, %s7226_s19 }
 0x401   : > { %6698 = vrot.lane.b32.xlu1 %v6707_v42, %s7214_s21 }
 0x403   : > { %6713 = vrot.lane.b32.xlu0 %v6712_v16, %s7227_s20  ;;  %v5765_v29 = vpop.f32.mrf.mxu1 }
 0x404   : > { %v3573_v34 = vmul.f32 %v5765_v29, %v9287_v59 }
 0x405   : > { %6703 = vrot.lane.b32.xlu1 %v6712_v16, %s7215_s22  ;;  %v3485_v43 = vpop.f32.mrf.mxu1 }
 0x406   : > { %v3612_v35 = vadd.f32 %v9292_v46, %v3573_v34  ;;  %v3571_v25 = vmul.f32 %v9287_v59, %v3485_v43  ;;  %v3884_v43 = vsel %vm2064_vm3, %v3882_v41, %v3883_v61 }
 0x407   : > { %6738 = vrot.lane.b32.xlu0 %v6737_v47, %s7223_s16  ;;  %v5766_v49 = vpop.f32.mrf.mxu1 }
 0x408   : > { %v3644_v7 = vmax.f32 %v3612_v35, 0.0  ;;  %v3610_v51 = vadd.f32 %v9292_v46, %v3571_v25  ;;  %v3574_v62 = vmul.f32 %v5766_v49, %v9287_v59  ;;  %v3886_v49 = vsel %vm2064_vm3, %v3883_v61, %v3885_v6 }
 0x409   : > { %6718 = vrot.lane.b32.xlu1 %v6707_v42, %s7224_s17  ;;  %v3488_v20 = vpop.f32.mrf.mxu1  ;;  %v6787_v60 = vpack.i.bf16 %v3886_v49, %v3884_v43 }
 0x40a   : > { %3731 = vst.msk [vmem:[#allocation3 + $0xf1] sm:$0xff] %vm417_vm1, %v3644_v7  ;;  %v3642_v27 = vmax.f32 %v3610_v51, 0.0  ;;  %v3613_v22 = vadd.f32 %v9292_v46, %v3574_v62  ;;  %v3572_v3 = vmul.f32 %v9287_v59, %v3488_v20  ;;  %v4058_v51 = vrot.slane %v9448_v53, 2 }
 0x40b   : > { %6743 = vrot.lane.b32.xlu0 %v6737_v47, %s7216_s23  ;;  %v5769_v1 = vpop.f32.mrf.mxu1  ;;  %v4059_v47 = vrot.slane %v9444_v45, 2 }
 0x40c   : > { %3729 = vst.msk [vmem:[#allocation3 + $0xd9] sm:$0xff] %vm417_vm1, %v3642_v27  ;;  %v3645_v50 = vmax.f32 %v3613_v22, 0.0  ;;  %v3611_v0 = vadd.f32 %v9292_v46, %v3572_v3  ;;  %v3577_v54 = vmul.f32 %v5769_v1, %v9287_v59 }
 0x40d   : > { %6723 = vrot.lane.b32.xlu1 %v6712_v16, %s7225_s18  ;;  %v3501_v17 = vpop.f32.mrf.mxu1  ;;  %v4060_v27 = vsel %vm2241_vm4, %v4058_v51, %v4059_v47  ;;  %v4062_v33 = vsel %vm2241_vm4, %v4059_v47, %v4061_v21  ;;  %v6491_v21 = vunpack.i.h.bf16 %v9503_v57 }
 0x40e   : > { %3732 = vst.msk [vmem:[#allocation3 + $0xf9] sm:$0xff] %vm417_vm1, %v3645_v50  ;;  %v3643_v52 = vmax.f32 %v3611_v0, 0.0  ;;  %v3616_v48 = vadd.f32 %v9292_v46, %v3577_v54  ;;  %v3575_v9 = vmul.f32 %v9287_v59, %v3501_v17  ;;  %v9522_v54 = vpop.permute.xlu0 %6493 }
 0x40f   : > { %6748 = vrot.lane.b32.xlu0 %v6747_v31, %s7214_s21  ;;  %v5770_v58 = vpop.f32.mrf.mxu1 }
 0x410   : > { %3730 = vst.msk [vmem:[#allocation3 + $0xe1] sm:$0xff] %vm417_vm1, %v3643_v52  ;;  %v3648_v4 = vmax.f32 %v3616_v48, 0.0  ;;  %v3614_v55 = vadd.f32 %v9292_v46, %v3575_v9  ;;  %v3578_v28 = vmul.f32 %v5770_v58, %v9287_v59 }
 0x411   : > { %6728 = vrot.lane.b32.xlu1 %v6727_v32, %s7223_s16  ;;  %v3504_v36 = vpop.f32.mrf.mxu1 }
 0x412   : > { %3735 = vst.msk [vmem:[#allocation3 + $0x121] sm:$0xff] %vm417_vm1, %v3648_v4  ;;  %v3646_v8 = vmax.f32 %v3614_v55, 0.0  ;;  %v3617_v38 = vadd.f32 %v9292_v46, %v3578_v28  ;;  %v3576_v24 = vmul.f32 %v9287_v59, %v3504_v36 }
 0x413   : > { %6753 = vrot.lane.b32.xlu0 %v6752_v10, %s7215_s22  ;;  %v5773_v14 = vpop.f32.mrf.mxu1  ;;  %v9535_v28 = vld [vmem:[#allocation3 + $0xd8] sm:$0xff] }
 0x414   : > { %3733 = vst.msk [vmem:[#allocation3 + $0x109] sm:$0xff] %vm417_vm1, %v3646_v8  ;;  %v3649_v37 = vmax.f32 %v3617_v38, 0.0  ;;  %v3615_v13 = vadd.f32 %v9292_v46, %v3576_v24  ;;  %v3581_v12 = vmul.f32 %v5773_v14, %v9287_v59 }
 0x415   : > { %6733 = vrot.lane.b32.xlu1 %v6727_v32, %s7216_s23  ;;  %v3517_v26 = vpop.f32.mrf.mxu1  ;;  %v3776_v58 = vld [vmem:[#allocation3 + $0xf8] sm:$0xff]  ;;  %v3777_v32 = vld [vmem:[#allocation3 + $0x100] sm:$0x3] }
 0x416   : > { %3736 = vst.msk [vmem:[#allocation3 + $0x129] sm:$0xff] %vm417_vm1, %v3649_v37  ;;  %v3647_v18 = vmax.f32 %v3615_v13, 0.0  ;;  %v3620_v42 = vadd.f32 %v9292_v46, %v3581_v12  ;;  %v3579_v63 = vmul.f32 %v9287_v59, %v3517_v26  ;;  %v3898_v38 = vrot.slane %v3776_v58, 1 }
 0x417   : > { %6758 = vrot.lane.b32.xlu0 %v6747_v31, %s7224_s17  ;;  %v5774_v16 = vpop.f32.mrf.mxu1  ;;  %v9528_v9 = vld [vmem:[#allocation3 + $0xe0] sm:$0xff]  ;;  %v3900_v24 = vrot.slane %v3777_v32, 1  ;;  %v4074_v12 = vrot.slane %v3776_v58, 2  ;;  %v4076_v26 = vrot.slane %v3777_v32, 2  ;;  %v3774_v43 = vld [vmem:[#allocation3 + $0xe8] sm:$0x3] }
 0x418   : > { %3734 = vst.msk [vmem:[#allocation3 + $0x111] sm:$0xff] %vm417_vm1, %v3647_v18  ;;  %v3652_v29 = vmax.f32 %v3620_v42, 0.0  ;;  %v3618_v5 = vadd.f32 %v9292_v46, %v3579_v63  ;;  %v3582_v34 = vmul.f32 %v5774_v16, %v9287_v59  ;;  %v4069_v51 = vrot.slane %v9528_v9, 2 }
 0x419   : > { %6768 = vrot.lane.b32.xlu1 %v6747_v31, %s7226_s19  ;;  %v3520_v56 = vpop.f32.mrf.mxu1  ;;  %v6792_v31 = vpack.i.bf16 %v4062_v33, %v4060_v27  ;;  %v3901_v13 = vsel %vm2064_vm3, %v3898_v38, %v3900_v24  ;;  %v4077_v16 = vsel %vm2241_vm4, %v4074_v12, %v4076_v26  ;;  %v4068_v27 = vrot.slane %v9535_v28, 2 }
 0x41a   : > { %3739 = vst.msk [vmem:[#allocation3 + $0x151] sm:$0xff] %vm417_vm1, %v3652_v29  ;;  %v3650_v35 = vmax.f32 %v3618_v5, 0.0  ;;  %v3621_v25 = vadd.f32 %v9292_v46, %v3582_v34  ;;  %v3580_v40 = vmul.f32 %v9287_v59, %v3520_v56  ;;  %v6495_v33 = vunpack.i.l.bf16 %v9522_v54 }
 0x41b   : > { %6763 = vrot.lane.b32.xlu0 %v6752_v10, %s7225_s18 }
 0x41c   : > { %3737 = vst.msk [vmem:[#allocation3 + $0x139] sm:$0xff] %vm417_vm1, %v3650_v35  ;;  %v3653_v45 = vmax.f32 %v3621_v25, 0.0  ;;  %v3619_v62 = vadd.f32 %v9292_v46, %v3580_v40  ;;  %v3893_v35 = vrot.slane %v9528_v9, 1  ;;  %v3895_v25 = vrot.slane %v3774_v43, 1 }
 0x41d   : > { %6773 = vrot.lane.b32.xlu1 %v6752_v10, %s7227_s20  ;;  %v3775_v10 = vld [vmem:[#allocation3 + $0xf0] sm:$0xff]  ;;  %v6490_v40 = vunpack.i.l.bf16 %v9503_v57 }
 0x41e   : > { %3740 = vst.msk [vmem:[#allocation3 + $0x159] sm:$0xff] %vm417_vm1, %v3653_v45  ;;  %v3651_v22 = vmax.f32 %v3619_v62, 0.0  ;;  %v4073_v18 = vrot.slane %v3775_v10, 2  ;;  %v6807_v29 = vpack.i.bf16 %v3776_v58, %v3775_v10  ;;  %v4071_v45 = vrot.slane %v3774_v43, 2  ;;  %v9626_v43 = vld [vmem:[#allocation3 + $0x108] sm:$0xff] }
 0x41f   : > { %6788 = vrot.lane.b32.xlu0 %v6787_v60, %s7226_s19  ;;  %v3896_v57 = vsel %vm2064_vm3, %v3893_v35, %v3895_v25 }
 0x420   : > { %v5777_v7 = vpop.f32.mrf.mxu1  ;;  %3738 = vst.msk [vmem:[#allocation3 + $0x141] sm:$0xff] %vm417_vm1, %v3651_v22  ;;  %v4075_v6 = vsel %vm2241_vm4, %v4073_v18, %v4074_v12  ;;  %v7176_v22 = vld [vmem:[#allocation3] sm:$0xff] }
 0x421   : > { %v3585_v20 = vmul.f32 %v5777_v7, %v9287_v59  ;;  %6778 = vrot.lane.b32.xlu1 %v6787_v60, %s7214_s21  ;;  %v6832_v34 = vpack.i.bf16 %v4077_v16, %v4075_v6  ;;  %v3892_v7 = vrot.slane %v9535_v28, 1  ;;  %v3782_v6 = vld [vmem:[#allocation3 + $0x128] sm:$0xff]  ;;  %v3783_v16 = vld [vmem:[#allocation3 + $0x130] sm:$0x3] }
 0x422   : > { %v3533_v44 = vpop.f32.mrf.mxu1 }
 0x423   : > { %v3624_v53 = vadd.f32 %v9292_v46, %v3585_v20  ;;  %v3583_v3 = vmul.f32 %v9287_v59, %v3533_v44  ;;  %v9530_v2 = vpop.permute.xlu1 %6503  ;;  %6793 = vrot.lane.b32.xlu0 %v6792_v31, %s7227_s20  ;;  %v7175_v20 = vld [vmem:[#allocation3 + $0x8] sm:$0xff] }
 0x424   : > { %v5778_v1 = vpop.f32.mrf.mxu1  ;;  %v4802_v44 = vsel %vm417_vm1, %v7175_v20, %v6491_v21 }
 0x425   : > { %v3656_v15 = vmax.f32 %v3624_v53, 0.0  ;;  %v3622_v50 = vadd.f32 %v9292_v46, %v3583_v3  ;;  %v3586_v0 = vmul.f32 %v5778_v1, %v9287_v59  ;;  %v9537_v36 = vpop.permute.xlu0 %6513  ;;  %6783 = vrot.lane.b32.xlu1 %v6792_v31, %s7215_s22  ;;  %v4801_v53 = vsel %vm417_vm1, %v7176_v22, %v6490_v40  ;;  %v3781_v40 = vld [vmem:[#allocation3 + $0x120] sm:$0xff] }
 0x426   : > { %v3536_v17 = vpop.f32.mrf.mxu1  ;;  %v6496_v3 = vunpack.i.h.bf16 %v9522_v54  ;;  %v4833_v54 = vsel %vm3052_vm9, %v4801_v53, %v6495_v33  ;;  %v3907_v53 = vrot.slane %v3781_v40, 1 }
 0x427   : > { %3743 = vst.msk [vmem:[#allocation3 + $0x181] sm:$0xff] %vm417_vm1, %v3656_v15  ;;  %v3654_v39 = vmax.f32 %v3622_v50, 0.0  ;;  %v3625_v52 = vadd.f32 %v9292_v46, %v3586_v0  ;;  %v3584_v48 = vmul.f32 %v9287_v59, %v3536_v17  ;;  %v6817_v59 = vpack.i.bf16 %v9528_v9, %v9535_v28  ;;  %v9543_v14 = vpop.permute.xlu1 %6508 }
 0x428   : > { %v6516_v15 = vunpack.i.h.bf16 %v9537_v36  ;;  %v6515_v50 = vunpack.i.l.bf16 %v9537_v36  ;;  %v4070_v0 = vsel %vm2241_vm4, %v4068_v27, %v4069_v51  ;;  %v4072_v17 = vsel %vm2241_vm4, %v4069_v51, %v4071_v45 }
 0x429   : > { %3741 = vst.msk [vmem:[#allocation3 + $0x169] sm:$0xff] %vm417_vm1, %v3654_v39  ;;  %v3657_v4 = vmax.f32 %v3625_v52, 0.0  ;;  %v3623_v55 = vadd.f32 %v9292_v46, %v3584_v48  ;;  %6818 = vrot.lane.b32.xlu0 %v6817_v59, %s7223_s16  ;;  %v3897_v46 = vrot.slane %v3775_v10, 1  ;;  %v9547_v19 = vpop.permute.xlu0 %6518  ;;  %6798 = vrot.lane.b32.xlu1 %v6787_v60, %s7224_s17  ;;  %v3894_v60 = vsel %vm2064_vm3, %v3892_v7, %v3893_v35 }
 0x42a   : > { %v6867_v48 = vpack.i.bf16 %v3896_v57, %v3894_v60  ;;  %v4834_v9 = vsel %vm3052_vm9, %v4802_v44, %v6496_v3  ;;  %v9601_v32 = vpack.i.bf16 %v4072_v17, %v4070_v0  ;;  %v6510_v10 = vunpack.i.l.bf16 %v9543_v14  ;;  %v7177_v17 = vld [vmem:[#allocation3 + $0x1a0] sm:$0xff] }
 0x42b   : > { %3744 = vst.msk [vmem:[#allocation3 + $0x189] sm:$0xff] %vm417_vm1, %v3657_v4  ;;  %v3655_v8 = vmax.f32 %v3623_v55, 0.0  ;;  %v3899_v37 = vsel %vm2064_vm3, %v3897_v46, %v3898_v38  ;;  %v9552_v61 = vpop.permute.xlu1 %6538  ;;  %v4866_v4 = vsel %vm3085_vm10, %v4834_v9, %v6516_v15  ;;  %v4865_v55 = vsel %vm3085_vm10, %v4833_v54, %v6515_v50  ;;  %v7178_v9 = vld [vmem:[#allocation3 + $0x198] sm:$0xff] }
 0x42c   : > { %v6827_v63 = vpack.i.bf16 %v3901_v13, %v3899_v37  ;;  %v9614_v13 = vld [vmem:[#allocation3 + $0x110] sm:$0xff]  ;;  %v6541_v12 = vunpack.i.h.bf16 %v9552_v61  ;;  %v6540_v26 = vunpack.i.l.bf16 %v9552_v61  ;;  %v3910_v45 = vrot.slane %v3783_v16, 1 }
 0x42d   : > { %3742 = vst.msk [vmem:[#allocation3 + $0x171] sm:$0xff] %vm417_vm1, %v3655_v8  ;;  %6823 = vrot.lane.b32.xlu0 %v6817_v59, %s7216_s23  ;;  %v9555_v42 = vpop.permute.xlu0 %6523  ;;  %6803 = vrot.lane.b32.xlu1 %v6792_v31, %s7225_s18  ;;  %v6511_v59 = vunpack.i.h.bf16 %v9543_v14  ;;  %v6897_v61 = vpack.i.bf16 %v9614_v13, %v9626_v43  ;;  %v4086_v15 = vrot.slane %v3783_v16, 2  ;;  %v4083_v54 = vrot.slane %v3781_v40, 2 }
 0x42f   : > { %v9560_v41 = vpop.permute.xlu1 %6543 }
 0x431   : > { %6828 = vrot.lane.b32.xlu0 %v6827_v63, %s7214_s21  ;;  %v9563_v5 = vpop.permute.xlu0 %6528  ;;  %6808 = vrot.lane.b32.xlu1 %v6807_v29, %s7223_s16 }
 0x433   : > { %v9566_v56 = vpop.permute.xlu1 %6548 }
 0x434   : > { %v6551_v20 = vunpack.i.h.bf16 %v9566_v56  ;;  %v6550_v44 = vunpack.i.l.bf16 %v9566_v56 }
 0x435   : > { %6833 = vrot.lane.b32.xlu0 %v6832_v34, %s7215_s22  ;;  %v9569_v47 = vpop.permute.xlu0 %6533  ;;  %6813 = vrot.lane.b32.xlu1 %v6807_v29, %s7216_s23  ;;  %v6546_v29 = vunpack.i.h.bf16 %v9560_v41 }
 0x436   : > { %v4804_v50 = vsel %vm417_vm1, %v9322_v11, %v6551_v20  ;;  %v4803_v0 = vsel %vm417_vm1, %v9320_v23, %v6550_v44  ;;  %v6505_v11 = vunpack.i.l.bf16 %v9530_v2 }
 0x437   : > { %v9575_v49 = vpop.permute.xlu1 %6553 }
 0x438   : > { %v6556_v27 = vunpack.i.h.bf16 %v9575_v49  ;;  %v6555_v22 = vunpack.i.l.bf16 %v9575_v49 }
 0x439   : > { %6838 = vrot.lane.b32.xlu0 %v6827_v63, %s7224_s17  ;;  %v9580_v62 = vpop.permute.xlu0 %6578  ;;  %6848 = vrot.lane.b32.xlu1 %v6827_v63, %s7226_s19 }
 0x43b   : > { %v6559_v1 = vpop.permute.xlu1 %6558 }
 0x43c   : > { %v6561_v31 = vunpack.i.h.bf16 %v6559_v1  ;;  %v6560_v39 = vunpack.i.l.bf16 %v6559_v1  ;;  %v4084_v1 = vrot.slane %v3782_v6, 2 }
 0x43d   : > { %6843 = vrot.lane.b32.xlu0 %v6832_v34, %s7225_s18  ;;  %v9595_v52 = vpop.permute.xlu0 %6583  ;;  %6853 = vrot.lane.b32.xlu1 %v6832_v34, %s7227_s20  ;;  %v6545_v34 = vunpack.i.l.bf16 %v9560_v41  ;;  %v3908_v41 = vrot.slane %v3782_v6, 1 }
 0x43e   : > { %v4898_v8 = vsel %vm3118_vm11, %v4866_v4, %v6561_v31  ;;  %v4897_v38 = vsel %vm3118_vm11, %v4865_v55, %v6560_v39  ;;  %v4600_v31 = vrot.slane %v7177_v17, 1  ;;  %v4835_v39 = vsel %vm3052_vm9, %v4803_v0, %v6555_v22 }
 0x43f   : > { %v6564_v58 = vpop.permute.xlu1 %6563  ;;  %v3909_v33 = vsel %vm2064_vm3, %v3907_v53, %v3908_v41  ;;  %v3911_v56 = vsel %vm2064_vm3, %v3908_v41, %v3910_v45  ;;  %v6506_v4 = vunpack.i.h.bf16 %v9530_v2  ;;  %v6887_v2 = vpack.i.bf16 %v3782_v6, %v3781_v40 }
 0x440   : > { %v6566_v28 = vunpack.i.h.bf16 %v6564_v58  ;;  %v6565_v36 = vunpack.i.l.bf16 %v6564_v58  ;;  %v4599_v58 = vrot.slane %v7178_v9, 1  ;;  %v6907_v23 = vpack.i.bf16 %v3911_v56, %v3909_v33 }
 0x441   : > { %6868 = vrot.lane.b32.xlu0 %v6867_v48, %s7226_s19  ;;  %v9609_v24 = vpop.permute.xlu0 %6588  ;;  %6858 = vrot.lane.b32.xlu1 %v6867_v48, %s7214_s21  ;;  %v3902_v41 = vrot.slane %v9626_v43, 1  ;;  %v3903_v45 = vrot.slane %v9614_v13, 1 }
 0x442   : > { %v4929_v46 = vsel %vm3151_vm12, %v4897_v38, %v6565_v36  ;;  %v4930_v37 = vsel %vm3151_vm12, %v4898_v8, %v6566_v28  ;;  %v4701_v28 = vrot.slane %v7177_v17, 2  ;;  %v4085_v36 = vsel %vm2241_vm4, %v4083_v54, %v4084_v1 }
 0x443   : > { %v4961_v14 = vsel %vm3184_vm13, %v4929_v46, %v6510_v10  ;;  %v4962_v18 = vsel %vm3184_vm13, %v4930_v37, %v6511_v59  ;;  %v9620_v63 = vpop.permute.xlu1 %6568  ;;  %v4087_v59 = vsel %vm2241_vm4, %v4084_v1, %v4086_v15  ;;  %v4700_v10 = vrot.slane %v7178_v9, 2 }
 0x444   : > { %v4993_v35 = vsel %vm3217_vm14, %v4961_v14, %v6540_v26  ;;  %v4994_v25 = vsel %vm3217_vm14, %v4962_v18, %v6541_v12  ;;  %v4867_v8 = vsel %vm3085_vm10, %v4835_v39, %v6505_v11  ;;  %v6531_v37 = vunpack.i.h.bf16 %v9563_v5  ;;  %v3798_v12 = vld [vmem:[#allocation3 + $0x1a8] sm:$0x3] }
 0x445   : > { %6873 = vrot.lane.b32.xlu0 %v9601_v32, %s7227_s20  ;;  %v9628_v21 = vpop.permute.xlu0 %6593  ;;  %6863 = vrot.lane.b32.xlu1 %v9601_v32, %s7215_s22  ;;  %v5025_v7 = vsel %vm3250_vm15, %v4993_v35, %v6545_v34  ;;  %v5026_v51 = vsel %vm3250_vm15, %v4994_v25, %v6546_v29  ;;  %v6536_v26 = vunpack.i.h.bf16 %v9569_v47  ;;  %v6535_v14 = vunpack.i.l.bf16 %v9569_v47  ;;  %v3780_v29 = vld [vmem:[#allocation3 + $0x118] sm:$0x3] }
 0x446   : > { %v5057_v57 = vpack.c.bf16 %v5026_v51, %v5025_v7  ;;  %v6912_v16 = vpack.i.bf16 %v4087_v59, %v4085_v36  ;;  %v9679_v34 = vsel %vm2064_vm3, %v4599_v58, %v4600_v31  ;;  %v6586_v35 = vunpack.i.h.bf16 %v9595_v52 }
 0x447   : > { %v9640_v60 = vpop.permute.xlu1 %6573  ;;  %v4602_v47 = vrot.slane %v3798_v12, 1  ;;  %v9689_v51 = vsel %vm2241_vm4, %v4700_v10, %v4701_v28  ;;  %v3905_v20 = vrot.slane %v3780_v29, 1  ;;  %v4703_v22 = vrot.slane %v3798_v12, 2 }
 0x448   : > { %5789 = vmatprep.mubr.msk.bf16.mxu0 %vm3335_vm2, %v5057_v57  ;;  %v4079_v54 = vrot.slane %v9614_v13, 2  ;;  %v4081_v9 = vrot.slane %v3780_v29, 2  ;;  %v6521_v58 = vunpack.i.h.bf16 %v9547_v19  ;;  %v3904_v59 = vsel %vm2064_vm3, %v3902_v41, %v3903_v45  ;;  %v7180_v29 = vld [vmem:[#allocation3 + $0x30] sm:$0xff] }
 0x449   : > { %6898 = vrot.lane.b32.xlu0 %v6897_v61, %s7223_s16  ;;  %v9646_v3 = vpop.permute.xlu0 %6598  ;;  %6878 = vrot.lane.b32.xlu1 %v6867_v48, %s7224_s17  ;;  %v4836_v48 = vsel %vm3052_vm9, %v4804_v50, %v6556_v27  ;;  %v9697_v27 = vsel %vm2064_vm3, %v4600_v31, %v4602_v47  ;;  %v9709_v31 = vsel %vm2241_vm4, %v4701_v28, %v4703_v22  ;;  %v6520_v28 = vunpack.i.l.bf16 %v9547_v19 }
 0x44a   : > { %v4868_v38 = vsel %vm3085_vm10, %v4836_v48, %v6506_v4  ;;  %v7092_v17 = vpack.i.bf16 %v9697_v27, %v9679_v34  ;;  %v7122_v36 = vpack.i.bf16 %v9709_v31, %v9689_v51  ;;  %v3906_v10 = vsel %vm2064_vm3, %v3903_v45, %v3905_v20 }
 0x44b   : > { %v9655_v49 = vpop.permute.xlu1 %6608  ;;  %v4900_v6 = vsel %vm3118_vm11, %v4868_v38, %v6531_v37  ;;  %v6526_v13 = vunpack.i.h.bf16 %v9555_v42  ;;  %v6525_v38 = vunpack.i.l.bf16 %v9555_v42  ;;  %v6580_v37 = vunpack.i.l.bf16 %v9580_v62 }
 0x44c   : > { %v4932_v57 = vsel %vm3151_vm12, %v4900_v6, %v6536_v26  ;;  %v6947_v42 = vpack.i.bf16 %v3906_v10, %v3904_v59  ;;  %v6576_v41 = vunpack.i.h.bf16 %v9640_v60  ;;  %v6575_v45 = vunpack.i.l.bf16 %v9640_v60  ;;  %v3787_v59 = vld [vmem:[#allocation3 + $0x150] sm:$0xff] }
 0x44d   : > { %6903 = vrot.lane.b32.xlu0 %v6897_v61, %s7216_s23  ;;  %v9662_v55 = vpop.permute.xlu0 %6603  ;;  %6883 = vrot.lane.b32.xlu1 %v9601_v32, %s7225_s18  ;;  %v6530_v32 = vunpack.i.l.bf16 %v9563_v5  ;;  %v6585_v5 = vunpack.i.l.bf16 %v9595_v52  ;;  %v4964_v53 = vsel %vm3184_vm13, %v4932_v57, %v6586_v35 }
 0x44f   : > { %v9670_v46 = vpop.permute.xlu1 %6613  ;;  %v4899_v61 = vsel %vm3118_vm11, %v4867_v8, %v6530_v32  ;;  %v4078_v8 = vrot.slane %v9626_v43, 2  ;;  %v4082_v32 = vsel %vm2241_vm4, %v4079_v54, %v4081_v9  ;;  %v9762_v9 = vld [vmem:[#allocation3 + $0x138] sm:$0xff] }
 0x450   : > { %v4931_v44 = vsel %vm3151_vm12, %v4899_v61, %v6535_v14  ;;  %v7179_v14 = vld [vmem:[#allocation3 + $0x38] sm:$0xff]  ;;  %v4805_v61 = vsel %vm417_vm1, %v7180_v29, %v6520_v28 }
 0x451   : > { %6908 = vrot.lane.b32.xlu0 %v6907_v23, %s7214_s21  ;;  %v6629_v18 = vpop.permute.xlu0 %6628  ;;  %6888 = vrot.lane.b32.xlu1 %v6887_v2, %s7223_s16  ;;  %v4963_v33 = vsel %vm3184_vm13, %v4931_v44, %v6585_v5  ;;  %v4080_v19 = vsel %vm2241_vm4, %v4078_v8, %v4079_v54  ;;  %v4837_v6 = vsel %vm3052_vm9, %v4805_v61, %v6525_v38  ;;  %v6615_v54 = vunpack.i.l.bf16 %v9670_v46  ;;  %v7181_v61 = vld [vmem:[#allocation3 + $0x50] sm:$0xff] }
 0x452   : > { %v6631_v25 = vunpack.i.h.bf16 %v6629_v18  ;;  %v6630_v40 = vunpack.i.l.bf16 %v6629_v18  ;;  %v4806_v18 = vsel %vm417_vm1, %v7179_v14, %v6521_v58  ;;  %v6952_v5 = vpack.i.bf16 %v4082_v32, %v4080_v19 }
 0x453   : > { %v9685_v7 = vpop.permute.xlu1 %6618 }
 0x454   : > { %v4996_v15 = vsel %vm3217_vm14, %v4964_v53, %v6631_v25  ;;  %v4995_v50 = vsel %vm3217_vm14, %v4963_v33, %v6630_v40  ;;  %v4869_v40 = vsel %vm3085_vm10, %v4837_v6, %v6580_v37  ;;  %v9751_v53 = vld [vmem:[#allocation3 + $0x140] sm:$0xff]  ;;  %v6611_v33 = vunpack.i.h.bf16 %v9655_v49 }
 0x455   : > { %6913 = vrot.lane.b32.xlu0 %v6912_v16, %s7215_s22  ;;  %v6634_v52 = vpop.permute.xlu0 %6633  ;;  %6893 = vrot.lane.b32.xlu1 %v6887_v2, %s7216_s23  ;;  %v6621_v38 = vunpack.i.h.bf16 %v9685_v7 }
 0x456   : > { %v6636_v56 = vunpack.i.h.bf16 %v6634_v52  ;;  %v6635_v1 = vunpack.i.l.bf16 %v6634_v52 }
 0x457   : > { %v9703_v0 = vpop.permute.xlu1 %6623  ;;  %v4808_v6 = vsel %vm417_vm1, %v7181_v61, %v6621_v38  ;;  %v4089_v61 = vrot.slane %v9751_v53, 2 }
 0x458   : > { %v5027_v39 = vsel %vm3250_vm15, %v4995_v50, %v6635_v1  ;;  %v5028_v48 = vsel %vm3250_vm15, %v4996_v15, %v6636_v56  ;;  %v6610_v56 = vunpack.i.l.bf16 %v9655_v49  ;;  %v3788_v50 = vld [vmem:[#allocation3 + $0x158] sm:$0xff]  ;;  %v6977_v49 = vpack.i.bf16 %v9751_v53, %v9762_v9 }
 0x459   : > { %6918 = vrot.lane.b32.xlu0 %v6907_v23, %s7224_s17  ;;  %v5058_v4 = vpack.c.bf16 %v5028_v48, %v5027_v39  ;;  %v9715_v11 = vpop.permute.xlu0 %6658  ;;  %6928 = vrot.lane.b32.xlu1 %v6907_v23, %s7226_s19  ;;  %v6581_v23 = vunpack.i.h.bf16 %v9580_v62  ;;  %v4838_v62 = vsel %vm3052_vm9, %v4806_v18, %v6526_v13  ;;  %v3789_v39 = vld [vmem:[#allocation3 + $0x160] sm:$0x3]  ;;  %v6616_v48 = vunpack.i.h.bf16 %v9670_v46 }
 0x45a   : > { %v3918_v13 = vrot.slane %v3788_v50, 1  ;;  %v3920_v46 = vrot.slane %v3789_v39, 1  ;;  %v6626_v19 = vunpack.i.h.bf16 %v9703_v0  ;;  %v6625_v32 = vunpack.i.l.bf16 %v9703_v0 }
 0x45b   : > { %5790 = vmatmul.mubr.msk.bf16.vlgmr.msra.gmra.mxu0 %vm3335_vm2, %v5058_v4  ;;  %v6639_v2 = vpop.permute.xlu1 %6638  ;;  %v4870_v25 = vsel %vm3085_vm10, %v4838_v62, %v6581_v23  ;;  %v4094_v18 = vrot.slane %v3788_v50, 2  ;;  %v4096_v29 = vrot.slane %v3789_v39, 2  ;;  %v7182_v62 = vld [vmem:[#allocation3 + $0x48] sm:$0xff] }
 0x45c   : > { %v6641_v12 = vunpack.i.h.bf16 %v6639_v2  ;;  %v6640_v26 = vunpack.i.l.bf16 %v6639_v2  ;;  %v6620_v2 = vunpack.i.l.bf16 %v9685_v7  ;;  %v3921_v7 = vsel %vm2064_vm3, %v3918_v13, %v3920_v46 }
 0x45d   : > { %6923 = vrot.lane.b32.xlu0 %v6912_v16, %s7225_s18  ;;  %v9732_v43 = vpop.permute.xlu0 %6663  ;;  %6933 = vrot.lane.b32.xlu1 %v6912_v16, %s7227_s20 }
 0x45e   : > { %v4902_v20 = vsel %vm3118_vm11, %v4870_v25, %v6641_v12  ;;  %v4901_v44 = vsel %vm3118_vm11, %v4869_v40, %v6640_v26  ;;  %v3917_v12 = vrot.slane %v3787_v59, 1  ;;  %v4093_v40 = vrot.slane %v3787_v59, 2 }
 0x45f   : > { %v6644_v35 = vpop.permute.xlu1 %6643 }
 0x460   : > { %v6646_v16 = vunpack.i.h.bf16 %v6644_v35  ;;  %v6645_v47 = vunpack.i.l.bf16 %v6644_v35  ;;  %v3919_v14 = vsel %vm2064_vm3, %v3917_v12, %v3918_v13  ;;  %v4807_v35 = vsel %vm417_vm1, %v7182_v62, %v6620_v2 }
 0x461   : > { %6948 = vrot.lane.b32.xlu0 %v6947_v42, %s7226_s19  ;;  %v9746_v57 = vpop.permute.xlu0 %6668  ;;  %6938 = vrot.lane.b32.xlu1 %v6947_v42, %s7214_s21  ;;  %v4839_v25 = vsel %vm3052_vm9, %v4807_v35, %v6625_v32 }
 0x462   : > { %v4933_v52 = vsel %vm3151_vm12, %v4901_v44, %v6645_v47  ;;  %v4934_v22 = vsel %vm3151_vm12, %v4902_v20, %v6646_v16  ;;  %v6571_v16 = vunpack.i.h.bf16 %v9620_v63  ;;  %v6570_v47 = vunpack.i.l.bf16 %v9620_v63 }
 0x463   : > { %v4965_v60 = vsel %vm3184_vm13, %v4933_v52, %v6575_v45  ;;  %v4966_v1 = vsel %vm3184_vm13, %v4934_v22, %v6576_v41  ;;  %v9757_v15 = vpop.permute.xlu1 %6648  ;;  %v6987_v45 = vpack.i.bf16 %v3921_v7, %v3919_v14  ;;  %v4095_v20 = vsel %vm2241_vm4, %v4093_v40, %v4094_v18 }
 0x464   : > { %v4997_v4 = vsel %vm3217_vm14, %v4965_v60, %v6610_v56  ;;  %v4998_v28 = vsel %vm3217_vm14, %v4966_v1, %v6611_v33  ;;  %v4097_v44 = vsel %vm2241_vm4, %v4094_v18, %v4096_v29  ;;  %v4871_v52 = vsel %vm3085_vm10, %v4839_v25, %v6570_v47 }
 0x465   : > { %6953 = vrot.lane.b32.xlu0 %v6952_v5, %s7227_s20  ;;  %v9764_v58 = vpop.permute.xlu0 %6673  ;;  %6943 = vrot.lane.b32.xlu1 %v6952_v5, %s7215_s22  ;;  %v5029_v10 = vsel %vm3250_vm15, %v4997_v4, %v6615_v54  ;;  %v5030_v8 = vsel %vm3250_vm15, %v4998_v28, %v6616_v48  ;;  %v6967_v56 = vpack.i.bf16 %v3788_v50, %v3787_v59  ;;  %v6601_v63 = vunpack.i.h.bf16 %v9646_v3  ;;  %v3786_v4 = vld [vmem:[#allocation3 + $0x148] sm:$0x3] }
 0x466   : > { %v5059_v37 = vpack.c.bf16 %v5030_v8, %v5029_v10  ;;  %v6600_v60 = vunpack.i.l.bf16 %v9646_v3  ;;  %v6666_v54 = vunpack.i.h.bf16 %v9732_v43  ;;  %v6606_v28 = vunpack.i.h.bf16 %v9662_v55 }
 0x467   : > { %v9775_v23 = vpop.permute.xlu1 %6653  ;;  %v6605_v50 = vunpack.i.l.bf16 %v9662_v55  ;;  %v3915_v38 = vrot.slane %v3786_v4, 1  ;;  %v3912_v7 = vrot.slane %v9762_v9, 1  ;;  %v6590_v40 = vunpack.i.l.bf16 %v9609_v24 }
 0x468   : > { %5793 = vmatprep.mubr.msk.bf16.mxu0 %vm3335_vm2, %v5059_v37  ;;  %v4903_v39 = vsel %vm3118_vm11, %v4871_v52, %v6600_v60  ;;  %v4088_v47 = vrot.slane %v9762_v9, 2  ;;  %v6660_v52 = vunpack.i.l.bf16 %v9715_v11  ;;  %v7183_v60 = vld [vmem:[#allocation3 + $0x68] sm:$0xff] }
 0x469   : > { %6978 = vrot.lane.b32.xlu0 %v6977_v49, %s7223_s16  ;;  %v9781_v26 = vpop.permute.xlu0 %6678  ;;  %6958 = vrot.lane.b32.xlu1 %v6947_v42, %s7224_s17  ;;  %v4840_v42 = vsel %vm3052_vm9, %v4808_v6, %v6626_v19  ;;  %v4935_v8 = vsel %vm3151_vm12, %v4903_v39, %v6605_v50  ;;  %v4091_v6 = vrot.slane %v3786_v4, 2  ;;  %v7184_v39 = vld [vmem:[#allocation3 + $0x60] sm:$0xff] }
 0x46a   : > { %v4872_v22 = vsel %vm3085_vm10, %v4840_v42, %v6571_v16  ;;  %v6591_v42 = vunpack.i.h.bf16 %v9609_v24 }
 0x46b   : > { %v9788_v0 = vpop.permute.xlu1 %6688  ;;  %v4904_v48 = vsel %vm3118_vm11, %v4872_v22, %v6601_v63  ;;  %v4090_v22 = vsel %vm2241_vm4, %v4088_v47, %v4089_v61  ;;  %v4092_v24 = vsel %vm2241_vm4, %v4089_v61, %v4091_v6  ;;  %v9880_v61 = vld [vmem:[#allocation3 + $0x190] sm:$0x3] }
 0x46c   : > { %v4936_v13 = vsel %vm3151_vm12, %v4904_v48, %v6606_v28  ;;  %v4809_v48 = vsel %vm417_vm1, %v7184_v39, %v6590_v40  ;;  %v7032_v4 = vpack.i.bf16 %v4092_v24, %v4090_v22  ;;  %v9902_v24 = vld [vmem:[#allocation3 + $0x168] sm:$0xff]  ;;  %v7185_v39 = vld [vmem:[#allocation3 + $0x80] sm:$0xff] }
 0x46d   : > { %6983 = vrot.lane.b32.xlu0 %v6977_v49, %s7216_s23  ;;  %v9795_v41 = vpop.permute.xlu0 %6683  ;;  %6963 = vrot.lane.b32.xlu1 %v6952_v5, %s7225_s18  ;;  %v6992_v5 = vpack.i.bf16 %v4097_v44, %v4095_v20  ;;  %v6665_v49 = vunpack.i.l.bf16 %v9732_v43  ;;  %v3913_v43 = vrot.slane %v9751_v53, 1  ;;  %v4968_v2 = vsel %vm3184_vm13, %v4936_v13, %v6666_v54 }
 0x46e   : > { %v6596_v20 = vunpack.i.h.bf16 %v9628_v21  ;;  %v6595_v53 = vunpack.i.l.bf16 %v9628_v21 }
 0x46f   : > { %v9802_v33 = vpop.permute.xlu1 %6693  ;;  %v4967_v55 = vsel %vm3184_vm13, %v4935_v8, %v6665_v49  ;;  %v3914_v25 = vsel %vm2064_vm3, %v3912_v7, %v3913_v43  ;;  %v3916_v16 = vsel %vm2064_vm3, %v3913_v43, %v3915_v38  ;;  %v6655_v8 = vunpack.i.l.bf16 %v9775_v23 }
 0x470   : > { %v7027_v21 = vpack.i.bf16 %v3916_v16, %v3914_v25  ;;  %v4841_v54 = vsel %vm3052_vm9, %v4809_v48, %v6595_v53  ;;  %v6696_v7 = vunpack.i.h.bf16 %v9802_v33 }
 0x471   : > { %6988 = vrot.lane.b32.xlu0 %v6987_v45, %s7214_s21  ;;  %v6709_v1 = vpop.permute.xlu0 %6708  ;;  %6968 = vrot.lane.b32.xlu1 %v6967_v56, %s7223_s16  ;;  %v4873_v50 = vsel %vm3085_vm10, %v4841_v54, %v6660_v52 }
 0x472   : > { %v6711_v59 = vunpack.i.h.bf16 %v6709_v1  ;;  %v6710_v10 = vunpack.i.l.bf16 %v6709_v1  ;;  %v4810_v1 = vsel %vm417_vm1, %v7183_v60, %v6591_v42  ;;  %v3792_v60 = vld [vmem:[#allocation3 + $0x178] sm:$0x3] }
 0x473   : > { %v9814_v3 = vpop.permute.xlu1 %6698 }
 0x474   : > { %v5000_v32 = vsel %vm3217_vm14, %v4968_v2, %v6711_v59  ;;  %v4999_v12 = vsel %vm3217_vm14, %v4967_v55, %v6710_v10  ;;  %v6656_v10 = vunpack.i.h.bf16 %v9775_v23  ;;  %v9867_v55 = vld [vmem:[#allocation3 + $0x188] sm:$0xff]  ;;  %v6701_v47 = vunpack.i.h.bf16 %v9814_v3 }
 0x475   : > { %6993 = vrot.lane.b32.xlu0 %v6992_v5, %s7215_s22  ;;  %v6714_v46 = vpop.permute.xlu0 %6713  ;;  %6973 = vrot.lane.b32.xlu1 %v6967_v56, %s7216_s23  ;;  %v4299_v16 = vrot.slane %v9867_v55, 1 }
 0x476   : > { %v6716_v37 = vunpack.i.h.bf16 %v6714_v46  ;;  %v6715_v19 = vunpack.i.l.bf16 %v6714_v46  ;;  %v4812_v48 = vsel %vm417_vm1, %v7185_v39, %v6701_v47  ;;  %v6685_v47 = vunpack.i.l.bf16 %v9795_v41 }
 0x477   : > { %v9825_v14 = vpop.permute.xlu1 %6703 }
 0x478   : > { %v5031_v18 = vsel %vm3250_vm15, %v4999_v12, %v6715_v19  ;;  %v5032_v29 = vsel %vm3250_vm15, %v5000_v32, %v6716_v37  ;;  %v6691_v37 = vunpack.i.h.bf16 %v9788_v0  ;;  %v6690_v19 = vunpack.i.l.bf16 %v9788_v0 }
 0x479   : > { %6998 = vrot.lane.b32.xlu0 %v6987_v45, %s7224_s17  ;;  %v5060_v62 = vpack.c.bf16 %v5032_v29, %v5031_v18  ;;  %v9832_v35 = vpop.permute.xlu0 %6738  ;;  %7008 = vrot.lane.b32.xlu1 %v6987_v45, %s7226_s19  ;;  %v6661_v45 = vunpack.i.h.bf16 %v9715_v11  ;;  %v4842_v11 = vsel %vm3052_vm9, %v4810_v1, %v6596_v20  ;;  %v6695_v18 = vunpack.i.l.bf16 %v9802_v33  ;;  %v9878_v29 = vld [vmem:[#allocation3 + $0x180] sm:$0xff]  ;;  %v9891_v33 = vld [vmem:[#allocation3 + $0x170] sm:$0xff] }
 0x47a   : > { %v7052_v0 = vpack.i.bf16 %v9867_v55, %v9878_v29  ;;  %v6700_v20 = vunpack.i.l.bf16 %v9814_v3  ;;  %v6706_v52 = vunpack.i.h.bf16 %v9825_v14  ;;  %v6705_v22 = vunpack.i.l.bf16 %v9825_v14  ;;  %v7186_v14 = vld [vmem:[#allocation3 + $0x78] sm:$0xff] }
 0x47b   : > { %5794 = vmatmul.mubr.msk.bf16.gmra.mxu0 %vm3335_vm2, %v5060_v62  ;;  %v6719_v44 = vpop.permute.xlu1 %6718  ;;  %v4874_v28 = vsel %vm3085_vm10, %v4842_v11, %v6661_v45  ;;  %v4301_v45 = vrot.slane %v9880_v61, 1  ;;  %v7057_v3 = vpack.i.bf16 %v9891_v33, %v9902_v24  ;;  %v3923_v1 = vrot.slane %v9891_v33, 1 }
 0x47c   : > { %v6721_v56 = vunpack.i.h.bf16 %v6719_v44  ;;  %v6720_v63 = vunpack.i.l.bf16 %v6719_v44  ;;  %v4811_v54 = vsel %vm417_vm1, %v7186_v14, %v6700_v20 }
 0x47d   : > { %7003 = vrot.lane.b32.xlu0 %v6992_v5, %s7225_s18  ;;  %v9848_v9 = vpop.permute.xlu0 %6743  ;;  %7013 = vrot.lane.b32.xlu1 %v6992_v5, %s7227_s20 }
 0x47e   : > { %v4906_v13 = vsel %vm3118_vm11, %v4874_v28, %v6721_v56  ;;  %v4905_v46 = vsel %vm3118_vm11, %v4873_v50, %v6720_v63  ;;  %v4298_v63 = vrot.slane %v9878_v29, 1  ;;  %v4843_v28 = vsel %vm3052_vm9, %v4811_v54, %v6705_v22 }
 0x47f   : > { %v6724_v49 = vpop.permute.xlu1 %6723  ;;  %v4844_v50 = vsel %vm3052_vm9, %v4812_v48, %v6706_v52 }
 0x480   : > { %v6726_v5 = vunpack.i.h.bf16 %v6724_v49  ;;  %v6725_v59 = vunpack.i.l.bf16 %v6724_v49  ;;  %v4302_v49 = vsel %vm2064_vm3, %v4299_v16, %v4301_v45 }
 0x481   : > { %7028 = vrot.lane.b32.xlu0 %v7027_v21, %s7226_s19  ;;  %v9862_v43 = vpop.permute.xlu0 %6748  ;;  %7018 = vrot.lane.b32.xlu1 %v7027_v21, %s7214_s21 }
 0x482   : > { %v4937_v38 = vsel %vm3151_vm12, %v4905_v46, %v6725_v59  ;;  %v4938_v2 = vsel %vm3151_vm12, %v4906_v13, %v6726_v5  ;;  %v6651_v5 = vunpack.i.h.bf16 %v9757_v15  ;;  %v6650_v59 = vunpack.i.l.bf16 %v9757_v15 }
 0x483   : > { %v4969_v23 = vsel %vm3184_vm13, %v4937_v38, %v6655_v8  ;;  %v4970_v32 = vsel %vm3184_vm13, %v4938_v2, %v6656_v10  ;;  %v9873_v12 = vpop.permute.xlu1 %6728  ;;  %v3922_v8 = vrot.slane %v9902_v24, 1  ;;  %v3925_v13 = vrot.slane %v3792_v60, 1 }
 0x484   : > { %v5001_v62 = vsel %vm3217_vm14, %v4969_v23, %v6690_v19  ;;  %v5002_v25 = vsel %vm3217_vm14, %v4970_v32, %v6691_v37  ;;  %v4399_v38 = vrot.slane %v9878_v29, 2  ;;  %v4875_v2 = vsel %vm3085_vm10, %v4843_v28, %v6650_v59 }
 0x485   : > { %7033 = vrot.lane.b32.xlu0 %v7032_v4, %s7227_s20  ;;  %v9882_v6 = vpop.permute.xlu0 %6753  ;;  %7023 = vrot.lane.b32.xlu1 %v7032_v4, %s7215_s22  ;;  %v5033_v42 = vsel %vm3250_vm15, %v5001_v62, %v6695_v18  ;;  %v5034_v40 = vsel %vm3250_vm15, %v5002_v25, %v6696_v7  ;;  %v4876_v37 = vsel %vm3085_vm10, %v4844_v50, %v6651_v5  ;;  %v6681_v23 = vunpack.i.h.bf16 %v9781_v26 }
 0x486   : > { %v5061_v44 = vpack.c.bf16 %v5034_v40, %v5033_v42  ;;  %v3924_v15 = vsel %vm2064_vm3, %v3922_v8, %v3923_v1  ;;  %v4400_v32 = vrot.slane %v9867_v55, 2  ;;  %v4402_v7 = vrot.slane %v9880_v61, 2 }
 0x487   : > { %v9896_v53 = vpop.permute.xlu1 %6733  ;;  %v3926_v29 = vsel %vm2064_vm3, %v3923_v1, %v3925_v13  ;;  %v4098_v62 = vrot.slane %v9902_v24, 2  ;;  %v4099_v25 = vrot.slane %v9891_v33, 2  ;;  %v4101_v42 = vrot.slane %v3792_v60, 2 }
 0x488   : > { %5797 = vmatprep.mubr.msk.bf16.mxu0 %vm3335_vm2, %v5061_v44  ;;  %v6745_v55 = vunpack.i.l.bf16 %v9848_v9  ;;  %v6686_v61 = vunpack.i.h.bf16 %v9795_v41  ;;  %v7097_v45 = vpack.i.bf16 %v3926_v29, %v3924_v15  ;;  %v4401_v52 = vsel %vm2241_vm4, %v4399_v38, %v4400_v32 }
 0x489   : > { %7053 = vrot.lane.b32.xlu0 %v7052_v0, %s7216_s23  ;;  %v9905_v56 = vpop.permute.xlu0 %6758  ;;  %7038 = vrot.lane.b32.xlu1 %v7027_v21, %s7224_s17  ;;  %v4300_v21 = vsel %vm2064_vm3, %v4298_v63, %v4299_v16  ;;  %v4908_v16 = vsel %vm3118_vm11, %v4876_v37, %v6681_v23  ;;  %v4403_v22 = vsel %vm2241_vm4, %v4400_v32, %v4402_v7  ;;  %v6670_v38 = vunpack.i.l.bf16 %v9746_v57 }
 0x48a   : > { %v7077_v46 = vpack.i.bf16 %v4302_v49, %v4300_v21  ;;  %v4940_v63 = vsel %vm3151_vm12, %v4908_v16, %v6686_v61  ;;  %v4100_v41 = vsel %vm2241_vm4, %v4098_v62, %v4099_v25  ;;  %v4102_v60 = vsel %vm2241_vm4, %v4099_v25, %v4101_v42  ;;  %v7188_v62 = vld [vmem:[#allocation3 + $0x90] sm:$0xff] }
 0x48b   : > { %v9914_v11 = vpop.permute.xlu1 %6768  ;;  %v7072_v28 = vpack.i.bf16 %v4403_v22, %v4401_v52  ;;  %v7102_v13 = vpack.i.bf16 %v4102_v60, %v4100_v41  ;;  %v6675_v37 = vunpack.i.l.bf16 %v9764_v58  ;;  %v6741_v23 = vunpack.i.h.bf16 %v9832_v35 }
 0x48c   : > { %v6736_v61 = vunpack.i.h.bf16 %v9896_v53 }
 0x48d   : > { %7058 = vrot.lane.b32.xlu0 %v7057_v3, %s7223_s16  ;;  %v9923_v10 = vpop.permute.xlu0 %6763  ;;  %7043 = vrot.lane.b32.xlu1 %v7032_v4, %s7225_s18  ;;  %v6680_v4 = vunpack.i.l.bf16 %v9781_v26  ;;  %v6746_v26 = vunpack.i.h.bf16 %v9848_v9 }
 0x48f   : > { %v9930_v19 = vpop.permute.xlu1 %6773  ;;  %v4907_v40 = vsel %vm3118_vm11, %v4875_v2, %v6680_v4  ;;  %v4972_v1 = vsel %vm3184_vm13, %v4940_v63, %v6746_v26  ;;  %v6676_v2 = vunpack.i.h.bf16 %v9764_v58  ;;  %v6740_v4 = vunpack.i.l.bf16 %v9832_v35 }
 0x490   : > { %v4813_v58 = vsel %vm417_vm1, %v7188_v62, %v6670_v38  ;;  %v6770_v63 = vunpack.i.l.bf16 %v9914_v11  ;;  %v6776_v60 = vunpack.i.h.bf16 %v9930_v19  ;;  %v6766_v62 = vunpack.i.h.bf16 %v9923_v10 }
 0x491   : > { %7063 = vrot.lane.b32.xlu0 %v7057_v3, %s7216_s23  ;;  %v6789_v18 = vpop.permute.xlu0 %6788  ;;  %7048 = vrot.lane.b32.xlu1 %v7052_v0, %s7223_s16  ;;  %v4939_v3 = vsel %vm3151_vm12, %v4907_v40, %v6685_v47  ;;  %v4845_v25 = vsel %vm3052_vm9, %v4813_v58, %v6675_v37  ;;  %v6735_v47 = vunpack.i.l.bf16 %v9896_v53  ;;  %v6730_v37 = vunpack.i.l.bf16 %v9873_v12 }
 0x492   : > { %v6791_v0 = vunpack.i.h.bf16 %v6789_v18  ;;  %v6790_v20 = vunpack.i.l.bf16 %v6789_v18  ;;  %v4971_v39 = vsel %vm3184_vm13, %v4939_v3, %v6745_v55  ;;  %v4877_v16 = vsel %vm3085_vm10, %v4845_v25, %v6740_v4 }
 0x493   : > { %v9948_v44 = vpop.permute.xlu1 %6778  ;;  %v6771_v3 = vunpack.i.h.bf16 %v9914_v11  ;;  %v6760_v4 = vunpack.i.l.bf16 %v9905_v56  ;;  %v6765_v58 = vunpack.i.l.bf16 %v9923_v10 }
 0x494   : > { %v5004_v54 = vsel %vm3217_vm14, %v4972_v1, %v6791_v0  ;;  %v5003_v21 = vsel %vm3217_vm14, %v4971_v39, %v6790_v20  ;;  %v6775_v1 = vunpack.i.l.bf16 %v9930_v19 }
 0x495   : > { %7078 = vrot.lane.b32.xlu0 %v7077_v46, %s7226_s19  ;;  %v6794_v9 = vpop.permute.xlu0 %6793  ;;  %7068 = vrot.lane.b32.xlu1 %v7077_v46, %s7224_s17  ;;  %v6671_v46 = vunpack.i.h.bf16 %v9746_v57  ;;  %v7187_v57 = vld [vmem:[#allocation3 + $0x98] sm:$0xff] }
 0x496   : > { %v6796_v48 = vunpack.i.h.bf16 %v6794_v9  ;;  %v6795_v14 = vunpack.i.l.bf16 %v6794_v9 }
 0x497   : > { %v9962_v49 = vpop.permute.xlu1 %6783  ;;  %v4814_v29 = vsel %vm417_vm1, %v7187_v57, %v6671_v46 }
 0x498   : > { %v5035_v50 = vsel %vm3250_vm15, %v5003_v21, %v6795_v14  ;;  %v5036_v5 = vsel %vm3250_vm15, %v5004_v54, %v6796_v48  ;;  %v4846_v42 = vsel %vm3052_vm9, %v4814_v29, %v6676_v2  ;;  %v6781_v21 = vunpack.i.h.bf16 %v9948_v44 }
 0x499   : > { %7098 = vrot.lane.b32.xlu0 %v7097_v45, %s7226_s19  ;;  %v5062_v59 = vpack.c.bf16 %v5036_v5, %v5035_v50  ;;  %7073 = vrot.lane.b32.xlu1 %v7072_v28, %s7225_s18  ;;  %v4878_v35 = vsel %vm3085_vm10, %v4846_v42, %v6741_v23  ;;  %v6780_v50 = vunpack.i.l.bf16 %v9948_v44  ;;  %v6786_v34 = vunpack.i.h.bf16 %v9962_v49 }
 0x49a   : > { %v6785_v27 = vunpack.i.l.bf16 %v9962_v49  ;;  %v6731_v2 = vunpack.i.h.bf16 %v9873_v12  ;;  %v6761_v23 = vunpack.i.h.bf16 %v9905_v56 }
 0x49b   : > { %v9967_v8 = vpop.permute.xlu0 %6818  ;;  %5798 = vmatmul.mubr.msk.bf16.gmra.mxu0 %vm3335_vm2, %v5062_v59  ;;  %v6799_v15 = vpop.permute.xlu1 %6798  ;;  %v7189_v59 = vld [vmem:[#allocation3 + $0xb0] sm:$0xff] }
 0x49c   : > { %v6801_v32 = vunpack.i.h.bf16 %v6799_v15  ;;  %v6800_v7 = vunpack.i.l.bf16 %v6799_v15  ;;  %v4816_v44 = vsel %vm417_vm1, %v7189_v59, %v6781_v21 }
 0x49d   : > { %7103 = vrot.lane.b32.xlu0 %v7102_v13, %s7227_s20  ;;  %7083 = vrot.lane.b32.xlu1 %v7097_v45, %s7214_s21  ;;  %v4848_v49 = vsel %vm3052_vm9, %v4816_v44, %v6786_v34  ;;  %v7192_v34 = vld [vmem:[#allocation3 + $0xc0] sm:$0xff] }
 0x49e   : > { %v4910_v0 = vsel %vm3118_vm11, %v4878_v35, %v6801_v32  ;;  %v4909_v20 = vsel %vm3118_vm11, %v4877_v16, %v6800_v7  ;;  %v4880_v31 = vsel %vm3085_vm10, %v4848_v49, %v6731_v2 }
 0x49f   : > { %v9978_v18 = vpop.permute.xlu0 %6823  ;;  %v6804_v40 = vpop.permute.xlu1 %6803  ;;  %v4912_v57 = vsel %vm3118_vm11, %v4880_v31, %v6761_v23 }
 0x4a0   : > { %v6806_v26 = vunpack.i.h.bf16 %v6804_v40  ;;  %v6805_v55 = vunpack.i.l.bf16 %v6804_v40  ;;  %v6826_v29 = vunpack.i.h.bf16 %v9978_v18  ;;  %v6825_v12 = vunpack.i.l.bf16 %v9978_v18 }
 0x4a1   : > { %7108 = vrot.lane.b32.xlu0 %v7097_v45, %s7224_s17  ;;  %7088 = vrot.lane.b32.xlu1 %v7102_v13, %s7215_s22  ;;  %v4944_v56 = vsel %vm3151_vm12, %v4912_v57, %v6766_v62  ;;  %s5600_s17 = sshll.u32 %s10575_s14, 8 }
 0x4a2   : > { %v4941_v45 = vsel %vm3151_vm12, %v4909_v20, %v6805_v55  ;;  %v4942_v22 = vsel %vm3151_vm12, %v4910_v0, %v6806_v26  ;;  %v4976_v26 = vsel %vm3184_vm13, %v4944_v56, %v6826_v29 }
 0x4a3   : > { %v9992_v52 = vpop.permute.xlu0 %6828  ;;  %v4973_v9 = vsel %vm3184_vm13, %v4941_v45, %v6735_v47  ;;  %v4974_v53 = vsel %vm3184_vm13, %v4942_v22, %v6736_v61  ;;  %v10001_v41 = vpop.permute.xlu1 %6808 }
 0x4a4   : > { %v5005_v11 = vsel %vm3217_vm14, %v4973_v9, %v6770_v63  ;;  %v5006_v48 = vsel %vm3217_vm14, %v4974_v53, %v6771_v3  ;;  %v6751_v63 = vunpack.i.h.bf16 %v9862_v43  ;;  %v6750_v9 = vunpack.i.l.bf16 %v9862_v43 }
 0x4a5   : > { %7113 = vrot.lane.b32.xlu0 %v7102_v13, %s7225_s18  ;;  %7093 = vrot.lane.b32.xlu1 %v7092_v17, %s7226_s19  ;;  %v5037_v14 = vsel %vm3250_vm15, %v5005_v11, %v6775_v1  ;;  %v5038_v54 = vsel %vm3250_vm15, %v5006_v48, %v6776_v60  ;;  %v7190_v13 = vld [vmem:[#allocation3 + $0xa8] sm:$0xff]  ;;  %v6756_v53 = vunpack.i.h.bf16 %v9882_v6  ;;  %v6755_v60 = vunpack.i.l.bf16 %v9882_v6  ;;  %s10355_s19 = scalar_lea.vmem %s10496_s10, %s5600_s17 }
 0x4a6   : > { %v5063_v5 = vpack.c.bf16 %v5038_v54, %v5037_v14  ;;  %v6821_v11 = vunpack.i.h.bf16 %v9967_v8  ;;  %v6820_v48 = vunpack.i.l.bf16 %v9967_v8  ;;  %v4817_v43 = vsel %vm417_vm1, %v7192_v34, %v6750_v9 }
 0x4a7   : > { %v10006_v39 = vpop.permute.xlu0 %6833  ;;  %v10018_v19 = vpop.permute.xlu1 %6813 }
 0x4a8   : > { %5801 = vmatprep.mubr.msk.bf16.mxu0 %vm3335_vm2, %v5063_v5  ;;  %v6815_v49 = vunpack.i.l.bf16 %v10018_v19 }
 0x4a9   : > { %7118 = vrot.lane.b32.xlu0 %v7072_v28, %s7227_s20  ;;  %7123 = vrot.lane.b32.xlu1 %v7122_v36, %s7227_s20  ;;  %v4815_v28 = vsel %vm417_vm1, %v7190_v13, %v6780_v50  ;;  %v7191_v50 = vld [vmem:[#allocation3 + $0xc8] sm:$0xff] }
 0x4aa   : > { %v4847_v38 = vsel %vm3052_vm9, %v4815_v28, %v6785_v27  ;;  %v4818_v5 = vsel %vm417_vm1, %v7191_v50, %v6751_v63  ;;  %v4849_v27 = vsel %vm3052_vm9, %v4817_v43, %v6755_v60  ;;  %v6811_v63 = vunpack.i.h.bf16 %v10001_v41 }
 0x4ab   : > { %v10024_v17 = vpop.permute.xlu0 %6838  ;;  %v10032_v46 = vpop.permute.xlu1 %6848  ;;  %v4879_v51 = vsel %vm3085_vm10, %v4847_v38, %v6730_v37  ;;  %v4850_v6 = vsel %vm3052_vm9, %v4818_v5, %v6756_v53  ;;  %v4881_v13 = vsel %vm3085_vm10, %v4849_v27, %v6820_v48  ;;  %v6816_v38 = vunpack.i.h.bf16 %v10018_v19 }
 0x4ac   : > { %v4911_v7 = vsel %vm3118_vm11, %v4879_v51, %v6760_v4  ;;  %v4882_v44 = vsel %vm3085_vm10, %v4850_v6, %v6821_v11  ;;  %v6851_v4 = vunpack.i.h.bf16 %v10032_v46  ;;  %v6841_v11 = vunpack.i.h.bf16 %v10024_v17 }
 0x4ad   : > { %v4943_v35 = vsel %vm3151_vm12, %v4911_v7, %v6765_v58  ;;  %v6840_v48 = vunpack.i.l.bf16 %v10024_v17 }
 0x4ae   : > { %v4975_v55 = vsel %vm3184_vm13, %v4943_v35, %v6825_v12 }
 0x4af   : > { %v10038_v15 = vpop.permute.xlu0 %6843  ;;  %v10042_v36 = vpop.permute.xlu1 %6853 }
 0x4b0   : > { %v6856_v19 = vunpack.i.h.bf16 %v10042_v36  ;;  %v6855_v12 = vunpack.i.l.bf16 %v10042_v36  ;;  %v6846_v34 = vunpack.i.h.bf16 %v10038_v15  ;;  %v6845_v43 = vunpack.i.l.bf16 %v10038_v15 }
 0x4b3   : > { %v6869_v32 = vpop.permute.xlu0 %6868  ;;  %v10052_v40 = vpop.permute.xlu1 %6858 }
 0x4b4   : > { %v6871_v25 = vunpack.i.h.bf16 %v6869_v32  ;;  %v6870_v42 = vunpack.i.l.bf16 %v6869_v32  ;;  %v6850_v32 = vunpack.i.l.bf16 %v10032_v46  ;;  %v6861_v35 = vunpack.i.h.bf16 %v10052_v40 }
 0x4b5   : > { %v6860_v56 = vunpack.i.l.bf16 %v10052_v40 }
 0x4b6   : > { %v5008_v18 = vsel %vm3217_vm14, %v4976_v26, %v6871_v25  ;;  %v5007_v0 = vsel %vm3217_vm14, %v4975_v55, %v6870_v42 }
 0x4b7   : > { %v6874_v16 = vpop.permute.xlu0 %6873  ;;  %v6864_v10 = vpop.permute.xlu1 %6863 }
 0x4b8   : > { %v6876_v61 = vunpack.i.h.bf16 %v6874_v16  ;;  %v6875_v47 = vunpack.i.l.bf16 %v6874_v16  ;;  %v6866_v55 = vunpack.i.h.bf16 %v6864_v10 }
 0x4ba   : > { %v5039_v20 = vsel %vm3250_vm15, %v5007_v0, %v6875_v47  ;;  %v5040_v45 = vsel %vm3250_vm15, %v5008_v18, %v6876_v61  ;;  %v6865_v61 = vunpack.i.l.bf16 %v6864_v10  ;;  %v7193_v47 = vld [vmem:[#allocation3 + $0xe0] sm:$0xff]  ;;  %v7194_v0 = vld [vmem:[#allocation3 + $0xd8] sm:$0xff]  ;;  %v6810_v10 = vunpack.i.l.bf16 %v10001_v41 }
 0x4bb   : > { %v5064_v22 = vpack.c.bf16 %v5040_v45, %v5039_v20  ;;  %v10062_v3 = vpop.permute.xlu0 %6898  ;;  %v6879_v1 = vpop.permute.xlu1 %6878  ;;  %v4820_v18 = vsel %vm417_vm1, %v7193_v47, %v6861_v35  ;;  %v4819_v20 = vsel %vm417_vm1, %v7194_v0, %v6860_v56  ;;  %v7195_v56 = vld [vmem:[#allocation3 + $0xf8] sm:$0xff] }
 0x4bc   : > { %v6881_v14 = vunpack.i.h.bf16 %v6879_v1  ;;  %v6880_v54 = vunpack.i.l.bf16 %v6879_v1  ;;  %v4852_v40 = vsel %vm3052_vm9, %v4820_v18, %v6866_v55  ;;  %v7196_v55 = vld [vmem:[#allocation3 + $0xf0] sm:$0xff] }
 0x4bd   : > { %5802 = vmatmul.mubr.msk.bf16.gmra.mxu0 %vm3335_vm2, %v5064_v22  ;;  %v4851_v22 = vsel %vm3052_vm9, %v4819_v20, %v6865_v61  ;;  %v4884_v60 = vsel %vm3085_vm10, %v4852_v40, %v6811_v63 }
 0x4be   : > { %v4914_v2 = vsel %vm3118_vm11, %v4882_v44, %v6881_v14  ;;  %v4913_v37 = vsel %vm3118_vm11, %v4881_v13, %v6880_v54  ;;  %v4883_v53 = vsel %vm3085_vm10, %v4851_v22, %v6810_v10  ;;  %v4916_v50 = vsel %vm3118_vm11, %v4884_v60, %v6841_v11 }
 0x4bf   : > { %v10071_v21 = vpop.permute.xlu0 %6903  ;;  %v6884_v59 = vpop.permute.xlu1 %6883  ;;  %v4915_v54 = vsel %vm3118_vm11, %v4883_v53, %v6840_v48  ;;  %v4948_v17 = vsel %vm3151_vm12, %v4916_v50, %v6846_v34 }
 0x4c0   : > { %v6886_v8 = vunpack.i.h.bf16 %v6884_v59  ;;  %v6885_v28 = vunpack.i.l.bf16 %v6884_v59  ;;  %v6906_v5 = vunpack.i.h.bf16 %v10071_v21  ;;  %v6905_v41 = vunpack.i.l.bf16 %v10071_v21 }
 0x4c1   : > { %v4947_v44 = vsel %vm3151_vm12, %v4915_v54, %v6845_v43 }
 0x4c2   : > { %v4945_v31 = vsel %vm3151_vm12, %v4913_v37, %v6885_v28  ;;  %v4946_v23 = vsel %vm3151_vm12, %v4914_v2, %v6886_v8  ;;  %v4980_v8 = vsel %vm3184_vm13, %v4948_v17, %v6906_v5  ;;  %v4979_v28 = vsel %vm3184_vm13, %v4947_v44, %v6905_v41 }
 0x4c3   : > { %v10083_v51 = vpop.permute.xlu0 %6908  ;;  %v4977_v7 = vsel %vm3184_vm13, %v4945_v31, %v6815_v49  ;;  %v4978_v57 = vsel %vm3184_vm13, %v4946_v23, %v6816_v38  ;;  %v10091_v29 = vpop.permute.xlu1 %6888 }
 0x4c4   : > { %v5009_v58 = vsel %vm3217_vm14, %v4977_v7, %v6850_v32  ;;  %v5010_v25 = vsel %vm3217_vm14, %v4978_v57, %v6851_v4  ;;  %v6831_v32 = vunpack.i.h.bf16 %v9992_v52  ;;  %v6830_v7 = vunpack.i.l.bf16 %v9992_v52 }
 0x4c5   : > { %v5041_v42 = vsel %vm3250_vm15, %v5009_v58, %v6855_v12  ;;  %v5042_v46 = vsel %vm3250_vm15, %v5010_v25, %v6856_v19  ;;  %v6836_v57 = vunpack.i.h.bf16 %v10006_v39  ;;  %v6835_v19 = vunpack.i.l.bf16 %v10006_v39 }
 0x4c6   : > { %v5065_v26 = vpack.c.bf16 %v5042_v46, %v5041_v42  ;;  %v6901_v58 = vunpack.i.h.bf16 %v10062_v3  ;;  %v6900_v25 = vunpack.i.l.bf16 %v10062_v3  ;;  %v4821_v52 = vsel %vm417_vm1, %v7196_v55, %v6830_v7 }
 0x4c7   : > { %v10095_v62 = vpop.permute.xlu0 %6913  ;;  %v10103_v16 = vpop.permute.xlu1 %6893  ;;  %v4853_v61 = vsel %vm3052_vm9, %v4821_v52, %v6835_v19 }
 0x4c8   : > { %5805 = vmatprep.mubr.msk.bf16.mxu0 %vm3335_vm2, %v5065_v26  ;;  %v4822_v26 = vsel %vm417_vm1, %v7195_v56, %v6831_v32  ;;  %v4885_v0 = vsel %vm3085_vm10, %v4853_v61, %v6900_v25  ;;  %v6896_v22 = vunpack.i.h.bf16 %v10103_v16  ;;  %v6895_v40 = vunpack.i.l.bf16 %v10103_v16 }
 0x4c9   : > { %v4854_v39 = vsel %vm3052_vm9, %v4822_v26, %v6836_v57  ;;  %v6891_v32 = vunpack.i.h.bf16 %v10091_v29 }
 0x4ca   : > { %v4886_v18 = vsel %vm3085_vm10, %v4854_v39, %v6901_v58 }
 0x4cb   : > { %v10106_v36 = vpop.permute.xlu0 %6918  ;;  %v10110_v45 = vpop.permute.xlu1 %6928 }
 0x4cc   : > { %v6931_v48 = vunpack.i.h.bf16 %v10110_v45  ;;  %v6921_v58 = vunpack.i.h.bf16 %v10106_v36  ;;  %v6920_v25 = vunpack.i.l.bf16 %v10106_v36 }
 0x4cf   : > { %v10116_v9 = vpop.permute.xlu0 %6923  ;;  %v10120_v1 = vpop.permute.xlu1 %6933 }
 0x4d0   : > { %v6936_v16 = vunpack.i.h.bf16 %v10120_v1  ;;  %v6935_v41 = vunpack.i.l.bf16 %v10120_v1  ;;  %v6926_v55 = vunpack.i.h.bf16 %v10116_v9  ;;  %v6925_v52 = vunpack.i.l.bf16 %v10116_v9 }
 0x4d3   : > { %v6949_v14 = vpop.permute.xlu0 %6948  ;;  %v10130_v59 = vpop.permute.xlu1 %6938 }
 0x4d4   : > { %v6951_v27 = vunpack.i.h.bf16 %v6949_v14  ;;  %v6950_v6 = vunpack.i.l.bf16 %v6949_v14  ;;  %v6930_v14 = vunpack.i.l.bf16 %v10110_v45  ;;  %v6941_v44 = vunpack.i.h.bf16 %v10130_v59 }
 0x4d5   : > { %v6940_v17 = vunpack.i.l.bf16 %v10130_v59 }
 0x4d6   : > { %v5012_v21 = vsel %vm3217_vm14, %v4980_v8, %v6951_v27  ;;  %v5011_v2 = vsel %vm3217_vm14, %v4979_v28, %v6950_v6 }
 0x4d7   : > { %v6954_v13 = vpop.permute.xlu0 %6953  ;;  %v6944_v15 = vpop.permute.xlu1 %6943 }
 0x4d8   : > { %v6956_v38 = vunpack.i.h.bf16 %v6954_v13  ;;  %v6955_v49 = vunpack.i.l.bf16 %v6954_v13  ;;  %v6946_v28 = vunpack.i.h.bf16 %v6944_v15 }
 0x4da   : > { %v5043_v37 = vsel %vm3250_vm15, %v5011_v2, %v6955_v49  ;;  %v5044_v31 = vsel %vm3250_vm15, %v5012_v21, %v6956_v38  ;;  %v6945_v38 = vunpack.i.l.bf16 %v6944_v15  ;;  %v7197_v49 = vld [vmem:[#allocation3 + $0x110] sm:$0xff]  ;;  %v7198_v2 = vld [vmem:[#allocation3 + $0x108] sm:$0xff]  ;;  %v6890_v15 = vunpack.i.l.bf16 %v10091_v29 }
 0x4db   : > { %v5066_v23 = vpack.c.bf16 %v5044_v31, %v5043_v37  ;;  %v10140_v4 = vpop.permute.xlu0 %6978  ;;  %v6959_v12 = vpop.permute.xlu1 %6958  ;;  %v4824_v21 = vsel %vm417_vm1, %v7197_v49, %v6941_v44  ;;  %v4823_v37 = vsel %vm417_vm1, %v7198_v2, %v6940_v17  ;;  %v7200_v44 = vld [vmem:[#allocation3 + $0x120] sm:$0xff] }
 0x4dc   : > { %v6961_v42 = vunpack.i.h.bf16 %v6959_v12  ;;  %v6960_v46 = vunpack.i.l.bf16 %v6959_v12  ;;  %v4856_v59 = vsel %vm3052_vm9, %v4824_v21, %v6946_v28 }
 0x4dd   : > { %5806 = vmatmul.mubr.msk.bf16.gmra.mxu0 %vm3335_vm2, %v5066_v23  ;;  %v4855_v23 = vsel %vm3052_vm9, %v4823_v37, %v6945_v38  ;;  %v4888_v19 = vsel %vm3085_vm10, %v4856_v59, %v6891_v32 }
 0x4de   : > { %v4918_v63 = vsel %vm3118_vm11, %v4886_v18, %v6961_v42  ;;  %v4917_v10 = vsel %vm3118_vm11, %v4885_v0, %v6960_v46  ;;  %v4887_v57 = vsel %vm3085_vm10, %v4855_v23, %v6890_v15  ;;  %v4920_v56 = vsel %vm3118_vm11, %v4888_v19, %v6921_v58 }
 0x4df   : > { %v10149_v35 = vpop.permute.xlu0 %6983  ;;  %v6964_v47 = vpop.permute.xlu1 %6963  ;;  %v4919_v46 = vsel %vm3118_vm11, %v4887_v57, %v6920_v25  ;;  %v4952_v36 = vsel %vm3151_vm12, %v4920_v56, %v6926_v55  ;;  %v7201_v55 = vld [vmem:[#allocation3 + $0x140] sm:$0xff] }
 0x4e0   : > { %v6966_v3 = vunpack.i.h.bf16 %v6964_v47  ;;  %v6965_v20 = vunpack.i.l.bf16 %v6964_v47  ;;  %v6986_v26 = vunpack.i.h.bf16 %v10149_v35  ;;  %v6985_v29 = vunpack.i.l.bf16 %v10149_v35 }
 0x4e1   : > { %v4951_v18 = vsel %vm3151_vm12, %v4919_v46, %v6925_v52 }
 0x4e2   : > { %v4949_v60 = vsel %vm3151_vm12, %v4917_v10, %v6965_v20  ;;  %v4950_v11 = vsel %vm3151_vm12, %v4918_v63, %v6966_v3  ;;  %v4984_v3 = vsel %vm3184_vm13, %v4952_v36, %v6986_v26  ;;  %v4983_v20 = vsel %vm3184_vm13, %v4951_v18, %v6985_v29 }
 0x4e3   : > { %v10161_v53 = vpop.permute.xlu0 %6988  ;;  %v4981_v54 = vsel %vm3184_vm13, %v4949_v60, %v6895_v40  ;;  %v4982_v50 = vsel %vm3184_vm13, %v4950_v11, %v6896_v22  ;;  %v10169_v5 = vpop.permute.xlu1 %6968  ;;  %v6911_v11 = vunpack.i.h.bf16 %v10083_v51 }
 0x4e4   : > { %v5013_v43 = vsel %vm3217_vm14, %v4981_v54, %v6930_v14  ;;  %v5014_v27 = vsel %vm3217_vm14, %v4982_v50, %v6931_v48  ;;  %v6910_v48 = vunpack.i.l.bf16 %v10083_v51  ;;  %v6916_v50 = vunpack.i.h.bf16 %v10095_v62 }
 0x4e5   : > { %v5045_v6 = vsel %vm3250_vm15, %v5013_v43, %v6935_v41  ;;  %v5046_v45 = vsel %vm3250_vm15, %v5014_v27, %v6936_v16  ;;  %v6915_v16 = vunpack.i.l.bf16 %v10095_v62  ;;  %v6981_v41 = vunpack.i.h.bf16 %v10140_v4 }
 0x4e6   : > { %v5067_v8 = vpack.c.bf16 %v5046_v45, %v5045_v6  ;;  %v6980_v43 = vunpack.i.l.bf16 %v10140_v4  ;;  %v7199_v6 = vld [vmem:[#allocation3 + $0x128] sm:$0xff]  ;;  %v4825_v51 = vsel %vm417_vm1, %v7200_v44, %v6910_v48 }
 0x4e7   : > { %v10173_v34 = vpop.permute.xlu0 %6993  ;;  %v10181_v13 = vpop.permute.xlu1 %6973  ;;  %v4826_v45 = vsel %vm417_vm1, %v7199_v6, %v6911_v11  ;;  %v4857_v38 = vsel %vm3052_vm9, %v4825_v51, %v6915_v16  ;;  %v6991_v16 = vunpack.i.h.bf16 %v10161_v53 }
 0x4e8   : > { %5809 = vmatprep.mubr.msk.bf16.mxu0 %vm3335_vm2, %v5067_v8  ;;  %v4858_v62 = vsel %vm3052_vm9, %v4826_v45, %v6916_v50  ;;  %v4889_v4 = vsel %vm3085_vm10, %v4857_v38, %v6980_v43  ;;  %v6976_v57 = vunpack.i.h.bf16 %v10181_v13  ;;  %v6975_v19 = vunpack.i.l.bf16 %v10181_v13 }
 0x4e9   : > { %v4890_v49 = vsel %vm3085_vm10, %v4858_v62, %v6981_v41  ;;  %v6995_v41 = vunpack.i.l.bf16 %v10173_v34  ;;  %v6500_v62 = vunpack.i.l.bf16 %v9511_v30 }
 0x4eb   : > { %v10184_v1 = vpop.permute.xlu0 %6998  ;;  %v10188_v31 = vpop.permute.xlu1 %7008 }
 0x4ec   : > { %v7011_v46 = vunpack.i.h.bf16 %v10188_v31  ;;  %v7010_v56 = vunpack.i.l.bf16 %v10188_v31  ;;  %v7000_v50 = vunpack.i.l.bf16 %v10184_v1 }
 0x4ef   : > { %v10194_v7 = vpop.permute.xlu0 %7003  ;;  %v10198_v12 = vpop.permute.xlu1 %7013 }
 0x4f0   : > { %v7016_v36 = vunpack.i.h.bf16 %v10198_v12  ;;  %v7015_v31 = vunpack.i.l.bf16 %v10198_v12  ;;  %v7006_v51 = vunpack.i.h.bf16 %v10194_v7 }
 0x4f3   : > { %v7029_v42 = vpop.permute.xlu0 %7028  ;;  %v7019_v47 = vpop.permute.xlu1 %7018 }
 0x4f4   : > { %v7031_v61 = vunpack.i.h.bf16 %v7029_v42  ;;  %v7030_v39 = vunpack.i.l.bf16 %v7029_v42  ;;  %v7021_v21 = vunpack.i.h.bf16 %v7019_v47  ;;  %v7020_v2 = vunpack.i.l.bf16 %v7019_v47 }
 0x4f6   : > { %v5016_v35 = vsel %vm3217_vm14, %v4984_v3, %v7031_v61  ;;  %v5015_v63 = vsel %vm3217_vm14, %v4983_v20, %v7030_v39  ;;  %v4828_v52 = vsel %vm417_vm1, %v7201_v55, %v7021_v21  ;;  %v7202_v61 = vld [vmem:[#allocation3 + $0x138] sm:$0xff]  ;;  %v6971_v20 = vunpack.i.h.bf16 %v10169_v5 }
 0x4f7   : > { %v7034_v0 = vpop.permute.xlu0 %7033  ;;  %v7024_v10 = vpop.permute.xlu1 %7023  ;;  %v4827_v39 = vsel %vm417_vm1, %v7202_v61, %v7020_v2  ;;  %v6996_v21 = vunpack.i.h.bf16 %v10173_v34 }
 0x4f8   : > { %v7036_v22 = vunpack.i.h.bf16 %v7034_v0  ;;  %v7035_v40 = vunpack.i.l.bf16 %v7034_v0  ;;  %v7026_v23 = vunpack.i.h.bf16 %v7024_v10  ;;  %v7025_v59 = vunpack.i.l.bf16 %v7024_v10 }
 0x4fa   : > { %v5047_v9 = vsel %vm3250_vm15, %v5015_v63, %v7035_v40  ;;  %v5048_v60 = vsel %vm3250_vm15, %v5016_v35, %v7036_v22  ;;  %v4859_v0 = vsel %vm3052_vm9, %v4827_v39, %v7025_v59  ;;  %v4860_v3 = vsel %vm3052_vm9, %v4828_v52, %v7026_v23 }
 0x4fb   : > { %v5068_v14 = vpack.c.bf16 %v5048_v60, %v5047_v9  ;;  %v10218_v54 = vpop.permute.xlu0 %7053  ;;  %v7039_v27 = vpop.permute.xlu1 %7038  ;;  %v6970_v22 = vunpack.i.l.bf16 %v10169_v5  ;;  %v4892_v60 = vsel %vm3085_vm10, %v4860_v3, %v6971_v20  ;;  %v7001_v5 = vunpack.i.h.bf16 %v10184_v1 }
 0x4fc   : > { %v7041_v17 = vunpack.i.h.bf16 %v7039_v27  ;;  %v7040_v8 = vunpack.i.l.bf16 %v7039_v27  ;;  %v7055_v52 = vunpack.i.l.bf16 %v10218_v54 }
 0x4fd   : > { %5810 = vmatmul.mubr.msk.bf16.gmra.mxu0 %vm3335_vm2, %v5068_v14  ;;  %v4891_v12 = vsel %vm3085_vm10, %v4859_v0, %v6970_v22  ;;  %v6990_v14 = vunpack.i.l.bf16 %v10161_v53  ;;  %v4924_v6 = vsel %vm3118_vm11, %v4892_v60, %v7001_v5  ;;  %v6501_v53 = vunpack.i.h.bf16 %v9511_v30 }
 0x4fe   : > { %v4922_v58 = vsel %vm3118_vm11, %v4890_v49, %v7041_v17  ;;  %v4921_v25 = vsel %vm3118_vm11, %v4889_v4, %v7040_v8  ;;  %v4923_v27 = vsel %vm3118_vm11, %v4891_v12, %v7000_v50  ;;  %v7005_v17 = vunpack.i.l.bf16 %v10194_v7  ;;  %v7203_v49 = vld [vmem:[#allocation3 + $0x150] sm:$0xff] }
 0x4ff   : > { %v10227_v28 = vpop.permute.xlu0 %7058  ;;  %v7044_v37 = vpop.permute.xlu1 %7043  ;;  %v4829_v4 = vsel %vm417_vm1, %v7203_v49, %v6990_v14  ;;  %v4956_v7 = vsel %vm3151_vm12, %v4924_v6, %v7006_v51 }
 0x500   : > { %v7046_v32 = vunpack.i.h.bf16 %v7044_v37  ;;  %v7045_v15 = vunpack.i.l.bf16 %v7044_v37  ;;  %v7061_v2 = vunpack.i.h.bf16 %v10227_v28  ;;  %v7060_v37 = vunpack.i.l.bf16 %v10227_v28 }
 0x501   : > { %v4955_v23 = vsel %vm3151_vm12, %v4923_v27, %v7005_v17  ;;  %v4861_v34 = vsel %vm3052_vm9, %v4829_v4, %v6995_v41 }
 0x502   : > { %v4953_v26 = vsel %vm3151_vm12, %v4921_v25, %v7045_v15  ;;  %v4954_v29 = vsel %vm3151_vm12, %v4922_v58, %v7046_v32  ;;  %v7204_v58 = vld [vmem:[#allocation3 + $0x158] sm:$0xff] }
 0x503   : > { %v7064_v42 = vpop.permute.xlu0 %7063  ;;  %v4985_v13 = vsel %vm3184_vm13, %v4953_v26, %v6975_v19  ;;  %v4986_v47 = vsel %vm3184_vm13, %v4954_v29, %v6976_v57  ;;  %v10245_v18 = vpop.permute.xlu1 %7048  ;;  %v4830_v25 = vsel %vm417_vm1, %v7204_v58, %v6991_v16  ;;  %v7056_v26 = vunpack.i.h.bf16 %v10218_v54 }
 0x504   : > { %v5017_v35 = vsel %vm3217_vm14, %v4985_v13, %v7010_v56  ;;  %v5018_v63 = vsel %vm3217_vm14, %v4986_v47, %v7011_v46  ;;  %v7066_v45 = vunpack.i.h.bf16 %v7064_v42  ;;  %v7065_v44 = vunpack.i.l.bf16 %v7064_v42 }
 0x505   : > { %v5049_v10 = vsel %vm3250_vm15, %v5017_v35, %v7015_v31  ;;  %v5050_v9 = vsel %vm3250_vm15, %v5018_v63, %v7016_v36  ;;  %v4862_v56 = vsel %vm3052_vm9, %v4830_v25, %v6996_v21  ;;  %v4893_v31 = vsel %vm3085_vm10, %v4861_v34, %v7060_v37 }
 0x506   : > { %v5069_v48 = vpack.c.bf16 %v5050_v9, %v5049_v10  ;;  %v4988_v32 = vsel %vm3184_vm13, %v4956_v7, %v7066_v45  ;;  %v4987_v15 = vsel %vm3184_vm13, %v4955_v23, %v7065_v44  ;;  %v4894_v36 = vsel %vm3085_vm10, %v4862_v56, %v7061_v2  ;;  %v10326_v7 = vld [vmem:[%s10494_s8] ss:$0 sm:$0xff] }
 0x507   : > { %v10253_v40 = vpop.permute.xlu0 %7078  ;;  %v10261_v11 = vpop.permute.xlu1 %7068  ;;  %v7051_v0 = vunpack.i.h.bf16 %v10245_v18  ;;  %v7050_v3 = vunpack.i.l.bf16 %v10245_v18 }
 0x508   : > { %5813 = vmatprep.mubr.msk.bf16.mxu0 %vm3335_vm2, %v5069_v48  ;;  %v7081_v20 = vunpack.i.h.bf16 %v10253_v40  ;;  %v7080_v22 = vunpack.i.l.bf16 %v10253_v40  ;;  %v7071_v10 = vunpack.i.h.bf16 %v10261_v11  ;;  %v7070_v9 = vunpack.i.l.bf16 %v10261_v11 }
 0x50b   : > { %v7099_v43 = vpop.permute.xlu0 %7098  ;;  %v10273_v1 = vpop.permute.xlu1 %7073 }
 0x50c   : > { %v7101_v8 = vunpack.i.h.bf16 %v7099_v43  ;;  %v7100_v38 = vunpack.i.l.bf16 %v7099_v43  ;;  %v7076_v48 = vunpack.i.h.bf16 %v10273_v1  ;;  %v7075_v14 = vunpack.i.l.bf16 %v10273_v1 }
 0x50e   : > { %v5020_v42 = vsel %vm3217_vm14, %v4988_v32, %v7101_v8  ;;  %v5019_v28 = vsel %vm3217_vm14, %v4987_v15, %v7100_v38 }
 0x50f   : > { %v7104_v59 = vpop.permute.xlu0 %7103  ;;  %v7084_v46 = vpop.permute.xlu1 %7083 }
 0x510   : > { %v7106_v57 = vunpack.i.h.bf16 %v7104_v59  ;;  %v7105_v19 = vunpack.i.l.bf16 %v7104_v59  ;;  %v7086_v39 = vunpack.i.h.bf16 %v7084_v46  ;;  %v7085_v13 = vunpack.i.l.bf16 %v7084_v46 }
 0x512   : > { %v5051_v29 = vsel %vm3250_vm15, %v5019_v28, %v7105_v19  ;;  %v5052_v55 = vsel %vm3250_vm15, %v5020_v42, %v7106_v57  ;;  %v4832_v18 = vsel %vm417_vm1, %v9891_v33, %v7086_v39  ;;  %v4831_v40 = vsel %vm417_vm1, %v9902_v24, %v7085_v13  ;;  %v10341_v42 = vld [vmem:[%s10495_s9] ss:$0 sm:$0xff] }
 0x513   : > { %v5070_v61 = vpack.c.bf16 %v5052_v55, %v5051_v29  ;;  %v7109_v47 = vpop.permute.xlu0 %7108  ;;  %v7089_v54 = vpop.permute.xlu1 %7088 }
 0x514   : > { %v7111_v35 = vunpack.i.h.bf16 %v7109_v47  ;;  %v7110_v63 = vunpack.i.l.bf16 %v7109_v47  ;;  %v7091_v12 = vunpack.i.h.bf16 %v7089_v54  ;;  %v7090_v60 = vunpack.i.l.bf16 %v7089_v54 }
 0x515   : > { %5814 = vmatmul.mubr.msk.bf16.gmra.mxu0 %vm3335_vm2, %v5070_v61 }
 0x516   : > { %v4863_v50 = vsel %vm3052_vm9, %v4831_v40, %v7090_v60  ;;  %v4864_v16 = vsel %vm3052_vm9, %v4832_v18, %v7091_v12  ;;  %v4926_v11 = vsel %vm3118_vm11, %v4894_v36, %v7111_v35  ;;  %v4925_v27 = vsel %vm3118_vm11, %v4893_v31, %v7110_v63 }
 0x517   : > { %v7114_v5 = vpop.permute.xlu0 %7113  ;;  %v4895_v6 = vsel %vm3085_vm10, %v4863_v50, %v7050_v3  ;;  %v4896_v45 = vsel %vm3085_vm10, %v4864_v16, %v7051_v0  ;;  %v7094_v44 = vpop.permute.xlu1 %7093 }
 0x518   : > { %v7116_v41 = vunpack.i.h.bf16 %v7114_v5  ;;  %v7115_v43 = vunpack.i.l.bf16 %v7114_v5  ;;  %v4927_v33 = vsel %vm3118_vm11, %v4895_v6, %v7070_v9  ;;  %v4928_v24 = vsel %vm3118_vm11, %v4896_v45, %v7071_v10 }
 0x519   : > { %v7096_v1 = vunpack.i.h.bf16 %v7094_v44  ;;  %v7095_v49 = vunpack.i.l.bf16 %v7094_v44  ;;  %v4959_v21 = vsel %vm3151_vm12, %v4927_v33, %v7075_v14  ;;  %v4960_v2 = vsel %vm3151_vm12, %v4928_v24, %v7076_v48 }
 0x51a   : > { %v4957_v51 = vsel %vm3151_vm12, %v4925_v27, %v7115_v43  ;;  %v4958_v17 = vsel %vm3151_vm12, %v4926_v11, %v7116_v41  ;;  %v4991_v59 = vsel %vm3184_vm13, %v4959_v21, %v6500_v62  ;;  %v4992_v32 = vsel %vm3184_vm13, %v4960_v2, %v6501_v53 }
 0x51b   : > { %v4989_v8 = vsel %vm3184_vm13, %v4957_v51, %v7055_v52  ;;  %v4990_v38 = vsel %vm3184_vm13, %v4958_v17, %v7056_v26  ;;  %v7119_v4 = vpop.permute.xlu0 %7118  ;;  %v5791_v19 = vpop.f32.mrf.mxu0  ;;  %v5023_v56 = vsel %vm3217_vm14, %v4991_v59, %v7095_v49  ;;  %v5024_v26 = vsel %vm3217_vm14, %v4992_v32, %v7096_v1 }
 0x51c   : > { %v7121_v37 = vunpack.i.h.bf16 %v7119_v4  ;;  %v7120_v23 = vunpack.i.l.bf16 %v7119_v4  ;;  %v5021_v15 = vsel %vm3217_vm14, %v4989_v8, %v7080_v22  ;;  %v5022_v57 = vsel %vm3217_vm14, %v4990_v38, %v7081_v20  ;;  %v7124_v58 = vpop.permute.xlu1 %7123 }
 0x51d   : > { %v5330_v30 = vmul.f32 %v5791_v19, %v10326_v7  ;;  %v7126_v53 = vunpack.i.h.bf16 %v7124_v58  ;;  %v7125_v28 = vunpack.i.l.bf16 %v7124_v58  ;;  %v5194_v46 = vpop.f32.mrf.mxu0 }
 0x51e   : > { %v5053_v25 = vsel %vm3250_vm15, %v5021_v15, %v7120_v23  ;;  %v5054_v34 = vsel %vm3250_vm15, %v5022_v57, %v7121_v37  ;;  %v5328_v29 = vmul.f32 %v10326_v7, %v5194_v46 }
 0x51f   : > { %v5071_v62 = vpack.c.bf16 %v5054_v34, %v5053_v25  ;;  %v5369_v55 = vadd.f32 %v10341_v42, %v5330_v30  ;;  %v5055_v52 = vsel %vm3250_vm15, %v5023_v56, %v7125_v28  ;;  %v5056_v61 = vsel %vm3250_vm15, %v5024_v26, %v7126_v53  ;;  %v5792_v39 = vpop.f32.mrf.mxu0 }
 0x520   : > { %v5072_v13 = vpack.c.bf16 %v5056_v61, %v5055_v52  ;;  %v5367_v47 = vadd.f32 %v10341_v42, %v5328_v29  ;;  %v5331_v36 = vmul.f32 %v5792_v39, %v10326_v7 }
 0x521   : > { %5817 = vmatprep.mubr.msk.bf16.mxu0 %vm3335_vm2, %v5071_v62  ;;  %v5401_v31 = vmax.f32 %v5369_v55, 0.0  ;;  %v5197_v0 = vpop.f32.mrf.mxu0 }
 0x522   : > { %v5399_v3 = vmax.f32 %v5367_v47, 0.0  ;;  %v5370_v20 = vadd.f32 %v10341_v42, %v5331_v36  ;;  %v5329_v22 = vmul.f32 %v10326_v7, %v5197_v0  ;;  %5818 = vmatmul.mubr.msk.bf16.gmra.mxu0 %vm3335_vm2, %v5072_v13 }
 0x523   : > { %5433 = vst.msk [vmem:[%s10355_s19 + $0x10] sm:$0xff] %vm417_vm1, %v5401_v31 }
 0x524   : > { %5431 = vst.msk [vmem:[%s10355_s19] sm:$0xff] %vm417_vm1, %v5399_v3  ;;  %v5402_v35 = vmax.f32 %v5370_v20, 0.0  ;;  %v5368_v63 = vadd.f32 %v10341_v42, %v5329_v22 }
 0x526   : > { %5434 = vst.msk [vmem:[%s10355_s19 + $0x18] sm:$0xff] %vm417_vm1, %v5402_v35  ;;  %v5400_v54 = vmax.f32 %v5368_v63, 0.0 }
 0x528   : > { %5432 = vst.msk [vmem:[%s10355_s19 + $0x8] sm:$0xff] %vm417_vm1, %v5400_v54 }
 0x53b   : > { %v5795_v10 = vpop.f32.mrf.mxu0 }
 0x53c   : > { %v5334_v9 = vmul.f32 %v5795_v10, %v10326_v7 }
 0x53d   : > { %v5210_v12 = vpop.f32.mrf.mxu0 }
 0x53e   : > { %v5373_v60 = vadd.f32 %v10341_v42, %v5334_v9  ;;  %v5332_v48 = vmul.f32 %v10326_v7, %v5210_v12 }
 0x53f   : > { %v5796_v14 = vpop.f32.mrf.mxu0 }
 0x540   : > { %v5405_v18 = vmax.f32 %v5373_v60, 0.0  ;;  %v5371_v40 = vadd.f32 %v10341_v42, %v5332_v48  ;;  %v5335_v5 = vmul.f32 %v5796_v14, %v10326_v7 }
 0x541   : > { %v5213_v50 = vpop.f32.mrf.mxu0 }
 0x542   : > { %5437 = vst.msk [vmem:[%s10355_s19 + $0x30] sm:$0xff] %vm417_vm1, %v5405_v18  ;;  %v5403_v16 = vmax.f32 %v5371_v40, 0.0  ;;  %v5374_v41 = vadd.f32 %v10341_v42, %v5335_v5  ;;  %v5333_v43 = vmul.f32 %v10326_v7, %v5213_v50 }
 0x544   : > { %5435 = vst.msk [vmem:[%s10355_s19 + $0x20] sm:$0xff] %vm417_vm1, %v5403_v16  ;;  %v5406_v11 = vmax.f32 %v5374_v41, 0.0  ;;  %v5372_v27 = vadd.f32 %v10341_v42, %v5333_v43 }
 0x546   : > { %5438 = vst.msk [vmem:[%s10355_s19 + $0x38] sm:$0xff] %vm417_vm1, %v5406_v11  ;;  %v5404_v6 = vmax.f32 %v5372_v27, 0.0 }
 0x548   : > { %5436 = vst.msk [vmem:[%s10355_s19 + $0x28] sm:$0xff] %vm417_vm1, %v5404_v6 }
 0x55b   : > { %v5799_v45 = vpop.f32.mrf.mxu0 }
 0x55c   : > { %v5338_v44 = vmul.f32 %v5799_v45, %v10326_v7 }
 0x55d   : > { %v5226_v33 = vpop.f32.mrf.mxu0 }
 0x55e   : > { %v5377_v24 = vadd.f32 %v10341_v42, %v5338_v44  ;;  %v5336_v51 = vmul.f32 %v10326_v7, %v5226_v33 }
 0x55f   : > { %v5800_v17 = vpop.f32.mrf.mxu0 }
 0x560   : > { %v5409_v8 = vmax.f32 %v5377_v24, 0.0  ;;  %v5375_v38 = vadd.f32 %v10341_v42, %v5336_v51  ;;  %v5339_v1 = vmul.f32 %v5800_v17, %v10326_v7 }
 0x561   : > { %v5229_v49 = vpop.f32.mrf.mxu0 }
 0x562   : > { %5441 = vst.msk [vmem:[%s10355_s19 + $0x50] sm:$0xff] %vm417_vm1, %v5409_v8  ;;  %v5407_v4 = vmax.f32 %v5375_v38, 0.0  ;;  %v5378_v21 = vadd.f32 %v10341_v42, %v5339_v1  ;;  %v5337_v2 = vmul.f32 %v10326_v7, %v5229_v49 }
 0x564   : > { %5439 = vst.msk [vmem:[%s10355_s19 + $0x40] sm:$0xff] %vm417_vm1, %v5407_v4  ;;  %v5410_v37 = vmax.f32 %v5378_v21, 0.0  ;;  %v5376_v23 = vadd.f32 %v10341_v42, %v5337_v2 }
 0x566   : > { %5442 = vst.msk [vmem:[%s10355_s19 + $0x58] sm:$0xff] %vm417_vm1, %v5410_v37  ;;  %v5408_v59 = vmax.f32 %v5376_v23, 0.0 }
 0x568   : > { %5440 = vst.msk [vmem:[%s10355_s19 + $0x48] sm:$0xff] %vm417_vm1, %v5408_v59 }
 0x57d   : > { %v5803_v32 = vpop.f32.mrf.mxu0 }
 0x57e   : > { %v5342_v15 = vmul.f32 %v5803_v32, %v10326_v7 }
 0x57f   : > { %v5242_v57 = vpop.f32.mrf.mxu0 }
 0x580   : > { %v5381_v19 = vadd.f32 %v10341_v42, %v5342_v15  ;;  %v5340_v58 = vmul.f32 %v10326_v7, %v5242_v57 }
 0x581   : > { %v5804_v25 = vpop.f32.mrf.mxu0 }
 0x582   : > { %v5413_v34 = vmax.f32 %v5381_v19, 0.0  ;;  %v5379_v62 = vadd.f32 %v10341_v42, %v5340_v58  ;;  %v5343_v30 = vmul.f32 %v5804_v25, %v10326_v7 }
 0x583   : > { %v5245_v53 = vpop.f32.mrf.mxu0 }
 0x584   : > { %5445 = vst.msk [vmem:[%s10355_s19 + $0x70] sm:$0xff] %vm417_vm1, %v5413_v34  ;;  %v5411_v28 = vmax.f32 %v5379_v62, 0.0  ;;  %v5382_v46 = vadd.f32 %v10341_v42, %v5343_v30  ;;  %v5341_v56 = vmul.f32 %v10326_v7, %v5245_v53 }
 0x586   : > { %5443 = vst.msk [vmem:[%s10355_s19 + $0x60] sm:$0xff] %vm417_vm1, %v5411_v28  ;;  %v5414_v26 = vmax.f32 %v5382_v46, 0.0  ;;  %v5380_v29 = vadd.f32 %v10341_v42, %v5341_v56 }
 0x588   : > { %5446 = vst.msk [vmem:[%s10355_s19 + $0x78] sm:$0xff] %vm417_vm1, %v5414_v26  ;;  %v5412_v55 = vmax.f32 %v5380_v29, 0.0 }
 0x58a   : > { %5444 = vst.msk [vmem:[%s10355_s19 + $0x68] sm:$0xff] %vm417_vm1, %v5412_v55 }
 0x59d   : > { %v5807_v52 = vpop.f32.mrf.mxu0 }
 0x59e   : > { %v5346_v61 = vmul.f32 %v5807_v52, %v10326_v7 }
 0x59f   : > { %v5258_v39 = vpop.f32.mrf.mxu0 }
 0x5a0   : > { %v5385_v13 = vadd.f32 %v10341_v42, %v5346_v61  ;;  %v5344_v47 = vmul.f32 %v10326_v7, %v5258_v39 }
 0x5a1   : > { %v5808_v36 = vpop.f32.mrf.mxu0 }
 0x5a2   : > { %v5417_v31 = vmax.f32 %v5385_v13, 0.0  ;;  %v5383_v0 = vadd.f32 %v10341_v42, %v5344_v47  ;;  %v5347_v3 = vmul.f32 %v5808_v36, %v10326_v7 }
 0x5a3   : > { %v5261_v20 = vpop.f32.mrf.mxu0 }
 0x5a4   : > { %5449 = vst.msk [vmem:[%s10355_s19 + $0x90] sm:$0xff] %vm417_vm1, %v5417_v31  ;;  %v5415_v22 = vmax.f32 %v5383_v0, 0.0  ;;  %v5386_v35 = vadd.f32 %v10341_v42, %v5347_v3  ;;  %v5345_v63 = vmul.f32 %v10326_v7, %v5261_v20 }
 0x5a6   : > { %5447 = vst.msk [vmem:[%s10355_s19 + $0x80] sm:$0xff] %vm417_vm1, %v5415_v22  ;;  %v5418_v54 = vmax.f32 %v5386_v35, 0.0  ;;  %v5384_v10 = vadd.f32 %v10341_v42, %v5345_v63 }
 0x5a8   : > { %5450 = vst.msk [vmem:[%s10355_s19 + $0x98] sm:$0xff] %vm417_vm1, %v5418_v54  ;;  %v5416_v9 = vmax.f32 %v5384_v10, 0.0 }
 0x5aa   : > { %5448 = vst.msk [vmem:[%s10355_s19 + $0x88] sm:$0xff] %vm417_vm1, %v5416_v9 }
 0x5bd   : > { %v5811_v12 = vpop.f32.mrf.mxu0 }
 0x5be   : > { %v5350_v60 = vmul.f32 %v5811_v12, %v10326_v7 }
 0x5bf   : > { %v5274_v48 = vpop.f32.mrf.mxu0 }
 0x5c0   : > { %v5389_v14 = vadd.f32 %v10341_v42, %v5350_v60  ;;  %v5348_v18 = vmul.f32 %v10326_v7, %v5274_v48 }
 0x5c1   : > { %v5812_v40 = vpop.f32.mrf.mxu0 }
 0x5c2   : > { %v5421_v5 = vmax.f32 %v5389_v14, 0.0  ;;  %v5387_v50 = vadd.f32 %v10341_v42, %v5348_v18  ;;  %v5351_v16 = vmul.f32 %v5812_v40, %v10326_v7 }
 0x5c3   : > { %v5277_v41 = vpop.f32.mrf.mxu0 }
 0x5c4   : > { %5453 = vst.msk [vmem:[%s10355_s19 + $0xb0] sm:$0xff] %vm417_vm1, %v5421_v5  ;;  %v5419_v43 = vmax.f32 %v5387_v50, 0.0  ;;  %v5390_v11 = vadd.f32 %v10341_v42, %v5351_v16  ;;  %v5349_v27 = vmul.f32 %v10326_v7, %v5277_v41 }
 0x5c6   : > { %5451 = vst.msk [vmem:[%s10355_s19 + $0xa0] sm:$0xff] %vm417_vm1, %v5419_v43  ;;  %v5422_v6 = vmax.f32 %v5390_v11, 0.0  ;;  %v5388_v45 = vadd.f32 %v10341_v42, %v5349_v27 }
 0x5c8   : > { %5454 = vst.msk [vmem:[%s10355_s19 + $0xb8] sm:$0xff] %vm417_vm1, %v5422_v6  ;;  %v5420_v44 = vmax.f32 %v5388_v45, 0.0 }
 0x5ca   : > { %5452 = vst.msk [vmem:[%s10355_s19 + $0xa8] sm:$0xff] %vm417_vm1, %v5420_v44 }
 0x5d5   : > { %v5815_v33 = vpop.f32.mrf.mxu0 }
 0x5d6   : > { %v5354_v24 = vmul.f32 %v5815_v33, %v10326_v7 }
 0x5d7   : > { %v5290_v51 = vpop.f32.mrf.mxu0 }
 0x5d8   : > { %v5393_v17 = vadd.f32 %v10341_v42, %v5354_v24  ;;  %v5352_v8 = vmul.f32 %v10326_v7, %v5290_v51 }
 0x5d9   : > { %v5816_v38 = vpop.f32.mrf.mxu0 }
 0x5da   : > { %v5425_v1 = vmax.f32 %v5393_v17, 0.0  ;;  %v5391_v49 = vadd.f32 %v10341_v42, %v5352_v8  ;;  %v5355_v4 = vmul.f32 %v5816_v38, %v10326_v7 }
 0x5db   : > { %v5293_v21 = vpop.f32.mrf.mxu0 }
 0x5dc   : > { %5457 = vst.msk [vmem:[%s10355_s19 + $0xd0] sm:$0xff] %vm417_vm1, %v5425_v1  ;;  %v5423_v2 = vmax.f32 %v5391_v49, 0.0  ;;  %v5394_v37 = vadd.f32 %v10341_v42, %v5355_v4  ;;  %v5353_v23 = vmul.f32 %v10326_v7, %v5293_v21 }
 0x5de   : > { %5455 = vst.msk [vmem:[%s10355_s19 + $0xc0] sm:$0xff] %vm417_vm1, %v5423_v2  ;;  %v5426_v59 = vmax.f32 %v5394_v37, 0.0  ;;  %v5392_v32 = vadd.f32 %v10341_v42, %v5353_v23 }
 0x5e0   : > { %5458 = vst.msk [vmem:[%s10355_s19 + $0xd8] sm:$0xff] %vm417_vm1, %v5426_v59  ;;  %v5424_v15 = vmax.f32 %v5392_v32, 0.0 }
 0x5e2   : > { %5456 = vst.msk [vmem:[%s10355_s19 + $0xc8] sm:$0xff] %vm417_vm1, %v5424_v15  ;;  %v5819_v57 = vpop.f32.mrf.mxu0 }
 0x5e3   : > { %v5358_v19 = vmul.f32 %v5819_v57, %v10326_v7 }
 0x5e4   : > { %v5306_v58 = vpop.f32.mrf.mxu0 }
 0x5e5   : > { %v5397_v25 = vadd.f32 %v10341_v42, %v5358_v19  ;;  %v5356_v34 = vmul.f32 %v10326_v7, %v5306_v58 }
 0x5e6   : > { %v5820_v62 = vpop.f32.mrf.mxu0 }
 0x5e7   : > { %v5429_v30 = vmax.f32 %v5397_v25, 0.0  ;;  %v5395_v53 = vadd.f32 %v10341_v42, %v5356_v34  ;;  %v5359_v28 = vmul.f32 %v5820_v62, %v10326_v7 }
 0x5e8   : > { %v5309_v46 = vpop.f32.mrf.mxu0 }
 0x5e9   : > { %5461 = vst.msk [vmem:[%s10355_s19 + $0xf0] sm:$0xff] %vm417_vm1, %v5429_v30  ;;  %v5427_v56 = vmax.f32 %v5395_v53, 0.0  ;;  %v5398_v26 = vadd.f32 %v10341_v42, %v5359_v28  ;;  %v5357_v29 = vmul.f32 %v10326_v7, %v5309_v46 }
 0x5eb   : > { %5459 = vst.msk [vmem:[%s10355_s19 + $0xe0] sm:$0xff] %vm417_vm1, %v5427_v56  ;;  %v5430_v55 = vmax.f32 %v5398_v26, 0.0  ;;  %v5396_v52 = vadd.f32 %v10341_v42, %v5357_v29 }
 0x5ed   : > { %5462 = vst.msk [vmem:[%s10355_s19 + $0xf8] sm:$0xff] %vm417_vm1, %v5430_v55  ;;  %v5428_v61 = vmax.f32 %v5396_v52, 0.0 }
 0x5ef   : > { %5460 = vst.msk [vmem:[%s10355_s19 + $0xe8] sm:$0xff] %vm417_vm1, %v5428_v61 }
 0x5f0 PF: > { %s20_s13 = sadd.s32 1, %s7211_s13  }
 0x5f1   : > { %p17_p4 = scmp.ge.s32.totalorder %s20_s13, 4  }
 0x5f3   :  { %19 = sbr.rel (!%p17_p4) target bundleno = 1 (0x1), region = 95 }

</bundles_post_ra>
